<compile_context>
chip_gen: v7x
topology: tpu7x:2x2x1
jax: 0.10.0
libtpu: 0.0.40
codegen_flags: <defaults>
</compile_context>

<pallas_src>
import functools

import numpy as np
import jax
import jax.numpy as jnp
from jax import lax
from jax.experimental import pallas as pl
from jax.experimental.pallas import tpu as pltpu


_MASK_VALUE = -1e30   # finite "minus infinity": avoids NaN if a row ever becomes fully masked


# ----------------------------------------------------------------------------
# Kernel
# ----------------------------------------------------------------------------
def _attention_kernel(z_ref, pos_ref, u_ref, wqkv_ref, wr_ref, rwb_ref, rrb_ref,
                      wo_ref, bo_ref, o_ref, vec_ref, *,
                      n_head, d_head, qlen, mlen, local_size, scale):
    klen = qlen + mlen
    nd = n_head * d_head

    z = z_ref[0]                 # (d_model, qlen) f32 — kept f32 for residual / LayerNorm
    u = u_ref[0]                 # (3*nd, klen)    f32

    # qkv_net / r_net are Conv1d(kernel=1, bias=False) -> plain channel matmuls.
    # bf16 MXU operands, f32 accumulation.
    z_bf = z.astype(jnp.bfloat16)
    w_heads = jnp.dot(wqkv_ref[...], z_bf,
                      preferred_element_type=jnp.float32) + u              # (3*nd, klen) f32
    r_head_k = jnp.dot(wr_ref[...], pos_ref[...],
                       preferred_element_type=jnp.float32)                 # (nd, rlen) f32

    # Cast the K/V slab and the relative-key slab to bf16 once (outside head loop).
    q_all = w_heads[:nd, klen - qlen:]                                     # (nd, qlen) f32
    kv_bf = w_heads[nd:, :].astype(jnp.bfloat16)                           # (2*nd, klen) bf16
    r_bf = r_head_k.astype(jnp.bfloat16)                                   # (nd, rlen) bf16

    # Causal (triu, diag=1+mlen) OR local-window (tril, diag=mlen-local_size) mask.
    qi = lax.broadcasted_iota(jnp.int32, (qlen, klen), 0)
    kj = lax.broadcasted_iota(jnp.int32, (qlen, klen), 1)
    mask = (kj > qi + mlen) | (kj <= qi + (mlen - local_size))

    # n_head is small & static -> unrolled loop; each head's result goes straight
    # into the VMEM scratch slab (no concatenate / relayout copies).
    for h in range(n_head):
        q_h = q_all[h * d_head:(h + 1) * d_head, :]                        # (dh, qlen) f32
        k_h = kv_bf[h * d_head:(h + 1) * d_head, :]                        # (dh, klen) bf16
        v_h = kv_bf[nd + h * d_head: nd + (h + 1) * d_head, :]             # (dh, klen) bf16
        r_h = r_bf[h * d_head:(h + 1) * d_head, :]                         # (dh, rlen) bf16

        # Fold the 1/sqrt(d_head) scale into the small query tensors.
        rw_q = ((q_h + rwb_ref[h]) * scale).astype(jnp.bfloat16)
        rr_q = ((q_h + rrb_ref[h]) * scale).astype(jnp.bfloat16)

        ac = jnp.einsum('di,dj->ij', rw_q, k_h,
                        preferred_element_type=jnp.float32)                # (qlen, klen)
        bd = jnp.einsum('di,dj->ij', rr_q, r_h,
                        preferred_element_type=jnp.float32)                # (qlen, rlen)

        # Transformer-XL relative shift: out[i, j] = bd[i, (j - i + klen - 1) mod klen],
        # implemented as a uniform lane roll followed by a sublane-strided lane roll
        # (pure XLU work; per-row rotate amounts stay in [0, klen-1]).
        # Wrapped (future) entries differ from the torch pad/view trick but are
        # killed by the causal mask below — keep that invariant if this is changed.
        bd = pltpu.roll(bd, shift=mlen + 1, axis=1)
        bd = pltpu.roll(bd, shift=0, axis=1, stride=1, stride_axis=0)

        score = jnp.where(mask, _MASK_VALUE, ac + bd)

        m = jnp.max(score, axis=-1, keepdims=True)
        p = jnp.exp(score - m)
        l = jnp.sum(p, axis=-1, keepdims=True)
        prob = p * pl.reciprocal(l, approx=True)
        # TODO(synk): dropatt / variational dropout omitted (identity in eval mode).

        vec_ref[h * d_head:(h + 1) * d_head, :] = jnp.einsum(
            'ij,dj->di', prob.astype(jnp.bfloat16), v_h,
            preferred_element_type=jnp.float32)                            # (dh, qlen)

    # o_net (Conv1d kernel=1, with bias) + residual.
    attn_vec = vec_ref[...]                                                # (nd, qlen) f32
    attn_out = jnp.dot(wo_ref[...], attn_vec.astype(jnp.bfloat16),
                       preferred_element_type=jnp.float32) + bo_ref[...]
    out = attn_out + z

    # Post LayerNorm over the channel (d_model) axis, eps=1e-5, no affine params.
    mean = jnp.mean(out, axis=0, keepdims=True)
    var = jnp.mean((out - mean) ** 2, axis=0, keepdims=True)
    o_ref[0] = ((out - mean) * lax.rsqrt(var + 1e-5)).astype(o_ref.dtype)


# ----------------------------------------------------------------------------
# Wrapper
# ----------------------------------------------------------------------------
def attention_forward(z, pos_emb, u, params, *, n_head, d_head, local_size=None):
    bsz, d_model, qlen = z.shape
    mlen = 0                      # mems=None path
    klen = qlen + mlen
    rlen = pos_emb.shape[-1]
    assert rlen == klen
    scale = 1.0 / (d_head ** 0.5)
    ls = local_size if local_size is not None else 1000
    nd = n_head * d_head
    nd3 = 3 * nd

    # Weights go in as bf16 (native MXU input); biases / activations stay f32.
    wqkv = params['w_qkv'].astype(jnp.bfloat16)                   # (3*nd, d_model)
    wr = params['w_r'].astype(jnp.bfloat16)                       # (nd, d_model)
    wo = params['w_o'].astype(jnp.bfloat16)                       # (d_model, nd)
    rwb = params['r_w_bias'].reshape(n_head, d_head, 1).astype(jnp.float32)
    rrb = params['r_r_bias'].reshape(n_head, d_head, 1).astype(jnp.float32)
    bo = params['b_o'].reshape(d_model, 1).astype(jnp.float32)
    pos2d = pos_emb.reshape(d_model, rlen).astype(jnp.bfloat16)
    # TODO(synk): on bandwidth-bound v5e, feed z/u as bf16 at this boundary too.
    # TODO(synk): for long sequences, add a q-tile grid axis (flash-style k streaming)
    #             so the per-step working set fits v7x's 64 MiB VMEM.

    kernel = functools.partial(
        _attention_kernel, n_head=n_head, d_head=d_head, qlen=qlen,
        mlen=mlen, local_size=ls, scale=scale)

    flops = 2 * bsz * (
        3 * nd * d_model * klen               # qkv projection
        + nd * d_model * rlen                 # r projection (per grid step)
        + 2 * n_head * d_head * qlen * klen   # AC + BD
        + n_head * d_head * qlen * klen       # prob @ v
        + d_model * nd * qlen                 # output projection
    )
    bytes_accessed = int(
        z.size * 4 + u.size * 4 + pos2d.size * 2
        + wqkv.size * 2 + wr.size * 2 + wo.size * 2
        + rwb.size * 4 + rrb.size * 4 + bo.size * 4
        + bsz * d_model * qlen * 4)
    cost = pl.CostEstimate(flops=int(flops),
                           transcendentals=int(bsz * n_head * qlen * klen),
                           bytes_accessed=bytes_accessed)

    return pl.pallas_call(
        kernel,
        out_shape=jax.ShapeDtypeStruct((bsz, d_model, qlen), jnp.float32),
        grid_spec=pltpu.PrefetchScalarGridSpec(
            num_scalar_prefetch=0,
            grid=(bsz,),
            in_specs=[
                pl.BlockSpec((1, d_model, qlen), lambda b: (b, 0, 0)),   # z (f32)
                pl.BlockSpec((d_model, rlen), lambda b: (0, 0)),         # pos_emb (bf16)
                pl.BlockSpec((1, nd3, klen), lambda b: (b, 0, 0)),       # u (f32)
                pl.BlockSpec((nd3, d_model), lambda b: (0, 0)),          # W_qkv (bf16)
                pl.BlockSpec((nd, d_model), lambda b: (0, 0)),           # W_r (bf16)
                pl.BlockSpec((n_head, d_head, 1), lambda b: (0, 0, 0)),  # r_w_bias
                pl.BlockSpec((n_head, d_head, 1), lambda b: (0, 0, 0)),  # r_r_bias
                pl.BlockSpec((d_model, nd), lambda b: (0, 0)),           # W_o (bf16)
                pl.BlockSpec((d_model, 1), lambda b: (0, 0)),            # b_o
            ],
            out_specs=pl.BlockSpec((1, d_model, qlen), lambda b: (b, 0, 0)),
            scratch_shapes=[pltpu.VMEM((nd, qlen), jnp.float32)],        # attn_vec slab
        ),
        compiler_params=pltpu.CompilerParams(
            dimension_semantics=("parallel",),
            vmem_limit_bytes=64 * 1024 * 1024),
        cost_estimate=cost,
    )(z, pos2d, u, wqkv, wr, rwb, rrb, wo, bo)


# ----------------------------------------------------------------------------
# Pure-JAX reference mirroring the PyTorch forward (for verification)
# ----------------------------------------------------------------------------
def reference_forward(z, pos_emb, u, params, *, n_head, d_head, local_size=None):
    bsz, d_model, qlen = z.shape
    mlen = 0
    klen = qlen
    rlen = pos_emb.shape[-1]
    scale = 1.0 / d_head ** 0.5
    nd = n_head * d_head
    hp = jax.lax.Precision.HIGHEST

    w_heads = jnp.einsum('oc,bcl->bol', params['w_qkv'], z, precision=hp) + u
    r_head_k = jnp.einsum('oc,cl->ol', params['w_r'], pos_emb[0], precision=hp)

    w_head_q, w_head_k, w_head_v = jnp.split(w_heads, 3, axis=1)
    w_head_q = w_head_q[:, :, -qlen:]
    q = w_head_q.reshape(bsz, n_head, d_head, qlen)
    k = w_head_k.reshape(bsz, n_head, d_head, klen)
    v = w_head_v.reshape(bsz, n_head, d_head, klen)
    r = r_head_k.reshape(n_head, d_head, rlen)

    rwb, rrb = params['r_w_bias'], params['r_r_bias']
    AC = jnp.einsum('bndi,bndj->bnij', q + rwb[None, :, :, None], k, precision=hp)
    BD = jnp.einsum('bndi,ndj->bnij', q + rrb[None, :, :, None], r, precision=hp)

    # _rel_shift (exact torch pad/view trick)
    xp = jnp.pad(BD, ((0, 0), (0, 0), (0, 0), (1, 0)))
    xp = xp.reshape(bsz, n_head, rlen + 1, qlen)
    BD = xp[:, :, 1:, :].reshape(bsz, n_head, qlen, rlen)

    score = (AC + BD) * scale
    ls = local_size if local_size is not None else 1000
    qi = jnp.arange(qlen)[:, None]
    kj = jnp.arange(klen)[None, :]
    mask = (kj > qi + mlen) | (kj <= qi + (mlen - ls))
    score = jnp.where(mask[None, None], -jnp.inf, score)
    prob = jax.nn.softmax(score, axis=-1)

    vec = jnp.einsum('bnij,bndj->bndi', prob, v, precision=hp).reshape(bsz, nd, qlen)
    out = jnp.einsum('oc,bcl->bol', params['w_o'], vec, precision=hp) \
        + params['b_o'][None, :, None] + z
    mean = out.mean(axis=1, keepdims=True)
    var = ((out - mean) ** 2).mean(axis=1, keepdims=True)
    return (out - mean) / jnp.sqrt(var + 1e-5)


if __name__ == "__main__":
    # Small but lane-dense shapes: qlen = klen = 128 (multiple of 128), d_head = 32.
    bsz, d_model, n_head, d_head, qlen = 2, 128, 4, 32, 128
    key = jax.random.PRNGKey(0)
    ks = jax.random.split(key, 9)

    z = jax.random.normal(ks[0], (bsz, d_model, qlen), jnp.float32)
    pos_emb = jax.random.normal(ks[1], (1, d_model, qlen), jnp.float32)
    u = 0.1 * jax.random.normal(ks[2], (bsz, 3 * n_head * d_head, qlen), jnp.float32)

    params = {
        'w_qkv': 0.05 * jax.random.normal(ks[3], (3 * n_head * d_head, d_model), jnp.float32),
        'w_r': 0.05 * jax.random.normal(ks[4], (n_head * d_head, d_model), jnp.float32),
        'r_w_bias': jax.random.uniform(ks[5], (n_head, d_head), jnp.float32, -0.05, 0.05),
        'r_r_bias': jax.random.uniform(ks[6], (n_head, d_head), jnp.float32, -0.05, 0.05),
        'w_o': 0.05 * jax.random.normal(ks[7], (d_model, n_head * d_head), jnp.float32),
        'b_o': 0.05 * jax.random.normal(ks[8], (d_model,), jnp.float32),
    }

    out = attention_forward(z, pos_emb, u, params, n_head=n_head, d_head=d_head)
    out = jax.block_until_ready(out)
    assert out.shape == (bsz, d_model, qlen)

    ref = reference_forward(z, pos_emb, u, params, n_head=n_head, d_head=d_head)
    # bf16 MXU operands vs. HIGHEST-precision f32 reference -> loose tolerances.
    np.testing.assert_allclose(np.asarray(out), np.asarray(ref), rtol=2e-2, atol=2e-2)

    print("KERNEL_OK")
</pallas_src>

<mosaic_0001>
module attributes {stable_mosaic.version = 11 : i64} {
  func.func @_attention_kernel(%arg0: i32, %arg1: memref<1x128x128xf32, #tpu.memory_space<vmem>>, %arg2: memref<128x128xbf16, #tpu.memory_space<vmem>>, %arg3: memref<1x384x128xf32, #tpu.memory_space<vmem>>, %arg4: memref<384x128xbf16, #tpu.memory_space<vmem>>, %arg5: memref<128x128xbf16, #tpu.memory_space<vmem>>, %arg6: memref<4x32x1xf32, #tpu.memory_space<vmem>>, %arg7: memref<4x32x1xf32, #tpu.memory_space<vmem>>, %arg8: memref<128x128xbf16, #tpu.memory_space<vmem>>, %arg9: memref<128x1xf32, #tpu.memory_space<vmem>>, %arg10: memref<1x128x128xf32, #tpu.memory_space<vmem>>, %arg11: memref<128x128xf32, #tpu.memory_space<vmem>>) attributes {dimension_semantics = [#tpu.dimension_semantics<parallel>], iteration_bounds = array<i64: 2>, scalar_prefetch = 0 : i64, scratch_operands = 1 : i64, tpu.core_type = #tpu.core_type<tc>, window_params = [{transform_indices = @transform_0, window_bounds = array<i64: 1, 128, 128>}, {pipeline_mode = #tpu.pipeline_mode<synchronous>, transform_indices = @transform_1, window_bounds = array<i64: 128, 128>}, {transform_indices = @transform_2, window_bounds = array<i64: 1, 384, 128>}, {pipeline_mode = #tpu.pipeline_mode<synchronous>, transform_indices = @transform_3, window_bounds = array<i64: 384, 128>}, {pipeline_mode = #tpu.pipeline_mode<synchronous>, transform_indices = @transform_4, window_bounds = array<i64: 128, 128>}, {pipeline_mode = #tpu.pipeline_mode<synchronous>, transform_indices = @transform_5, window_bounds = array<i64: 4, 32, 1>}, {pipeline_mode = #tpu.pipeline_mode<synchronous>, transform_indices = @transform_6, window_bounds = array<i64: 4, 32, 1>}, {pipeline_mode = #tpu.pipeline_mode<synchronous>, transform_indices = @transform_7, window_bounds = array<i64: 128, 128>}, {pipeline_mode = #tpu.pipeline_mode<synchronous>, transform_indices = @transform_8, window_bounds = array<i64: 128, 1>}, {transform_indices = @transform_9, window_bounds = array<i64: 1, 128, 128>}]} {
    %c0 = arith.constant 0 : index
    %c0_0 = arith.constant 0 : index
    %c0_1 = arith.constant 0 : index
    %0 = vector.load %arg1[%c0, %c0_0, %c0_1] : memref<1x128x128xf32, #tpu.memory_space<vmem>>, vector<1x128x128xf32>
    %1 = vector.shape_cast %0 : vector<1x128x128xf32> to vector<128x128xf32>
    %c0_2 = arith.constant 0 : index
    %c0_3 = arith.constant 0 : index
    %c0_4 = arith.constant 0 : index
    %2 = vector.load %arg3[%c0_2, %c0_3, %c0_4] : memref<1x384x128xf32, #tpu.memory_space<vmem>>, vector<1x384x128xf32>
    %3 = vector.shape_cast %2 : vector<1x384x128xf32> to vector<384x128xf32>
    %4 = arith.truncf %1 : vector<128x128xf32> to vector<128x128xbf16>
    %c0_5 = arith.constant 0 : index
    %c0_6 = arith.constant 0 : index
    %5 = vector.load %arg4[%c0_5, %c0_6] : memref<384x128xbf16, #tpu.memory_space<vmem>>, vector<384x128xbf16>
    %cst = arith.constant dense<0.000000e+00> : vector<384x128xf32>
    %6 = tpu.matmul %5, %4, %cst {dimension_numbers = #tpu.dot_dimension_numbers<[1], [0], [0], [1], [0, 0, 1, 1], [], []>} : vector<384x128xbf16>, vector<128x128xbf16>, vector<384x128xf32> -> vector<384x128xf32>
    %7 = arith.addf %6, %3 : vector<384x128xf32>
    %c0_7 = arith.constant 0 : index
    %c0_8 = arith.constant 0 : index
    %8 = vector.load %arg5[%c0_7, %c0_8] : memref<128x128xbf16, #tpu.memory_space<vmem>>, vector<128x128xbf16>
    %c0_9 = arith.constant 0 : index
    %c0_10 = arith.constant 0 : index
    %9 = vector.load %arg2[%c0_9, %c0_10] : memref<128x128xbf16, #tpu.memory_space<vmem>>, vector<128x128xbf16>
    %cst_11 = arith.constant dense<0.000000e+00> : vector<128x128xf32>
    %10 = tpu.matmul %8, %9, %cst_11 {dimension_numbers = #tpu.dot_dimension_numbers<[1], [0], [0], [1], [0, 0, 1, 1], [], []>} : vector<128x128xbf16>, vector<128x128xbf16>, vector<128x128xf32> -> vector<128x128xf32>
    %11 = vector.extract_strided_slice %7 {offsets = [0, 0], sizes = [128, 128], strides = [1, 1]} : vector<384x128xf32> to vector<128x128xf32>
    %12 = vector.extract_strided_slice %7 {offsets = [128, 0], sizes = [256, 128], strides = [1, 1]} : vector<384x128xf32> to vector<256x128xf32>
    %13 = arith.truncf %12 : vector<256x128xf32> to vector<256x128xbf16>
    %14 = arith.truncf %10 : vector<128x128xf32> to vector<128x128xbf16>
    %15 = tpu.iota {dimensions = array<i32: 0>} : vector<128x128xi32>
    %16 = tpu.iota {dimensions = array<i32: 1>} : vector<128x128xi32>
    %c0_i32 = arith.constant 0 : i32
    %17 = vector.broadcast %c0_i32 : i32 to vector<128x128xi32>
    %18 = arith.addi %15, %17 : vector<128x128xi32>
    %19 = arith.cmpi sgt, %16, %18 : vector<128x128xi32>
    %c-1000_i32 = arith.constant -1000 : i32
    %20 = vector.broadcast %c-1000_i32 : i32 to vector<128x128xi32>
    %21 = arith.addi %15, %20 : vector<128x128xi32>
    %22 = arith.cmpi sle, %16, %21 : vector<128x128xi32>
    %23 = arith.ori %19, %22 : vector<128x128xi1>
    %24 = vector.extract_strided_slice %11 {offsets = [0, 0], sizes = [32, 128], strides = [1, 1]} : vector<128x128xf32> to vector<32x128xf32>
    %25 = vector.extract_strided_slice %13 {offsets = [0, 0], sizes = [32, 128], strides = [1, 1]} : vector<256x128xbf16> to vector<32x128xbf16>
    %26 = vector.extract_strided_slice %13 {offsets = [128, 0], sizes = [32, 128], strides = [1, 1]} : vector<256x128xbf16> to vector<32x128xbf16>
    %27 = vector.extract_strided_slice %14 {offsets = [0, 0], sizes = [32, 128], strides = [1, 1]} : vector<128x128xbf16> to vector<32x128xbf16>
    %c0_12 = arith.constant 0 : index
    %c0_13 = arith.constant 0 : index
    %c0_14 = arith.constant 0 : index
    %28 = vector.load %arg6[%c0_12, %c0_13, %c0_14] : memref<4x32x1xf32, #tpu.memory_space<vmem>>, vector<1x32x1xf32>
    %29 = vector.shape_cast %28 : vector<1x32x1xf32> to vector<32x1xf32>
    %30 = vector.broadcast %29 : vector<32x1xf32> to vector<32x128xf32>
    %31 = arith.addf %24, %30 : vector<32x128xf32>
    %cst_15 = arith.constant 0.176776692 : f32
    %32 = vector.broadcast %cst_15 : f32 to vector<32x128xf32>
    %33 = arith.mulf %31, %32 : vector<32x128xf32>
    %34 = arith.truncf %33 : vector<32x128xf32> to vector<32x128xbf16>
    %c0_16 = arith.constant 0 : index
    %c0_17 = arith.constant 0 : index
    %c0_18 = arith.constant 0 : index
    %35 = vector.load %arg7[%c0_16, %c0_17, %c0_18] : memref<4x32x1xf32, #tpu.memory_space<vmem>>, vector<1x32x1xf32>
    %36 = vector.shape_cast %35 : vector<1x32x1xf32> to vector<32x1xf32>
    %37 = vector.broadcast %36 : vector<32x1xf32> to vector<32x128xf32>
    %38 = arith.addf %24, %37 : vector<32x128xf32>
    %cst_19 = arith.constant 0.176776692 : f32
    %39 = vector.broadcast %cst_19 : f32 to vector<32x128xf32>
    %40 = arith.mulf %38, %39 : vector<32x128xf32>
    %41 = arith.truncf %40 : vector<32x128xf32> to vector<32x128xbf16>
    "tpu.trace_start"() <{level = 10 : i32, message = "di,dj->ij"}> : () -> ()
    %cst_20 = arith.constant dense<0.000000e+00> : vector<128x128xf32>
    %42 = tpu.matmul %34, %25, %cst_20 {dimension_numbers = #tpu.dot_dimension_numbers<[0], [0], [1], [1], [0, 1, 1, 1], [], []>} : vector<32x128xbf16>, vector<32x128xbf16>, vector<128x128xf32> -> vector<128x128xf32>
    %cst_21 = arith.constant dense<0.000000e+00> : vector<128x128xf32>
    %43 = tpu.matmul %41, %27, %cst_21 {dimension_numbers = #tpu.dot_dimension_numbers<[0], [0], [1], [1], [0, 1, 1, 1], [], []>} : vector<32x128xbf16>, vector<32x128xbf16>, vector<128x128xf32> -> vector<128x128xf32>
    %c1_i32 = arith.constant 1 : i32
    "tpu.trace_stop"() : () -> ()
    %44 = tpu.dynamic_rotate %43 by %c1_i32 dim 1 : vector<128x128xf32>, i32 -> vector<128x128xf32>
    %c0_i32_22 = arith.constant 0 : i32
    %45 = tpu.dynamic_rotate %44 by %c0_i32_22 dim 1 {stride = 1 : si32, stride_dimension = 0 : si32} : vector<128x128xf32>, i32 -> vector<128x128xf32>
    %46 = arith.addf %42, %45 : vector<128x128xf32>
    %cst_23 = arith.constant -1.000000e+30 : f32
    %47 = vector.broadcast %cst_23 : f32 to vector<128x128xf32>
    %48 = arith.select %23, %47, %46 : vector<128x128xi1>, vector<128x128xf32>
    %cst_24 = arith.constant dense<0xFF800000> : vector<128xf32>
    %49 = vector.multi_reduction <maximumf>, %48, %cst_24 [1] : vector<128x128xf32> to vector<128xf32>
    %50 = vector.shape_cast %49 : vector<128xf32> to vector<128x1xf32>
    %51 = vector.broadcast %50 : vector<128x1xf32> to vector<128x128xf32>
    %52 = arith.subf %48, %51 : vector<128x128xf32>
    %53 = math.exp %52 : vector<128x128xf32>
    %cst_25 = arith.constant dense<0.000000e+00> : vector<128xf32>
    %54 = vector.multi_reduction <add>, %53, %cst_25 [1] : vector<128x128xf32> to vector<128xf32>
    %55 = vector.shape_cast %54 : vector<128xf32> to vector<128x1xf32>
    %56 = tpu.reciprocal %55 {approx = true} : vector<128x1xf32> -> vector<128x1xf32>
    %57 = vector.broadcast %56 : vector<128x1xf32> to vector<128x128xf32>
    %58 = arith.mulf %53, %57 : vector<128x128xf32>
    %59 = arith.truncf %58 : vector<128x128xf32> to vector<128x128xbf16>
    "tpu.trace_start"() <{level = 10 : i32, message = "ij,dj->di"}> : () -> ()
    %cst_26 = arith.constant dense<0.000000e+00> : vector<32x128xf32>
    %60 = tpu.matmul %26, %59, %cst_26 {dimension_numbers = #tpu.dot_dimension_numbers<[1], [1], [0], [0], [0, 0, 1, 0], [], []>} : vector<32x128xbf16>, vector<128x128xbf16>, vector<32x128xf32> -> vector<32x128xf32>
    "tpu.trace_stop"() : () -> ()
    %c0_27 = arith.constant 0 : index
    %c0_28 = arith.constant 0 : index
    %61 = vector.load %arg11[%c0_27, %c0_28] : memref<128x128xf32, #tpu.memory_space<vmem>>, vector<32x128xf32>
    tpu.vector_store %arg11[%c0_27, %c0_28], %60 {strides = array<i32>} : memref<128x128xf32, #tpu.memory_space<vmem>>, vector<32x128xf32>,
    %62 = vector.extract_strided_slice %11 {offsets = [32, 0], sizes = [32, 128], strides = [1, 1]} : vector<128x128xf32> to vector<32x128xf32>
    %63 = vector.extract_strided_slice %13 {offsets = [32, 0], sizes = [32, 128], strides = [1, 1]} : vector<256x128xbf16> to vector<32x128xbf16>
    %64 = vector.extract_strided_slice %13 {offsets = [160, 0], sizes = [32, 128], strides = [1, 1]} : vector<256x128xbf16> to vector<32x128xbf16>
    %65 = vector.extract_strided_slice %14 {offsets = [32, 0], sizes = [32, 128], strides = [1, 1]} : vector<128x128xbf16> to vector<32x128xbf16>
    %c1 = arith.constant 1 : index
    %c0_29 = arith.constant 0 : index
    %c0_30 = arith.constant 0 : index
    %66 = vector.load %arg6[%c1, %c0_29, %c0_30] : memref<4x32x1xf32, #tpu.memory_space<vmem>>, vector<1x32x1xf32>
    %67 = vector.shape_cast %66 : vector<1x32x1xf32> to vector<32x1xf32>
    %68 = vector.broadcast %67 : vector<32x1xf32> to vector<32x128xf32>
    %69 = arith.addf %62, %68 : vector<32x128xf32>
    %cst_31 = arith.constant 0.176776692 : f32
    %70 = vector.broadcast %cst_31 : f32 to vector<32x128xf32>
    %71 = arith.mulf %69, %70 : vector<32x128xf32>
    %72 = arith.truncf %71 : vector<32x128xf32> to vector<32x128xbf16>
    %c1_32 = arith.constant 1 : index
    %c0_33 = arith.constant 0 : index
    %c0_34 = arith.constant 0 : index
    %73 = vector.load %arg7[%c1_32, %c0_33, %c0_34] : memref<4x32x1xf32, #tpu.memory_space<vmem>>, vector<1x32x1xf32>
    %74 = vector.shape_cast %73 : vector<1x32x1xf32> to vector<32x1xf32>
    %75 = vector.broadcast %74 : vector<32x1xf32> to vector<32x128xf32>
    %76 = arith.addf %62, %75 : vector<32x128xf32>
    %cst_35 = arith.constant 0.176776692 : f32
    %77 = vector.broadcast %cst_35 : f32 to vector<32x128xf32>
    %78 = arith.mulf %76, %77 : vector<32x128xf32>
    %79 = arith.truncf %78 : vector<32x128xf32> to vector<32x128xbf16>
    "tpu.trace_start"() <{level = 10 : i32, message = "di,dj->ij"}> : () -> ()
    %cst_36 = arith.constant dense<0.000000e+00> : vector<128x128xf32>
    %80 = tpu.matmul %72, %63, %cst_36 {dimension_numbers = #tpu.dot_dimension_numbers<[0], [0], [1], [1], [0, 1, 1, 1], [], []>} : vector<32x128xbf16>, vector<32x128xbf16>, vector<128x128xf32> -> vector<128x128xf32>
    %cst_37 = arith.constant dense<0.000000e+00> : vector<128x128xf32>
    %81 = tpu.matmul %79, %65, %cst_37 {dimension_numbers = #tpu.dot_dimension_numbers<[0], [0], [1], [1], [0, 1, 1, 1], [], []>} : vector<32x128xbf16>, vector<32x128xbf16>, vector<128x128xf32> -> vector<128x128xf32>
    %c1_i32_38 = arith.constant 1 : i32
    "tpu.trace_stop"() : () -> ()
    %82 = tpu.dynamic_rotate %81 by %c1_i32_38 dim 1 : vector<128x128xf32>, i32 -> vector<128x128xf32>
    %c0_i32_39 = arith.constant 0 : i32
    %83 = tpu.dynamic_rotate %82 by %c0_i32_39 dim 1 {stride = 1 : si32, stride_dimension = 0 : si32} : vector<128x128xf32>, i32 -> vector<128x128xf32>
    %84 = arith.addf %80, %83 : vector<128x128xf32>
    %cst_40 = arith.constant -1.000000e+30 : f32
    %85 = vector.broadcast %cst_40 : f32 to vector<128x128xf32>
    %86 = arith.select %23, %85, %84 : vector<128x128xi1>, vector<128x128xf32>
    %cst_41 = arith.constant dense<0xFF800000> : vector<128xf32>
    %87 = vector.multi_reduction <maximumf>, %86, %cst_41 [1] : vector<128x128xf32> to vector<128xf32>
    %88 = vector.shape_cast %87 : vector<128xf32> to vector<128x1xf32>
    %89 = vector.broadcast %88 : vector<128x1xf32> to vector<128x128xf32>
    %90 = arith.subf %86, %89 : vector<128x128xf32>
    %91 = math.exp %90 : vector<128x128xf32>
    %cst_42 = arith.constant dense<0.000000e+00> : vector<128xf32>
    %92 = vector.multi_reduction <add>, %91, %cst_42 [1] : vector<128x128xf32> to vector<128xf32>
    %93 = vector.shape_cast %92 : vector<128xf32> to vector<128x1xf32>
    %94 = tpu.reciprocal %93 {approx = true} : vector<128x1xf32> -> vector<128x1xf32>
    %95 = vector.broadcast %94 : vector<128x1xf32> to vector<128x128xf32>
    %96 = arith.mulf %91, %95 : vector<128x128xf32>
    %97 = arith.truncf %96 : vector<128x128xf32> to vector<128x128xbf16>
    "tpu.trace_start"() <{level = 10 : i32, message = "ij,dj->di"}> : () -> ()
    %cst_43 = arith.constant dense<0.000000e+00> : vector<32x128xf32>
    %98 = tpu.matmul %64, %97, %cst_43 {dimension_numbers = #tpu.dot_dimension_numbers<[1], [1], [0], [0], [0, 0, 1, 0], [], []>} : vector<32x128xbf16>, vector<128x128xbf16>, vector<32x128xf32> -> vector<32x128xf32>
    "tpu.trace_stop"() : () -> ()
    %c32 = arith.constant 32 : index
    %c0_44 = arith.constant 0 : index
    %99 = vector.load %arg11[%c32, %c0_44] : memref<128x128xf32, #tpu.memory_space<vmem>>, vector<32x128xf32>
    tpu.vector_store %arg11[%c32, %c0_44], %98 {strides = array<i32>} : memref<128x128xf32, #tpu.memory_space<vmem>>, vector<32x128xf32>,
    %100 = vector.extract_strided_slice %11 {offsets = [64, 0], sizes = [32, 128], strides = [1, 1]} : vector<128x128xf32> to vector<32x128xf32>
    %101 = vector.extract_strided_slice %13 {offsets = [64, 0], sizes = [32, 128], strides = [1, 1]} : vector<256x128xbf16> to vector<32x128xbf16>
    %102 = vector.extract_strided_slice %13 {offsets = [192, 0], sizes = [32, 128], strides = [1, 1]} : vector<256x128xbf16> to vector<32x128xbf16>
    %103 = vector.extract_strided_slice %14 {offsets = [64, 0], sizes = [32, 128], strides = [1, 1]} : vector<128x128xbf16> to vector<32x128xbf16>
    %c2 = arith.constant 2 : index
    %c0_45 = arith.constant 0 : index
    %c0_46 = arith.constant 0 : index
    %104 = vector.load %arg6[%c2, %c0_45, %c0_46] : memref<4x32x1xf32, #tpu.memory_space<vmem>>, vector<1x32x1xf32>
    %105 = vector.shape_cast %104 : vector<1x32x1xf32> to vector<32x1xf32>
    %106 = vector.broadcast %105 : vector<32x1xf32> to vector<32x128xf32>
    %107 = arith.addf %100, %106 : vector<32x128xf32>
    %cst_47 = arith.constant 0.176776692 : f32
    %108 = vector.broadcast %cst_47 : f32 to vector<32x128xf32>
    %109 = arith.mulf %107, %108 : vector<32x128xf32>
    %110 = arith.truncf %109 : vector<32x128xf32> to vector<32x128xbf16>
    %c2_48 = arith.constant 2 : index
    %c0_49 = arith.constant 0 : index
    %c0_50 = arith.constant 0 : index
    %111 = vector.load %arg7[%c2_48, %c0_49, %c0_50] : memref<4x32x1xf32, #tpu.memory_space<vmem>>, vector<1x32x1xf32>
    %112 = vector.shape_cast %111 : vector<1x32x1xf32> to vector<32x1xf32>
    %113 = vector.broadcast %112 : vector<32x1xf32> to vector<32x128xf32>
    %114 = arith.addf %100, %113 : vector<32x128xf32>
    %cst_51 = arith.constant 0.176776692 : f32
    %115 = vector.broadcast %cst_51 : f32 to vector<32x128xf32>
    %116 = arith.mulf %114, %115 : vector<32x128xf32>
    %117 = arith.truncf %116 : vector<32x128xf32> to vector<32x128xbf16>
    "tpu.trace_start"() <{level = 10 : i32, message = "di,dj->ij"}> : () -> ()
    %cst_52 = arith.constant dense<0.000000e+00> : vector<128x128xf32>
    %118 = tpu.matmul %110, %101, %cst_52 {dimension_numbers = #tpu.dot_dimension_numbers<[0], [0], [1], [1], [0, 1, 1, 1], [], []>} : vector<32x128xbf16>, vector<32x128xbf16>, vector<128x128xf32> -> vector<128x128xf32>
    %cst_53 = arith.constant dense<0.000000e+00> : vector<128x128xf32>
    %119 = tpu.matmul %117, %103, %cst_53 {dimension_numbers = #tpu.dot_dimension_numbers<[0], [0], [1], [1], [0, 1, 1, 1], [], []>} : vector<32x128xbf16>, vector<32x128xbf16>, vector<128x128xf32> -> vector<128x128xf32>
    %c1_i32_54 = arith.constant 1 : i32
    "tpu.trace_stop"() : () -> ()
    %120 = tpu.dynamic_rotate %119 by %c1_i32_54 dim 1 : vector<128x128xf32>, i32 -> vector<128x128xf32>
    %c0_i32_55 = arith.constant 0 : i32
    %121 = tpu.dynamic_rotate %120 by %c0_i32_55 dim 1 {stride = 1 : si32, stride_dimension = 0 : si32} : vector<128x128xf32>, i32 -> vector<128x128xf32>
    %122 = arith.addf %118, %121 : vector<128x128xf32>
    %cst_56 = arith.constant -1.000000e+30 : f32
    %123 = vector.broadcast %cst_56 : f32 to vector<128x128xf32>
    %124 = arith.select %23, %123, %122 : vector<128x128xi1>, vector<128x128xf32>
    %cst_57 = arith.constant dense<0xFF800000> : vector<128xf32>
    %125 = vector.multi_reduction <maximumf>, %124, %cst_57 [1] : vector<128x128xf32> to vector<128xf32>
    %126 = vector.shape_cast %125 : vector<128xf32> to vector<128x1xf32>
    %127 = vector.broadcast %126 : vector<128x1xf32> to vector<128x128xf32>
    %128 = arith.subf %124, %127 : vector<128x128xf32>
    %129 = math.exp %128 : vector<128x128xf32>
    %cst_58 = arith.constant dense<0.000000e+00> : vector<128xf32>
    %130 = vector.multi_reduction <add>, %129, %cst_58 [1] : vector<128x128xf32> to vector<128xf32>
    %131 = vector.shape_cast %130 : vector<128xf32> to vector<128x1xf32>
    %132 = tpu.reciprocal %131 {approx = true} : vector<128x1xf32> -> vector<128x1xf32>
    %133 = vector.broadcast %132 : vector<128x1xf32> to vector<128x128xf32>
    %134 = arith.mulf %129, %133 : vector<128x128xf32>
    %135 = arith.truncf %134 : vector<128x128xf32> to vector<128x128xbf16>
    "tpu.trace_start"() <{level = 10 : i32, message = "ij,dj->di"}> : () -> ()
    %cst_59 = arith.constant dense<0.000000e+00> : vector<32x128xf32>
    %136 = tpu.matmul %102, %135, %cst_59 {dimension_numbers = #tpu.dot_dimension_numbers<[1], [1], [0], [0], [0, 0, 1, 0], [], []>} : vector<32x128xbf16>, vector<128x128xbf16>, vector<32x128xf32> -> vector<32x128xf32>
    "tpu.trace_stop"() : () -> ()
    %c64 = arith.constant 64 : index
    %c0_60 = arith.constant 0 : index
    %137 = vector.load %arg11[%c64, %c0_60] : memref<128x128xf32, #tpu.memory_space<vmem>>, vector<32x128xf32>
    tpu.vector_store %arg11[%c64, %c0_60], %136 {strides = array<i32>} : memref<128x128xf32, #tpu.memory_space<vmem>>, vector<32x128xf32>,
    %138 = vector.extract_strided_slice %11 {offsets = [96, 0], sizes = [32, 128], strides = [1, 1]} : vector<128x128xf32> to vector<32x128xf32>
    %139 = vector.extract_strided_slice %13 {offsets = [96, 0], sizes = [32, 128], strides = [1, 1]} : vector<256x128xbf16> to vector<32x128xbf16>
    %140 = vector.extract_strided_slice %13 {offsets = [224, 0], sizes = [32, 128], strides = [1, 1]} : vector<256x128xbf16> to vector<32x128xbf16>
    %141 = vector.extract_strided_slice %14 {offsets = [96, 0], sizes = [32, 128], strides = [1, 1]} : vector<128x128xbf16> to vector<32x128xbf16>
    %c3 = arith.constant 3 : index
    %c0_61 = arith.constant 0 : index
    %c0_62 = arith.constant 0 : index
    %142 = vector.load %arg6[%c3, %c0_61, %c0_62] : memref<4x32x1xf32, #tpu.memory_space<vmem>>, vector<1x32x1xf32>
    %143 = vector.shape_cast %142 : vector<1x32x1xf32> to vector<32x1xf32>
    %144 = vector.broadcast %143 : vector<32x1xf32> to vector<32x128xf32>
    %145 = arith.addf %138, %144 : vector<32x128xf32>
    %cst_63 = arith.constant 0.176776692 : f32
    %146 = vector.broadcast %cst_63 : f32 to vector<32x128xf32>
    %147 = arith.mulf %145, %146 : vector<32x128xf32>
    %148 = arith.truncf %147 : vector<32x128xf32> to vector<32x128xbf16>
    %c3_64 = arith.constant 3 : index
    %c0_65 = arith.constant 0 : index
    %c0_66 = arith.constant 0 : index
    %149 = vector.load %arg7[%c3_64, %c0_65, %c0_66] : memref<4x32x1xf32, #tpu.memory_space<vmem>>, vector<1x32x1xf32>
    %150 = vector.shape_cast %149 : vector<1x32x1xf32> to vector<32x1xf32>
    %151 = vector.broadcast %150 : vector<32x1xf32> to vector<32x128xf32>
    %152 = arith.addf %138, %151 : vector<32x128xf32>
    %cst_67 = arith.constant 0.176776692 : f32
    %153 = vector.broadcast %cst_67 : f32 to vector<32x128xf32>
    %154 = arith.mulf %152, %153 : vector<32x128xf32>
    %155 = arith.truncf %154 : vector<32x128xf32> to vector<32x128xbf16>
    "tpu.trace_start"() <{level = 10 : i32, message = "di,dj->ij"}> : () -> ()
    %cst_68 = arith.constant dense<0.000000e+00> : vector<128x128xf32>
    %156 = tpu.matmul %148, %139, %cst_68 {dimension_numbers = #tpu.dot_dimension_numbers<[0], [0], [1], [1], [0, 1, 1, 1], [], []>} : vector<32x128xbf16>, vector<32x128xbf16>, vector<128x128xf32> -> vector<128x128xf32>
    %cst_69 = arith.constant dense<0.000000e+00> : vector<128x128xf32>
    %157 = tpu.matmul %155, %141, %cst_69 {dimension_numbers = #tpu.dot_dimension_numbers<[0], [0], [1], [1], [0, 1, 1, 1], [], []>} : vector<32x128xbf16>, vector<32x128xbf16>, vector<128x128xf32> -> vector<128x128xf32>
    %c1_i32_70 = arith.constant 1 : i32
    "tpu.trace_stop"() : () -> ()
    %158 = tpu.dynamic_rotate %157 by %c1_i32_70 dim 1 : vector<128x128xf32>, i32 -> vector<128x128xf32>
    %c0_i32_71 = arith.constant 0 : i32
    %159 = tpu.dynamic_rotate %158 by %c0_i32_71 dim 1 {stride = 1 : si32, stride_dimension = 0 : si32} : vector<128x128xf32>, i32 -> vector<128x128xf32>
    %160 = arith.addf %156, %159 : vector<128x128xf32>
    %cst_72 = arith.constant -1.000000e+30 : f32
    %161 = vector.broadcast %cst_72 : f32 to vector<128x128xf32>
    %162 = arith.select %23, %161, %160 : vector<128x128xi1>, vector<128x128xf32>
    %cst_73 = arith.constant dense<0xFF800000> : vector<128xf32>
    %163 = vector.multi_reduction <maximumf>, %162, %cst_73 [1] : vector<128x128xf32> to vector<128xf32>
    %164 = vector.shape_cast %163 : vector<128xf32> to vector<128x1xf32>
    %165 = vector.broadcast %164 : vector<128x1xf32> to vector<128x128xf32>
    %166 = arith.subf %162, %165 : vector<128x128xf32>
    %167 = math.exp %166 : vector<128x128xf32>
    %cst_74 = arith.constant dense<0.000000e+00> : vector<128xf32>
    %168 = vector.multi_reduction <add>, %167, %cst_74 [1] : vector<128x128xf32> to vector<128xf32>
    %169 = vector.shape_cast %168 : vector<128xf32> to vector<128x1xf32>
    %170 = tpu.reciprocal %169 {approx = true} : vector<128x1xf32> -> vector<128x1xf32>
    %171 = vector.broadcast %170 : vector<128x1xf32> to vector<128x128xf32>
    %172 = arith.mulf %167, %171 : vector<128x128xf32>
    %173 = arith.truncf %172 : vector<128x128xf32> to vector<128x128xbf16>
    "tpu.trace_start"() <{level = 10 : i32, message = "ij,dj->di"}> : () -> ()
    %cst_75 = arith.constant dense<0.000000e+00> : vector<32x128xf32>
    %174 = tpu.matmul %140, %173, %cst_75 {dimension_numbers = #tpu.dot_dimension_numbers<[1], [1], [0], [0], [0, 0, 1, 0], [], []>} : vector<32x128xbf16>, vector<128x128xbf16>, vector<32x128xf32> -> vector<32x128xf32>
    "tpu.trace_stop"() : () -> ()
    %c96 = arith.constant 96 : index
    %c0_76 = arith.constant 0 : index
    %175 = vector.load %arg11[%c96, %c0_76] : memref<128x128xf32, #tpu.memory_space<vmem>>, vector<32x128xf32>
    tpu.vector_store %arg11[%c96, %c0_76], %174 {strides = array<i32>} : memref<128x128xf32, #tpu.memory_space<vmem>>, vector<32x128xf32>,
    %c0_77 = arith.constant 0 : index
    %c0_78 = arith.constant 0 : index
    %176 = vector.load %arg11[%c0_77, %c0_78] : memref<128x128xf32, #tpu.memory_space<vmem>>, vector<128x128xf32>
    %c0_79 = arith.constant 0 : index
    %c0_80 = arith.constant 0 : index
    %177 = vector.load %arg8[%c0_79, %c0_80] : memref<128x128xbf16, #tpu.memory_space<vmem>>, vector<128x128xbf16>
    %178 = arith.truncf %176 : vector<128x128xf32> to vector<128x128xbf16>
    %cst_81 = arith.constant dense<0.000000e+00> : vector<128x128xf32>
    %179 = tpu.matmul %177, %178, %cst_81 {dimension_numbers = #tpu.dot_dimension_numbers<[1], [0], [0], [1], [0, 0, 1, 1], [], []>} : vector<128x128xbf16>, vector<128x128xbf16>, vector<128x128xf32> -> vector<128x128xf32>
    %c0_82 = arith.constant 0 : index
    %c0_83 = arith.constant 0 : index
    %180 = vector.load %arg9[%c0_82, %c0_83] : memref<128x1xf32, #tpu.memory_space<vmem>>, vector<128x1xf32>
    %181 = vector.broadcast %180 : vector<128x1xf32> to vector<128x128xf32>
    %182 = arith.addf %179, %181 : vector<128x128xf32>
    %183 = arith.addf %182, %1 : vector<128x128xf32>
    %cst_84 = arith.constant dense<0.000000e+00> : vector<128xf32>
    %184 = vector.multi_reduction <add>, %183, %cst_84 [0] : vector<128x128xf32> to vector<128xf32>
    %185 = vector.shape_cast %184 : vector<128xf32> to vector<1x128xf32>
    %cst_85 = arith.constant 1.280000e+02 : f32
    %186 = vector.broadcast %cst_85 : f32 to vector<1x128xf32>
    %187 = arith.divf %185, %186 : vector<1x128xf32>
    %188 = vector.broadcast %187 : vector<1x128xf32> to vector<128x128xf32>
    %189 = arith.subf %183, %188 : vector<128x128xf32>
    %190 = arith.mulf %189, %189 : vector<128x128xf32>
    %cst_86 = arith.constant dense<0.000000e+00> : vector<128xf32>
    %191 = vector.multi_reduction <add>, %190, %cst_86 [0] : vector<128x128xf32> to vector<128xf32>
    %192 = vector.shape_cast %191 : vector<128xf32> to vector<1x128xf32>
    %cst_87 = arith.constant 1.280000e+02 : f32
    %193 = vector.broadcast %cst_87 : f32 to vector<1x128xf32>
    %194 = arith.divf %192, %193 : vector<1x128xf32>
    %195 = vector.broadcast %187 : vector<1x128xf32> to vector<128x128xf32>
    %196 = arith.subf %183, %195 : vector<128x128xf32>
    %cst_88 = arith.constant 9.99999974E-6 : f32
    %197 = vector.broadcast %cst_88 : f32 to vector<1x128xf32>
    %198 = arith.addf %194, %197 : vector<1x128xf32>
    %199 = math.rsqrt %198 : vector<1x128xf32>
    %200 = vector.broadcast %199 : vector<1x128xf32> to vector<128x128xf32>
    %201 = arith.mulf %196, %200 : vector<128x128xf32>
    %c0_89 = arith.constant 0 : index
    %c0_90 = arith.constant 0 : index
    %c0_91 = arith.constant 0 : index
    %202 = vector.load %arg10[%c0_89, %c0_90, %c0_91] : memref<1x128x128xf32, #tpu.memory_space<vmem>>, vector<1x128x128xf32>
    %203 = vector.shape_cast %202 : vector<1x128x128xf32> to vector<128x128xf32>
    %204 = vector.shape_cast %201 : vector<128x128xf32> to vector<1x128x128xf32>
    tpu.vector_store %arg10[%c0_89, %c0_90, %c0_91], %204 {strides = array<i32>} : memref<1x128x128xf32, #tpu.memory_space<vmem>>, vector<1x128x128xf32>,
    return
  }
  func.func @transform_0(%arg0: i32) -> (i32, i32, i32) {
    %c0_i32 = arith.constant 0 : i32
    %c0_i32_0 = arith.constant 0 : i32
    %c0_i32_1 = arith.constant 0 : i32
    return %arg0, %c0_i32, %c0_i32_0 : i32, i32, i32
  }
  func.func @transform_1(%arg0: i32) -> (i32, i32) {
    %c0_i32 = arith.constant 0 : i32
    %c0_i32_0 = arith.constant 0 : i32
    %c0_i32_1 = arith.constant 0 : i32
    return %c0_i32, %c0_i32_0 : i32, i32
  }
  func.func @transform_2(%arg0: i32) -> (i32, i32, i32) {
    %c0_i32 = arith.constant 0 : i32
    %c0_i32_0 = arith.constant 0 : i32
    %c0_i32_1 = arith.constant 0 : i32
    return %arg0, %c0_i32, %c0_i32_0 : i32, i32, i32
  }
  func.func @transform_3(%arg0: i32) -> (i32, i32) {
    %c0_i32 = arith.constant 0 : i32
    %c0_i32_0 = arith.constant 0 : i32
    %c0_i32_1 = arith.constant 0 : i32
    return %c0_i32, %c0_i32_0 : i32, i32
  }
  func.func @transform_4(%arg0: i32) -> (i32, i32) {
    %c0_i32 = arith.constant 0 : i32
    %c0_i32_0 = arith.constant 0 : i32
    %c0_i32_1 = arith.constant 0 : i32
    return %c0_i32, %c0_i32_0 : i32, i32
  }
  func.func @transform_5(%arg0: i32) -> (i32, i32, i32) {
    %c0_i32 = arith.constant 0 : i32
    %c0_i32_0 = arith.constant 0 : i32
    %c0_i32_1 = arith.constant 0 : i32
    %c0_i32_2 = arith.constant 0 : i32
    return %c0_i32, %c0_i32_0, %c0_i32_1 : i32, i32, i32
  }
  func.func @transform_6(%arg0: i32) -> (i32, i32, i32) {
    %c0_i32 = arith.constant 0 : i32
    %c0_i32_0 = arith.constant 0 : i32
    %c0_i32_1 = arith.constant 0 : i32
    %c0_i32_2 = arith.constant 0 : i32
    return %c0_i32, %c0_i32_0, %c0_i32_1 : i32, i32, i32
  }
  func.func @transform_7(%arg0: i32) -> (i32, i32) {
    %c0_i32 = arith.constant 0 : i32
    %c0_i32_0 = arith.constant 0 : i32
    %c0_i32_1 = arith.constant 0 : i32
    return %c0_i32, %c0_i32_0 : i32, i32
  }
  func.func @transform_8(%arg0: i32) -> (i32, i32) {
    %c0_i32 = arith.constant 0 : i32
    %c0_i32_0 = arith.constant 0 : i32
    %c0_i32_1 = arith.constant 0 : i32
    return %c0_i32, %c0_i32_0 : i32, i32
  }
  func.func @transform_9(%arg0: i32) -> (i32, i32, i32) {
    %c0_i32 = arith.constant 0 : i32
    %c0_i32_0 = arith.constant 0 : i32
    %c0_i32_1 = arith.constant 0 : i32
    return %arg0, %c0_i32, %c0_i32_0 : i32, i32, i32
  }
}

</mosaic_0001>

<bundles_post_ra>
// kernel: tpu_custom_call.1
= control target key start
LH: loop header
LB: loop body
LE: loop exit
PB: predicated region body
PF: predicated region fallthrough
CT: control target
= control target key end

     0   :  { %s8308_s0 = inlined_call_operand.hbm [shape: f32[2,128,128], index: 0, kind: input, shape index: {}]   ;;  %s8309_s1 = inlined_call_operand.hbm [shape: bf16[128,128], index: 1, kind: input, shape index: {}]   ;;  %s8310_s2 = inlined_call_operand.hbm [shape: f32[2,384,128], index: 2, kind: input, shape index: {}]   ;;  %s8311_s3 = inlined_call_operand.hbm [shape: bf16[384,128], index: 3, kind: input, shape index: {}]   ;;  %s8312_s4 = inlined_call_operand.hbm [shape: bf16[128,128], index: 4, kind: input, shape index: {}]   ;;  %s8313_s5 = inlined_call_operand.hbm [shape: f32[4,32,1], index: 5, kind: input, shape index: {}]   ;;  %s8314_s6 = inlined_call_operand.hbm [shape: f32[4,32,1], index: 6, kind: input, shape index: {}]   ;;  %s8315_s7 = inlined_call_operand.hbm [shape: bf16[128,128], index: 7, kind: input, shape index: {}]   ;;  %s8316_s8 = inlined_call_operand.hbm [shape: f32[128,1], index: 8, kind: input, shape index: {}]   ;;  %s8317_s9 = inlined_call_operand.hbm [shape: f32[2,128,128], index: 9, kind: output, shape index: {}]  }
   0x1   :  { %8401 = sst [smem:[#allocation83_spill]] %s8308_s0 }
   0x2   :  { %8402 = sst [smem:[#allocation84_spill]] %s8309_s1 }
   0x3   :  { %8403 = sst [smem:[#allocation85_spill]] %s8311_s3 }
   0x4   :  { %8404 = sst [smem:[#allocation86_spill]] %s8312_s4 }
   0x5   :  { %8405 = sst [smem:[#allocation87_spill]] %s8314_s6 }
   0x6   :  { %8406 = sst [smem:[#allocation88_spill]] %s8317_s9 }
   0x7   :  { %14 = vsyncpa [#allocation4], 0 }
   0x8   :  { %16 = vsyncpa [#allocation4 + $0x1], 0 }
   0x9   :  { %17 = vsyncpa [#allocation7], 0 }
   0xa   :  { %18 = vsyncpa [#allocation11], 0 }
   0xb   :  { %19 = vsyncpa [#allocation14], 0 }
   0xc   :  { %20 = vsyncpa [#allocation17], 0 }
   0xd   :  { %21 = vsyncpa [#allocation5], 0 }
   0xe   :  { %23 = vsyncpa [#allocation5 + $0x1], 0  ;;  %s6133_s30 = smov 0   ;;  %s6135_s10 = smov 0  }
   0xf   :  { %s6137_s11 = smov 0   ;;  %s6139_s12 = smov 0  }
  0x10 LB: > { %8407 = sst [smem:[#allocation27_spill]] %s6035_s30  ;;  %s6049_s13 = smov [#allocation6]   ;;  %s6047_s12 = sphi %s6139_s12, %s8641_s12   ;;  %s6043_s11 = sphi %s6137_s11, %s8643_s11   ;;  %s6039_s10 = sphi %s6135_s10, %s8645_s10   ;;  %s6035_s30 = sphi %s6133_s30, %s8644_s30  }
  0x11   : > { %8408 = sst [smem:[#allocation28_spill]] %s6043_s11  ;;  %s271_s14 = sshll.u32 %s6049_s13, 4  ;;  %s6159_s14 = int_to_ptr.vmem [resolvable:$true] %s271_s14 }
  0x12   : > { %s6154_s15 = sadd.s32 4294967295, %s6047_s12   ;;  %p4534_p0 = scmp.ge.s32.totalorder %s6047_s12, 1 }
  0x13   : > { %p8319_p1 = scmp.eq.s32.totalorder %s6154_s15, 0  ;;  %p259_p2 = scmp.lt.s32.totalorder %s6047_s12, 3 }
  0x14   : > { %s6050_s17 = smov [#allocation10]   ;;  %s6051_s20 = smov [#allocation13]  }
  0x15   : > { %p6161_p3 = pnand %p4534_p0, %p259_p2  ;;  %s297_s18 = sshll.u32 %s6050_s17, 4  ;;  %s6174_s18 = int_to_ptr.vmem [resolvable:$true] %s297_s18 }
  0x16   : > { %s6176_s21 = sshll.u32 %s6051_s20, 4  ;;  %s8411_s1 = sld [smem:[#allocation84_spill]]  ;;  %s324_s21 = int_to_ptr.vmem [resolvable:$true] %s6176_s21 }
  0x17   : > { %s8409_s16 = scalar_select %p6161_p3, 1, 0 }
  0x18   : > { %p5265_p5 = pneg %p6161_p3 }
  0x1a   : > { %p6170_p6 = pnand %p5265_p5, %p8319_p1 }
  0x1c   : > { %s8410_s19 = scalar_select %p6170_p6, 1, 0 }
  0x1d   : > { %s5701_s24 = scalar_lea.hbm %s8411_s1, 1024  ;;  %p6186_p8 = pneg %p6170_p6 }
  0x1e   : > { %p5702_p7 = scmp.ne.s32.totalorder %s8411_s1, %s5701_s24  ;;  %p5708_p11 = scmp.lt.u32.totalorder %s5701_s24, %s8411_s1 }
  0x20   : > { %p5704_p9 = pnand %p6186_p8, %p5702_p7 }
  0x22   : > { %p5705_p10 = pneg %p5704_p9 }
  0x24   : > { %p5710_p12 = pnand %p5708_p11, %p5705_p10 }
  0x26   : > { %5713 = shalt.err (!%p5710_p12)
}
  0x27   : > { %s5714_s13 = scalar_lea.vmem %s6159_s14, 1024  ;;  %p5722_p5 = scmp.lt.s32.totalorder %s6159_s14, %s6159_s14 }
  0x28   : > { %p5715_p13 = scmp.ne.s32.totalorder %s6159_s14, %s5714_s13  ;;  %p5723_p4 = scmp.lt.s32.totalorder %s5714_s13, %s5714_s13 }
  0x2a   : > { %p5717_p0 = pnand %p5715_p13, %p6186_p8  ;;  %p5724_p7 = por %p5723_p4, %p5722_p5 }
  0x2c   : > { %p5718_p2 = pneg %p5717_p0 }
  0x2e   : > { %p5725_p9 = pnand %p5724_p7, %p5718_p2 }
  0x30   : > { %5728 = shalt.err (!%p5725_p9)
}
  0x31   : > { %s8321_s17 = smov 64   ;;  %s8323_s20 = smov 4  }
  0x32   : > { %5268 = dma.hbm_to_vmem [thread:$0]  (!%p6170_p6), %s8411_s1, 1024, %s6159_s14, [#allocation7], %s8321_s17, %s8321_s17, %s8323_s20  }
  0x33   : > { %s8413_s4 = sld [smem:[#allocation86_spill]] }
  0x39   : > { %s5729_s26 = scalar_lea.hbm %s8413_s4, 1024 }
  0x3a   : > { %p5730_p4 = scmp.ne.s32.totalorder %s8413_s4, %s5729_s26  ;;  %p5736_p12 = scmp.lt.u32.totalorder %s5729_s26, %s8413_s4 }
  0x3c   : > { %p5732_p10 = pnand %p5730_p4, %p6186_p8 }
  0x3e   : > { %p5733_p11 = pneg %p5732_p10 }
  0x40   : > { %p5738_p13 = pnand %p5736_p12, %p5733_p11 }
  0x42   : > { %5741 = shalt.err (!%p5738_p13)
}
  0x43   : > { %s5742_s14 = scalar_lea.vmem %s6174_s18, 1024  ;;  %p5750_p7 = scmp.lt.s32.totalorder %s6174_s18, %s6174_s18 }
  0x44   : > { %p5743_p0 = scmp.ne.s32.totalorder %s6174_s18, %s5742_s14  ;;  %p5751_p9 = scmp.lt.s32.totalorder %s5742_s14, %s5742_s14 }
  0x46   : > { %p5745_p2 = pnand %p5743_p0, %p6186_p8  ;;  %p5752_p4 = por %p5751_p9, %p5750_p7 }
  0x48   : > { %p5746_p5 = pneg %p5745_p2 }
  0x4a   : > { %p5753_p10 = pnand %p5752_p4, %p5746_p5 }
  0x4c   : > { %5756 = shalt.err (!%p5753_p10)
}
  0x4d   : > { %5274 = dma.hbm_to_vmem [thread:$0]  (!%p6170_p6), %s8413_s4, 1024, %s6174_s18, [#allocation11], %s8321_s17, %s8321_s17, %s8323_s20  }
  0x4e   : > { %s8414_s6 = sld [smem:[#allocation87_spill]] }
  0x54   : > { %s5757_s25 = scalar_lea.hbm %s8414_s6, 2048 }
  0x55   : > { %p5758_p11 = scmp.ne.s32.totalorder %s8414_s6, %s5757_s25  ;;  %p5764_p0 = scmp.lt.u32.totalorder %s5757_s25, %s8414_s6 }
  0x57   : > { %p5760_p12 = pnand %p5758_p11, %p6186_p8 }
  0x59   : > { %p5761_p13 = pneg %p5760_p12 }
  0x5b   : > { %p5766_p2 = pnand %p5764_p0, %p5761_p13 }
  0x5d   : > { %5769 = shalt.err (!%p5766_p2)
}
  0x5e   : > { %s5770_s14 = scalar_lea.vmem %s324_s21, 2048  ;;  %p5778_p4 = scmp.lt.s32.totalorder %s324_s21, %s324_s21 }
  0x5f   : > { %p5771_p5 = scmp.ne.s32.totalorder %s324_s21, %s5770_s14  ;;  %p5779_p10 = scmp.lt.s32.totalorder %s5770_s14, %s5770_s14 }
  0x61   : > { %p5773_p7 = pnand %p5771_p5, %p6186_p8  ;;  %p5780_p1 = por %p5779_p10, %p5778_p4 }
  0x63   : > { %p5774_p9 = pneg %p5773_p7 }
  0x65   : > { %p5781_p3 = pnand %p5780_p1, %p5774_p9 }
  0x67   : > { %5784 = shalt.err (!%p5781_p3)
}
  0x68   : > { %s8325_s18 = smov 128   ;;  %s8327_s9 = smov 8  }
  0x69   : > { %5280 = dma.hbm_to_vmem [thread:$0]  (!%p6170_p6), %s8414_s6, 2048, %s324_s21, [#allocation14], %s8325_s18, %s8325_s18, %s8327_s9  }
  0x6a   : > { %s4533_s24 = sadd.s32 4294967294, %s6047_s12   ;;  %s6260_s25 = sadd.s32 1, %s6047_s12  }
  0x6b   : > { %8415 = sst [smem:[#allocation29_spill]] %s6260_s25  ;;  %s36_s26 = sadd.s32 1, %s6043_s11 }
  0x6c   : > { %s33_s28 = ssub.s32 %s6047_s12, %s6260_s25  ;;  %p43_p1 = scmp.ne.s32.totalorder %s6043_s11, %s6039_s10 }
  0x6d   : > { %p34_p3 = scmp.eq.s32.totalorder %s33_s28, 0  ;;  %p44_p11 = scmp.eq.s32.totalorder %s6047_s12, 0 }
  0x6e   : > { %p49_p12 = scmp.ne.s32.totalorder %s6039_s10, %s6035_s30  ;;  %p246_p13 = scmp.eq.s32.totalorder %s6154_s15, 1 }
  0x6f   : > { %s6272_s29 = scalar_select %p34_p3, %s6043_s11, %s36_s26  }
  0x70   : > { %p45_p0 = por %p44_p11, %p43_p1  ;;  %p8417_p2 = scmp.eq.s32.totalorder %s6154_s15, 0 }
  0x71   : > { %8416 = sst [smem:[#allocation30_spill]] %s6272_s29  ;;  %p6280_p7 = por %p246_p13, %p43_p1 }
  0x72   : > { %p6276_p5 = por %p8417_p2, %p49_p12  ;;  %p252_p9 = scmp.eq.s32.totalorder %s4533_s24, 1 }
  0x73   : > { %s8419_s13 = scalar_select %p6280_p7, 1, 0 }
  0x74   : > { %s8418_s21 = scalar_select %p6276_p5, 1, 0 }
  0x75   : > { %8420 = sst [smem:[#allocation31_spill]] %s8419_s13  ;;  %p5305_p4 = scmp.lt.s32.totalorder %s6047_s12, 2 }
  0x76   : > { %s363_s14 = sand.u32 1, %s6047_s12   ;;  %p6286_p10 = por %p252_p9, %p49_p12 }
  0x77   : > { %s365_s23 = sand.u32 1, %s6043_s11   ;;  %s4674_s26 = sshll.u32 %s6047_s12, 11 }
  0x78   : > { %s8421_s22 = scalar_select %p6286_p10, 1, 0 }
  0x79   : > { %s4543_s28 = sshll.u32 %s365_s23, 7  ;;  %s8423_s0 = sld [smem:[#allocation83_spill]] }
  0x7a   : > { %8422 = sst [smem:[#allocation32_spill]] %s8421_s22  ;;  %p6297_p1 = pnand %p5305_p4, %p45_p0 }
  0x7b   : > { %s367_s9 = scalar_lea.vmem [#allocation3], %s4543_s28  ;;  %s6301_s4 = smul.u32 384, %s365_s23 }
  0x7c   : > { %s8424_s24 = scalar_select %p6297_p1, 1, 0 }
  0x7d   : > { %s374_s1 = sshll.u32 %s367_s9, 4  ;;  %s6305_s6 = scalar_lea.sflag [#allocation4], %s363_s14  ;;  %s6303_s1 = int_to_ptr.vmem [resolvable:$true] %s374_s1 }
  0x7e   : > { %p8338_p11 = pneg %p6297_p1 }
  0x7f   : > { %s6295_s18 = scalar_lea.hbm %s8423_s0, %s4674_s26  ;;  %s5790_s29 = scalar_lea.hbm %s8423_s0, 4096 }
  0x80   : > { %s5785_s17 = scalar_lea.hbm %s6295_s18, 2048  ;;  %p5791_p0 = scmp.lt.u32.totalorder %s6295_s18, %s8423_s0 }
  0x81   : > { %p5786_p3 = scmp.ne.s32.totalorder %s6295_s18, %s5785_s17  ;;  %p5792_p2 = scmp.lt.u32.totalorder %s5790_s29, %s5785_s17 }
  0x82   : > { %p5794_p4 = scmp.lt.u32.totalorder %s5785_s17, %s6295_s18 }
  0x83   : > { %p5788_p12 = pnand %p8338_p11, %p5786_p3  ;;  %p5793_p9 = por %p5792_p2, %p5791_p0 }
  0x85   : > { %p5789_p13 = pneg %p5788_p12  ;;  %p5795_p10 = por %p5794_p4, %p5793_p9 }
  0x87   : > { %p5796_p7 = pnand %p5795_p10, %p5789_p13 }
  0x89   : > { %5799 = shalt.err (!%p5796_p7)
}
  0x8a   : > { %s5800_s14 = scalar_lea.vmem %s6303_s1, 2048  ;;  %s6056_s23 = smov [#allocation3]  }
  0x8b   : > { %p5801_p3 = scmp.ne.s32.totalorder %s6303_s1, %s5800_s14  ;;  %s5805_s20 = sshll.u32 %s6056_s23, 4  ;;  %s5806_s20 = int_to_ptr.vmem [resolvable:$false] %s5805_s20 }
  0x8c   : > { %s5807_s26 = scalar_lea.vmem %s5806_s20, 4096  ;;  %p5808_p6 = scmp.lt.s32.totalorder %s6303_s1, %s5806_s20 }
  0x8d   : > { %p5803_p12 = pnand %p5801_p3, %p8338_p11  ;;  %p5809_p0 = scmp.lt.s32.totalorder %s5807_s26, %s5800_s14 }
  0x8f   : > { %p5804_p5 = pneg %p5803_p12  ;;  %p5810_p2 = por %p5809_p0, %p5808_p6 }
  0x91   : > { %p5811_p9 = pnand %p5810_p2, %p5804_p5 }
  0x93   : > { %5814 = shalt.err (!%p5811_p9)
}
  0x94   : > { %s8425_s29 = smov 8   ;;  %s8426_s17 = smov 128  }
  0x95   : > { %5290 = dma.hbm_to_vmem [thread:$0]  (!%p6297_p1), %s6295_s18, 2048, %s6303_s1, %s6305_s6, %s8426_s17, %s8426_s17, %s8425_s29  }
  0x96   : > { %s6057_s28 = smov [#allocation9]   ;;  %s6058_s23 = smov [#allocation12]  }
  0x97   : > { %s284_s9 = sshll.u32 %s6057_s28, 4  ;;  %s310_s0 = sshll.u32 %s6058_s23, 4  ;;  %s285_s9 = int_to_ptr.vmem [resolvable:$true] %s284_s9  ;;  %s311_s0 = int_to_ptr.vmem [resolvable:$true] %s310_s0 }
  0x98   : > { %s8427_s3 = sld [smem:[#allocation85_spill]] }
  0x9e   : > { %s5815_s26 = scalar_lea.hbm %s8427_s3, 3072 }
  0x9f   : > { %p5816_p6 = scmp.ne.s32.totalorder %s8427_s3, %s5815_s26  ;;  %p5822_p10 = scmp.lt.u32.totalorder %s5815_s26, %s8427_s3 }
  0xa1   : > { %p5818_p5 = pnand %p5816_p6, %p6186_p8 }
  0xa3   : > { %p5819_p7 = pneg %p5818_p5 }
  0xa5   : > { %p5824_p13 = pnand %p5822_p10, %p5819_p7 }
  0xa7   : > { %5827 = shalt.err (!%p5824_p13)
}
  0xa8   : > { %s5828_s1 = scalar_lea.vmem %s285_s9, 3072  ;;  %p5836_p0 = scmp.lt.s32.totalorder %s285_s9, %s285_s9 }
  0xa9   : > { %p5829_p4 = scmp.ne.s32.totalorder %s285_s9, %s5828_s1  ;;  %p5837_p2 = scmp.lt.s32.totalorder %s5828_s1, %s5828_s1 }
  0xab   : > { %p5831_p3 = pnand %p5829_p4, %p6186_p8  ;;  %p5838_p9 = por %p5837_p2, %p5836_p0 }
  0xad   : > { %p5832_p12 = pneg %p5831_p3 }
  0xaf   : > { %p5839_p11 = pnand %p5838_p9, %p5832_p12 }
  0xb1   : > { %5842 = shalt.err (!%p5839_p11)
}
  0xb2   : > { %p8428_p6 = scmp.ne.s32.totalorder %s8410_s19, 0  ;;  %s8429_s11 = smov 4  }
  0xb3   : > { %s8430_s18 = smov 64   ;;  %s5843_s23 = scalar_lea.hbm %s8313_s5, 2048 }
  0xb4   : > { %5271 = dma.hbm_to_vmem [thread:$0]  (!%p8428_p6), %s8427_s3, 3072, %s285_s9, [#allocation7], %s8430_s18, %s8430_s18, %s8429_s11  }
  0xb5   : > { %p5844_p5 = scmp.ne.s32.totalorder %s8313_s5, %s5843_s23  ;;  %p5850_p10 = scmp.lt.u32.totalorder %s5843_s23, %s8313_s5 }
  0xb7   : > { %p5846_p11 = pnand %p5844_p5, %p6186_p8 }
  0xb9   : > { %p5847_p7 = pneg %p5846_p11 }
  0xbb   : > { %p5852_p13 = pnand %p5850_p10, %p5847_p7 }
  0xbd   : > { %5855 = shalt.err (!%p5852_p13)
}
  0xbe   : > { %s5856_s30 = scalar_lea.vmem %s311_s0, 2048  ;;  %p5864_p0 = scmp.lt.s32.totalorder %s311_s0, %s311_s0 }
  0xbf   : > { %p5857_p4 = scmp.ne.s32.totalorder %s311_s0, %s5856_s30  ;;  %p5865_p2 = scmp.lt.s32.totalorder %s5856_s30, %s5856_s30 }
  0xc1   : > { %p5859_p3 = pnand %p5857_p4, %p6186_p8  ;;  %p5866_p9 = por %p5865_p2, %p5864_p0 }
  0xc3   : > { %p5860_p12 = pneg %p5859_p3 }
  0xc5   : > { %p5867_p1 = pnand %p5866_p9, %p5860_p12 }
  0xc7   : > { %5870 = shalt.err (!%p5867_p1)
}
  0xc8   : > { %5277 = dma.hbm_to_vmem [thread:$0]  (!%p8428_p6), %s8313_s5, 2048, %s311_s0, [#allocation11], %s8426_s17, %s8426_s17, %s8425_s29  }
  0xc9   : > { %s6059_s22 = smov [#allocation15]   ;;  %s6060_s23 = smov [#allocation16]  }
  0xca   : > { %s336_s28 = sshll.u32 %s6059_s22, 4  ;;  %s349_s20 = sshll.u32 %s6060_s23, 4  ;;  %s337_s28 = int_to_ptr.vmem [resolvable:$true] %s336_s28  ;;  %s350_s20 = int_to_ptr.vmem [resolvable:$true] %s349_s20 }
  0xcb   : > { %s5871_s1 = scalar_lea.hbm %s8315_s7, 1024 }
  0xcc   : > { %p5872_p1 = scmp.ne.s32.totalorder %s8315_s7, %s5871_s1  ;;  %p5878_p7 = scmp.lt.u32.totalorder %s5871_s1, %s8315_s7 }
  0xce   : > { %p5874_p5 = pnand %p5872_p1, %p6186_p8 }
  0xd0   : > { %p5875_p11 = pneg %p5874_p5 }
  0xd2   : > { %p5880_p10 = pnand %p5878_p7, %p5875_p11 }
  0xd4   : > { %5883 = shalt.err (!%p5880_p10)
}
  0xd5   : > { %s5884_s0 = scalar_lea.vmem %s337_s28, 1024  ;;  %p5892_p12 = scmp.lt.s32.totalorder %s337_s28, %s337_s28 }
  0xd6   : > { %p5885_p13 = scmp.ne.s32.totalorder %s337_s28, %s5884_s0  ;;  %p5893_p0 = scmp.lt.s32.totalorder %s5884_s0, %s5884_s0 }
  0xd8   : > { %p5887_p4 = pnand %p5885_p13, %p6186_p8  ;;  %p5894_p2 = por %p5893_p0, %p5892_p12 }
  0xda   : > { %p5888_p3 = pneg %p5887_p4 }
  0xdc   : > { %p5895_p9 = pnand %p5894_p2, %p5888_p3 }
  0xde   : > { %5898 = shalt.err (!%p5895_p9)
}
  0xdf   : > { %5283 = dma.hbm_to_vmem [thread:$0]  (!%p8428_p6), %s8315_s7, 1024, %s337_s28, [#allocation14], %s8430_s18, %s8430_s18, %s8429_s11  }
  0xe0   : > { %s5229_s25 = smul.u32 6144, %s6047_s12  ;;  %s5899_s14 = scalar_lea.hbm %s8316_s8, 2048 }
  0xe1   : > { %p5900_p1 = scmp.ne.s32.totalorder %s8316_s8, %s5899_s14  ;;  %p5906_p7 = scmp.lt.u32.totalorder %s5899_s14, %s8316_s8 }
  0xe3   : > { %p5902_p5 = pnand %p5900_p1, %p6186_p8 }
  0xe5   : > { %p5903_p11 = pneg %p5902_p5 }
  0xe7   : > { %p5908_p10 = pnand %p5906_p7, %p5903_p11 }
  0xe9   : > { %5911 = shalt.err (!%p5908_p10)
}
  0xea   : > { %s5912_s11 = scalar_lea.vmem %s350_s20, 2048  ;;  %p5920_p12 = scmp.lt.s32.totalorder %s350_s20, %s350_s20 }
  0xeb   : > { %p5913_p13 = scmp.ne.s32.totalorder %s350_s20, %s5912_s11  ;;  %p5921_p0 = scmp.lt.s32.totalorder %s5912_s11, %s5912_s11 }
  0xed   : > { %p5915_p4 = pnand %p5913_p13, %p6186_p8  ;;  %p5922_p2 = por %p5921_p0, %p5920_p12 }
  0xef   : > { %p5916_p3 = pneg %p5915_p4 }
  0xf1   : > { %p5923_p9 = pnand %p5922_p2, %p5916_p3 }
  0xf3   : > { %5926 = shalt.err (!%p5923_p9)
}
  0xf4   : > { %5286 = dma.hbm_to_vmem [thread:$0]  (!%p8428_p6), %s8316_s8, 2048, %s350_s20, [#allocation17], %s8426_s17, %s8426_s17, %s8425_s29  }
  0xf5   : > { %s6424_s3 = scalar_lea.hbm %s8310_s2, %s5229_s25  ;;  %s388_s13 = scalar_lea.vmem [#allocation8], %s6301_s4 }
  0xf6   : > { %s395_s19 = sshll.u32 %s388_s13, 4  ;;  %s5927_s22 = scalar_lea.hbm %s6424_s3, 6144  ;;  %s6427_s19 = int_to_ptr.vmem [resolvable:$true] %s395_s19 }
  0xf7   : > { %p5928_p8 = scmp.ne.s32.totalorder %s6424_s3, %s5927_s22  ;;  %p8431_p1 = scmp.ne.s32.totalorder %s8424_s24, 0 }
  0xf8   : > { %s5932_s14 = scalar_lea.hbm %s8310_s2, 12288  ;;  %p5933_p6 = scmp.lt.u32.totalorder %s6424_s3, %s8310_s2 }
  0xf9   : > { %p8432_p5 = pneg %p8431_p1  ;;  %p5934_p10 = scmp.lt.u32.totalorder %s5932_s14, %s5927_s22 }
  0xfa   : > { %p5936_p4 = scmp.lt.u32.totalorder %s5927_s22, %s6424_s3 }
  0xfb   : > { %p5930_p11 = pnand %p5928_p8, %p8432_p5  ;;  %p5935_p13 = por %p5934_p10, %p5933_p6 }
  0xfd   : > { %p5931_p7 = pneg %p5930_p11  ;;  %p5937_p3 = por %p5936_p4, %p5935_p13 }
  0xff   : > { %p5938_p12 = pnand %p5937_p3, %p5931_p7 }
 0x101   : > { %5941 = shalt.err (!%p5938_p12)
}
 0x102   : > { %s5942_s4 = scalar_lea.vmem %s6427_s19, 6144  ;;  %p8433_p2 = pmov %p8432_p5 }
 0x103   : > { %p5943_p0 = scmp.ne.s32.totalorder %s6427_s19, %s5942_s4  ;;  %s6061_s1 = smov [#allocation8]  }
 0x104   : > { %s5947_s30 = sshll.u32 %s6061_s1, 4  ;;  %s5948_s30 = int_to_ptr.vmem [resolvable:$false] %s5947_s30 }
 0x105   : > { %p5945_p9 = pnand %p5943_p0, %p8433_p2  ;;  %s5949_s9 = scalar_lea.vmem %s5948_s30, 12288 }
 0x106   : > { %p5950_p5 = scmp.lt.s32.totalorder %s6427_s19, %s5948_s30  ;;  %p5951_p11 = scmp.lt.s32.totalorder %s5949_s9, %s5942_s4 }
 0x107   : > { %p5946_p8 = pneg %p5945_p9 }
 0x108   : > { %p5952_p6 = por %p5951_p11, %p5950_p5 }
 0x10a   : > { %p5953_p10 = pnand %p5952_p6, %p5946_p8 }
 0x10c   : > { %5956 = shalt.err (!%p5953_p10)
}
 0x10d   : > { %5293 = dma.hbm_to_vmem [thread:$0]  (!%p8431_p1), %s6424_s3, 6144, %s6427_s19, %s6305_s6, %s8426_s17, %s8426_s17, %s8425_s29  }
 0x10e   : > { %p8434_p7 = scmp.ne.s32.totalorder %s8409_s16, 0 }
 0x110   : > { %407 = sbr.rel (%p8434_p7) target bundleno = 3659 (0xe4b), region = 56 }
 0x117   : > { %s409_s11 = sand.u32 1, %s6154_s15   ;;  %s6460_s18 = sand.u32 1, %s6039_s10  }
 0x118   : > { %s4548_s28 = sshll.u32 %s6460_s18, 7  ;;  %s410_s24 = scalar_lea.sflag [#allocation4], %s409_s11 }
 0x119   : > { %s6465_s0 = scalar_lea.vmem [#allocation3], %s4548_s28  ;;  %p8435_p13 = scmp.ne.s32.totalorder %s8418_s21, 0 }
 0x11b   : > { %6002 = dma.done.wait (%p8435_p13), %s410_s24, 2048  }
 0x11c   : > { %6004 = vsyncadd (%p8435_p13), %s410_s24, 4294965248  ;;  %p8436_p1 = scmp.eq.s32.totalorder %s6154_s15, 0 }
 0x11e   : > { %6006 = dma.done.wait (%p8436_p1), [#allocation7], 1024   ;;  %p8437_p4 = pmov %p8436_p1 }
 0x11f   : > { %s5230_s6 = smul.u32 384, %s6460_s18 }
 0x120   : > { %6008 = vsyncadd (%p8437_p4), [#allocation7], 4294966272 }
 0x121   : > { %s6476_s16 = scalar_lea.vmem [#allocation8], %s5230_s6 }
 0x122   : > { %6010 = dma.done.wait (%p8435_p13), %s410_s24, 6144  }
 0x123   : > { %6012 = vsyncadd (%p8435_p13), %s410_s24, 4294961152  ;;  %p8438_p3 = pmov %p8436_p1 }
 0x124   : > { %p8439_p12 = pmov %p8436_p1 }
 0x125   : > { %6014 = dma.done.wait (%p8438_p3), [#allocation7], 3072  }
 0x126   : > { %6016 = vsyncadd (%p8439_p12), [#allocation7], 4294964224  ;;  %p8440_p0 = pmov %p8436_p1 }
 0x128   : > { %6018 = dma.done.wait (%p8440_p0), [#allocation11], 3072   ;;  %p8441_p2 = pmov %p8440_p0 }
 0x129   : > { %p8442_p9 = pmov %p8440_p0 }
 0x12a   : > { %6020 = vsyncadd (%p8441_p2), [#allocation11], 4294964224 }
 0x12b   : > { %6022 = dma.done.wait (%p8442_p9), [#allocation14], 3072   ;;  %p8443_p8 = pmov %p8440_p0 }
 0x12c   : > { %p8444_p5 = pmov %p8440_p0 }
 0x12d   : > { %6024 = vsyncadd (%p8443_p8), [#allocation14], 4294964224 }
 0x12e   : > { %6026 = dma.done.wait (%p8444_p5), [#allocation17], 2048   ;;  %p8445_p11 = pmov %p8440_p0 }
 0x12f   : > { %v6062_v0 = vmov 0   ;;  %v491_v1 = vld [vmem:[%s6465_s0] sm:$0xff]  ;;  %v492_v2 = vld [vmem:[%s6465_s0 + $0x8] sm:$0xff]  ;;  %v493_v3 = vld [vmem:[%s6465_s0 + $0x10] sm:$0xff]  ;;  %vm1396_vm0 = vcmask 261120   ;;  %s6063_s21 = smov 1  }
 0x130   : > { %6028 = vsyncadd (%p8445_p11), [#allocation17], 4294965248  ;;  %5378 = vset.pattern.permute.xlu1 %v6062_v0  ;;  %5377 = vset.pattern.permute.xlu0 %v6062_v0  ;;  %v555_v4 = vpack.c.bf16 %v492_v2, %v491_v1  ;;  %v494_v5 = vld [vmem:[%s6465_s0 + $0x18] sm:$0xff]  ;;  %v495_v7 = vld [vmem:[%s6465_s0 + $0x20] sm:$0xff]  ;;  %s6064_s29 = smov 280   ;;  %s6065_s17 = smov 264  }
 0x131   : > { %v556_v6 = vpack.c.bf16 %v494_v5, %v493_v3  ;;  %v496_v8 = vld [vmem:[%s6465_s0 + $0x28] sm:$0xff]  ;;  %v497_v9 = vld [vmem:[%s6465_s0 + $0x30] sm:$0xff]  ;;  %v498_v11 = vld [vmem:[%s6465_s0 + $0x38] sm:$0xff]  ;;  %s6066_s27 = smov 312   ;;  %s6067_s3 = smov 272  }
 0x132   : > { %4860 = vmatprep.subr.bf16.mxu0 %v555_v4  ;;  %v557_v10 = vpack.c.bf16 %v496_v8, %v495_v7  ;;  %v5379_v12 = vld [vmem:[#allocation9] sm:$0xff]   ;;  %v558_v13 = vpack.c.bf16 %v498_v11, %v497_v9  ;;  %v500_v15 = vld [vmem:[%s6465_s0 + $0x48] sm:$0xff]  ;;  %v1348_v16 = vld [vmem:[#allocation13 + $0x10] sm:$0xff]  ;;  %s6068_s13 = smov 256   ;;  %s6069_s19 = smov 304  }
 0x133   : > { %4861 = vmatpush3.bf16.msra.mxu0 %v555_v4  ;;  %4876 = vmatprep.mubr.bf16.mxu0 %v5379_v12  ;;  %v499_v14 = vld [vmem:[%s6465_s0 + $0x40] sm:$0xff]  ;;  %v501_v17 = vld [vmem:[%s6465_s0 + $0x50] sm:$0xff]  ;;  %v1349_v19 = vld [vmem:[#allocation13 + $0x18] sm:$0xff]  ;;  %s6070_s22 = smov 288   ;;  %s6071_s20 = smov 296  }
 0x134   : > { %4862 = vmatprep.subr.bf16.mxu0 %v556_v6  ;;  %1362 = vperm.xlu1 %5378, %v1348_v16   ;;  %v559_v18 = vpack.c.bf16 %v500_v15, %v499_v14  ;;  %v5385_v20 = vld [vmem:[#allocation6] sm:$0xff]   ;;  %v502_v21 = vld [vmem:[%s6465_s0 + $0x58] sm:$0xff]  ;;  %v5386_v22 = vld [vmem:[#allocation6 + $0x8] sm:$0xff]   ;;  %s6072_s23 = smov 336   ;;  %s6073_s14 = smov 344  }
 0x135   : > { %4924 = vmatprep.subr.bf16.mxu1 %v5385_v20  ;;  %v560_v23 = vpack.c.bf16 %v502_v21, %v501_v17  ;;  %v503_v24 = vld [vmem:[%s6465_s0 + $0x60] sm:$0xff]  ;;  %v504_v26 = vld [vmem:[%s6465_s0 + $0x68] sm:$0xff]  ;;  %v5387_v27 = vld [vmem:[#allocation6 + $0x10] sm:$0xff]   ;;  %s6074_s25 = smov 320   ;;  %s6075_s26 = smov 328  }
 0x136   : > { %v1312_v25 = vld [vmem:[#allocation12] sm:$0xff]  ;;  %4925 = vmatpush3.bf16.msra.mxu1 %v5385_v20  ;;  %v505_v28 = vld [vmem:[%s6465_s0 + $0x70] sm:$0xff]  ;;  %v561_v29 = vpack.c.bf16 %v504_v26, %v503_v24  ;;  %v506_v30 = vld [vmem:[%s6465_s0 + $0x78] sm:$0xff]  ;;  %s6076_s4 = smov 368   ;;  %s6077_s1 = smov 376  }
 0x137   : > { %4863 = vmatpush3.bf16.msra.mxu0 %v556_v6  ;;  %4926 = vmatprep.subr.bf16.mxu1 %v5386_v22  ;;  %v1313_v31 = vld [vmem:[#allocation12 + $0x8] sm:$0xff]  ;;  %v5388_v32 = vld [vmem:[#allocation6 + $0x18] sm:$0xff]   ;;  %v5393_v33 = vld [vmem:[#allocation10] sm:$0xff]   ;;  %v562_v35 = vpack.c.bf16 %v506_v30, %v505_v28  ;;  %s6078_s30 = smov 352   ;;  %s6079_s9 = smov 360  }
 0x138   : > { %4864 = vmatprep.subr.bf16.mxu0 %v557_v10  ;;  %1367 = vperm.xlu1 %5378, %v1349_v19   ;;  %v1346_v34 = vld [vmem:[#allocation13] sm:$0xff]  ;;  %v1314_v36 = vld [vmem:[#allocation12 + $0x10] sm:$0xff]  ;;  %v1347_v38 = vld [vmem:[#allocation13 + $0x8] sm:$0xff]  ;;  %s4675_s11 = sshll.u32 %s6154_s15, 11  ;;  %s8236_s24 = scalar_lea.vmem [#allocation18], %s4548_s28 }
 0x139   : > { %v5389_v37 = vld [vmem:[#allocation6 + $0x20] sm:$0xff]   ;;  %4940 = vmatprep.mubr.bf16.mxu1 %v5393_v33  ;;  %v1315_v39 = vld [vmem:[#allocation12 + $0x18] sm:$0xff]  ;;  %1352 = vperm.xlu0 %5377, %v1346_v34   ;;  %v5390_v40 = vld [vmem:[#allocation6 + $0x28] sm:$0xff]   ;;  %s8634_s6 = sld [smem:[#allocation88_spill]] }
 0x13a   : > { %4927 = vmatpush3.bf16.msra.mxu1 %v5386_v22  ;;  %v5380_v41 = vld [vmem:[#allocation9 + $0x8] sm:$0xff]   ;;  %v5381_v42 = vld [vmem:[#allocation9 + $0x10] sm:$0xff]   ;;  %v2007_v43 = vld [vmem:[#allocation13 + $0x20] sm:$0xff] }
 0x13b   : > { %4865 = vmatpush3.bf16.msra.mxu0 %v557_v10  ;;  %4928 = vmatprep.subr.bf16.mxu1 %v5387_v27  ;;  %v5391_v44 = vld [vmem:[#allocation6 + $0x30] sm:$0xff]   ;;  %v5392_v46 = vld [vmem:[#allocation6 + $0x38] sm:$0xff]   ;;  %v5383_v48 = vld [vmem:[#allocation9 + $0x20] sm:$0xff]  }
 0x13c   : > { %4866 = vmatprep.subr.bf16.mxu0 %v558_v13  ;;  %1318 = vperm.xlu1 %5378, %v1312_v25   ;;  %v2009_v45 = vld [vmem:[#allocation13 + $0x30] sm:$0xff]  ;;  %v5382_v47 = vld [vmem:[#allocation9 + $0x18] sm:$0xff]   ;;  %v1972_v49 = vld [vmem:[#allocation12 + $0x20] sm:$0xff] }
 0x13d   : > { %1357 = vperm.xlu0 %5377, %v1347_v38   ;;  %v5394_v50 = vld [vmem:[#allocation10 + $0x8] sm:$0xff]   ;;  %v1974_v51 = vld [vmem:[#allocation12 + $0x30] sm:$0xff]  ;;  %v2667_v54 = vld [vmem:[#allocation13 + $0x40] sm:$0xff] }
 0x13e   : > { %4929 = vmatpush3.bf16.msra.mxu1 %v5387_v27  ;;  %v5384_v52 = vld [vmem:[#allocation9 + $0x28] sm:$0xff]   ;;  %v5395_v53 = vld [vmem:[#allocation9 + $0x30] sm:$0xff]   ;;  %v5396_v56 = vld [vmem:[#allocation9 + $0x38] sm:$0xff]  }
 0x13f   : > { %4867 = vmatpush3.bf16.msra.mxu0 %v558_v13  ;;  %4930 = vmatprep.subr.bf16.mxu1 %v5388_v32  ;;  %v2669_v55 = vld [vmem:[#allocation13 + $0x50] sm:$0xff]  ;;  %v2670_v57 = vld [vmem:[#allocation13 + $0x58] sm:$0xff]  ;;  %v5397_v58 = vld [vmem:[#allocation9 + $0x40] sm:$0xff]  }
 0x140   : > { %4868 = vmatprep.subr.bf16.mxu0 %v559_v18  ;;  %1323 = vperm.xlu1 %5378, %v1313_v31   ;;  %v5398_v59 = vld [vmem:[#allocation9 + $0x48] sm:$0xff]   ;;  %v5399_v61 = vld [vmem:[#allocation10 + $0x10] sm:$0xff]   ;;  %v5400_v62 = vld [vmem:[#allocation10 + $0x18] sm:$0xff]  }
 0x141   : > { %v5401_v63 = vld [vmem:[#allocation10 + $0x20] sm:$0xff]   ;;  %v5402_v1 = vld [vmem:[#allocation10 + $0x28] sm:$0xff]   ;;  %v5403_v2 = vld [vmem:[#allocation10 + $0x30] sm:$0xff]  }
 0x142   : > { %4931 = vmatpush3.bf16.msra.mxu1 %v5388_v32  ;;  %v5404_v4 = vld [vmem:[#allocation10 + $0x38] sm:$0xff]   ;;  %v509_v11 = vld [vmem:[%s6476_s16 + $0x10] sm:$0xff]  ;;  %v507_v13 = vld [vmem:[%s6476_s16] sm:$0xff] }
 0x143   : > { %4869 = vmatpush3.bf16.msra.mxu0 %v559_v18  ;;  %4932 = vmatprep.subr.bf16.mxu1 %v5389_v37  ;;  %v510_v15 = vld [vmem:[%s6476_s16 + $0x18] sm:$0xff]  ;;  %v508_v18 = vld [vmem:[%s6476_s16 + $0x8] sm:$0xff] }
 0x144   : > { %4870 = vmatprep.subr.bf16.mxu0 %v560_v23  ;;  %1328 = vperm.xlu1 %5378, %v1314_v36  }
 0x146   : > { %4933 = vmatpush3.bf16.msra.mxu1 %v5389_v37 }
 0x147   : > { %4871 = vmatpush3.bf16.msra.mxu0 %v560_v23  ;;  %4934 = vmatprep.subr.bf16.mxu1 %v5390_v40 }
 0x148   : > { %4872 = vmatprep.subr.bf16.mxu0 %v561_v29  ;;  %1333 = vperm.xlu1 %5378, %v1315_v39  }
 0x14a   : > { %4935 = vmatpush3.bf16.msra.mxu1 %v5390_v40 }
 0x14b   : > { %4873 = vmatpush3.bf16.msra.mxu0 %v561_v29  ;;  %4936 = vmatprep.subr.bf16.mxu1 %v5391_v44 }
 0x14c   : > { %4874 = vmatprep.subr.bf16.mxu0 %v562_v35  ;;  %2013 = vperm.xlu1 %5378, %v2007_v43  }
 0x14e   : > { %4937 = vmatpush3.bf16.msra.mxu1 %v5391_v44 }
 0x14f   : > { %4875 = vmatpush3.bf16.msra.mxu0 %v562_v35  ;;  %4938 = vmatprep.subr.bf16.mxu1 %v5392_v46 }
 0x150   : > { %2023 = vperm.xlu1 %5378, %v2009_v45  }
 0x152   : > { %4877 = vmatmul.mubr.bf16.vlgmr.msra.gmra.mrb[0].mxu0 %v5380_v41  ;;  %4939 = vmatpush3.bf16.msra.mxu1 %v5392_v46 }
 0x153   : > { %4880 = vmatprep.mubr.bf16.mxu0 %v5381_v42 }
 0x154   : > { %1978 = vperm.xlu1 %5378, %v1972_v49  }
 0x155   : > { %4941 = vmatmul.mubr.bf16.vlgmr.msra.gmra.mrb[0].mxu1 %v5394_v50 }
 0x156   : > { %4944 = vmatprep.mubr.bf16.mxu1 %v5399_v61 }
 0x158   : > { %1988 = vperm.xlu1 %5378, %v1974_v51  }
 0x15a   : > { %4881 = vmatmul.mubr.bf16.gmra.mrb[4].mxu0 %v5382_v47 }
 0x15b   : > { %4884 = vmatprep.mubr.bf16.mxu0 %v5383_v48 }
 0x15c   : > { %2673 = vperm.xlu1 %5378, %v2667_v54  }
 0x15d   : > { %4945 = vmatmul.mubr.bf16.gmra.mrb[4].mxu1 %v5400_v62 }
 0x15e   : > { %4948 = vmatprep.mubr.bf16.mxu1 %v5401_v63 }
 0x160   : > { %2683 = vperm.xlu1 %5378, %v2669_v55  }
 0x162   : > { %4885 = vmatmul.mubr.bf16.gmra.mrb[8].mxu0 %v5384_v52 }
 0x163   : > { %4888 = vmatprep.mubr.bf16.mxu0 %v5395_v53  ;;  %v517_v53 = vld [vmem:[%s6476_s16 + $0x50] sm:$0xff] }
 0x164   : > { %2688 = vperm.xlu1 %5378, %v2670_v57   ;;  %v518_v57 = vld [vmem:[%s6476_s16 + $0x58] sm:$0xff] }
 0x165   : > { %4949 = vmatmul.mubr.bf16.gmra.mrb[8].mxu1 %v5402_v1 }
 0x166   : > { %4952 = vmatprep.mubr.bf16.mxu1 %v5403_v2 }
 0x16a   : > { %4889 = vmatmul.mubr.bf16.gmra.mrb[12].mxu0 %v5396_v56 }
 0x16b   : > { %4892 = vmatprep.mubr.bf16.mxu0 %v5397_v58 }
 0x16d   : > { %4953 = vmatmul.mubr.bf16.gmra.mrb[12].mxu1 %v5404_v4 }
 0x172   : > { %4893 = vmatmul.mubr.bf16.gmra.mrb[16].mxu0 %v5398_v59 }
 0x1b3   : > { %v1363_v60 = vpop.permute.xlu1 %1362 }
 0x1b7   : > { %v1368_v0 = vpop.permute.xlu1 %1367 }
 0x1b8   : > { %v1353_v12 = vpop.permute.xlu0 %1352 }
 0x1bb   : > { %v1319_v3 = vpop.permute.xlu1 %1318 }
 0x1bc   : > { %v1358_v30 = vpop.permute.xlu0 %1357 }
 0x1bf   : > { %v1324_v5 = vpop.permute.xlu1 %1323 }
 0x1c3   : > { %v1329_v6 = vpop.permute.xlu1 %1328 }
 0x1c7   : > { %v1334_v7 = vpop.permute.xlu1 %1333 }
 0x1cb   : > { %v6514_v8 = vpop.permute.xlu1 %2013 }
 0x1cf   : > { %v6516_v9 = vpop.permute.xlu1 %2023 }
 0x1d3   : > { %v6518_v10 = vpop.permute.xlu1 %1978 }
 0x1d7   : > { %v6524_v19 = vpop.permute.xlu1 %1988 }
 0x1db   : > { %v6526_v40 = vpop.permute.xlu1 %2673 }
 0x1df   : > { %v2684_v52 = vpop.permute.xlu1 %2683 }
 0x1e3   : > { %v2689_v2 = vpop.permute.xlu1 %2688 }
 0x225   : > { %v4878_v14 = vpop.f32.mrb[0].mxu0 }
 0x226   : > { %v798_v16 = vadd.f32 %v4878_v14, %v509_v11  ;;  %v789_v17 = vpop.f32.mrb[1].mxu0  ;;  %v2633_v11 = vld [vmem:[#allocation12 + $0x48] sm:$0xff]  ;;  %v2634_v14 = vld [vmem:[#allocation12 + $0x50] sm:$0xff] }
 0x227   : > { %v790_v20 = vadd.f32 %v789_v17, %v507_v13  ;;  %v4879_v21 = vpop.f32.mrb[2].mxu0  ;;  %v2008_v13 = vld [vmem:[#allocation13 + $0x28] sm:$0xff] }
 0x228   : > { %v1338_v22 = vadd.f32 %v1329_v6, %v798_v16  ;;  %v1372_v23 = vadd.f32 %v1363_v60, %v798_v16  ;;  %v801_v24 = vadd.f32 %v4879_v21, %v510_v15  ;;  %v792_v25 = vpop.f32.mrb[3].mxu0  ;;  %v4942_v51 = vpop.f32.mrb[0].mxu1  ;;  %v2010_v15 = vld [vmem:[#allocation13 + $0x38] sm:$0xff]  ;;  %v1973_v17 = vld [vmem:[#allocation12 + $0x28] sm:$0xff] }
 0x229   : > { %v1336_v26 = vadd.f32 %v1319_v3, %v790_v20  ;;  %v1370_v27 = vadd.f32 %v1353_v12, %v790_v20  ;;  %v793_v28 = vadd.f32 %v792_v25, %v508_v18  ;;  %v1142_v54 = vpop.f32.mrb[1].mxu1  ;;  %v2635_v16 = vld [vmem:[#allocation12 + $0x58] sm:$0xff]  ;;  %v2668_v20 = vld [vmem:[#allocation13 + $0x48] sm:$0xff] }
 0x22a   : > { %v1342_v29 = vmul.f32 0.17677669, %v1338_v22  ;;  %v1339_v31 = vadd.f32 %v1334_v7, %v801_v24  ;;  %v1373_v32 = vadd.f32 %v1368_v0, %v801_v24  ;;  %v1376_v33 = vmul.f32 0.17677669, %v1372_v23  ;;  %v4943_v55 = vpop.f32.mrb[2].mxu1  ;;  %v2632_v7 = vld [vmem:[#allocation12 + $0x40] sm:$0xff] }
 0x22b   : > { %v1340_v34 = vmul.f32 0.17677669, %v1336_v26  ;;  %v1337_v35 = vadd.f32 %v1324_v5, %v793_v28  ;;  %v1371_v36 = vadd.f32 %v1358_v30, %v793_v28  ;;  %v1374_v37 = vmul.f32 0.17677669, %v1370_v27  ;;  %v1145_v59 = vpop.f32.mrb[3].mxu1  ;;  %v1975_v18 = vld [vmem:[#allocation12 + $0x38] sm:$0xff] }
 0x22c   : > { %v1343_v38 = vmul.f32 0.17677669, %v1339_v31  ;;  %v1377_v39 = vmul.f32 0.17677669, %v1373_v32  ;;  %v1222_v58 = vpack.c.bf16 %v4943_v55, %v4942_v51  ;;  %v1221_v62 = vpack.c.bf16 %v1145_v59, %v1142_v54  ;;  %v3327_v22 = vld [vmem:[#allocation13 + $0x60] sm:$0xff]  ;;  %v3329_v24 = vld [vmem:[#allocation13 + $0x70] sm:$0xff] }
 0x22d   : > { %v1341_v41 = vmul.f32 0.17677669, %v1337_v35  ;;  %v1375_v42 = vmul.f32 0.17677669, %v1371_v36  ;;  %v6528_v43 = vpop.f32.mrb[4].mxu0  ;;  %v3330_v25 = vld [vmem:[#allocation13 + $0x78] sm:$0xff] }
 0x22e   : > { %v1345_v44 = vpack.c.bf16 %v1343_v38, %v1342_v29  ;;  %v1379_v45 = vpack.c.bf16 %v1377_v39, %v1376_v33  ;;  %v6530_v46 = vpop.f32.mrb[5].mxu0  ;;  %4956 = vmatprep.subr.bf16.mxu1 %v1221_v62  ;;  %v525_v28 = vld [vmem:[%s6476_s16 + $0x90] sm:$0xff]  ;;  %v523_v30 = vld [vmem:[%s6476_s16 + $0x80] sm:$0xff]  ;;  %v526_v31 = vld [vmem:[%s6476_s16 + $0x98] sm:$0xff] }
 0x22f   : > { %v1378_v47 = vpack.c.bf16 %v1375_v42, %v1374_v37  ;;  %v1344_v48 = vpack.c.bf16 %v1341_v41, %v1340_v34  ;;  %v6532_v49 = vpop.f32.mrb[6].mxu0  ;;  %4957 = vmatpush3.bf16.msra.mxu1 %v1221_v62  ;;  %v524_v35 = vld [vmem:[%s6476_s16 + $0x88] sm:$0xff] }
 0x230   : > { %v6534_v50 = vpop.f32.mrb[7].mxu0  ;;  %4958 = vmatprep.subr.bf16.mxu1 %v1222_v58 }
 0x231   : > { %1380 = vxpose.xlu0.c.b16.start [1/2] (short) %v1378_v47, 128  ;;  %1613 = vxpose.xlu1.c.b16.start [1/2] (short) %v1344_v48, 128 }
 0x233   : > { %4959 = vmatpush3.bf16.msra.mxu1 %v1222_v58 }
 0x235   : > { %v4886_v56 = vpop.f32.mrb[8].mxu0  ;;  %1381 = vxpose.xlu0.c.b16.end [2/2] (short) %v1379_v45, 128  ;;  %1614 = vxpose.xlu1.c.b16.end [2/2] (short) %v1345_v44, 128 }
 0x236   : > { %v6538_v60 = vadd.f32 %v4886_v56, %v517_v53  ;;  %v6540_v61 = vpop.f32.mrb[9].mxu0 }
 0x237   : > { %v4887_v63 = vpop.f32.mrb[10].mxu0 }
 0x238   : > { %v2693_v0 = vadd.f32 %v2684_v52, %v6538_v60  ;;  %v6543_v1 = vadd.f32 %v4887_v63, %v518_v57  ;;  %v6552_v12 = vpop.f32.mrb[11].mxu0 }
 0x23a   : > { %v2694_v3 = vadd.f32 %v2689_v2, %v6543_v1  ;;  %v6546_v4 = vmul.f32 0.17677669, %v2693_v0  ;;  %v4946_v0 = vpop.f32.mrb[4].mxu1 }
 0x23b   : > { %v1158_v2 = vpop.f32.mrb[5].mxu1 }
 0x23c   : > { %v6548_v5 = vmul.f32 0.17677669, %v2694_v3 }
 0x23d   : > { %v6554_v21 = vpop.f32.mrb[12].mxu0 }
 0x23e   : > { %v2700_v6 = vpack.c.bf16 %v6548_v5, %v6546_v4  ;;  %v6556_v23 = vpop.f32.mrb[13].mxu0 }
 0x23f   : > { %v6558_v26 = vpop.f32.mrb[14].mxu0 }
 0x240   : > { %v6560_v27 = vpop.f32.mrb[15].mxu0 }
 0x245   : > { %v4894_v29 = vpop.f32.mrb[16].mxu0 }
 0x246   : > { %v862_v32 = vadd.f32 %v4894_v29, %v525_v28  ;;  %v853_v33 = vpop.f32.mrb[17].mxu0 }
 0x247   : > { %v4895_v34 = vpop.f32.mrb[18].mxu0  ;;  %v854_v37 = vadd.f32 %v853_v33, %v523_v30  ;;  %v514_v33 = vld [vmem:[%s6476_s16 + $0x38] sm:$0xff] }
 0x248   : > { %v865_v38 = vadd.f32 %v4895_v34, %v526_v31  ;;  %v856_v39 = vpop.f32.mrb[19].mxu0 }
 0x249   : > { %v857_v42 = vadd.f32 %v856_v39, %v524_v35 }
 0x24a   : > { %v1206_v41 = vpack.c.bf16 %v865_v38, %v862_v32 }
 0x24b   : > { %v1205_v45 = vpack.c.bf16 %v857_v42, %v854_v37 }
 0x24d   : > { %4976 = vmatprep.subr.bf16.mxu1 %v1205_v45 }
 0x251   : > { %2638 = vperm.xlu1 %5378, %v2632_v7   ;;  %v4947_v7 = vpop.f32.mrb[6].mxu1 }
 0x255   : > { %2643 = vperm.xlu1 %5378, %v2633_v11   ;;  %v1224_v11 = vpack.c.bf16 %v4947_v7, %v4946_v0 }
 0x256   : > { %2018 = vperm.xlu0 %5377, %v2008_v13   ;;  %v1161_v13 = vpop.f32.mrb[7].mxu1 }
 0x259   : > { %2648 = vperm.xlu1 %5378, %v2634_v14   ;;  %v1223_v14 = vpack.c.bf16 %v1161_v13, %v1158_v2 }
 0x25a   : > { %2028 = vperm.xlu0 %5377, %v2010_v15   ;;  %v511_v15 = vld [vmem:[%s6476_s16 + $0x20] sm:$0xff] }
 0x25d   : > { %2653 = vperm.xlu1 %5378, %v2635_v16   ;;  %v515_v16 = vld [vmem:[%s6476_s16 + $0x40] sm:$0xff] }
 0x25e   : > { %1983 = vperm.xlu0 %5377, %v1973_v17   ;;  %v516_v17 = vld [vmem:[%s6476_s16 + $0x48] sm:$0xff]  ;;  %v822_v28 = vadd.f32 %v6540_v61, %v515_v16 }
 0x25f   : > { %v825_v29 = vadd.f32 %v6552_v12, %v516_v17 }
 0x262   : > { %1993 = vperm.xlu0 %5377, %v1975_v18   ;;  %v512_v18 = vld [vmem:[%s6476_s16 + $0x28] sm:$0xff] }
 0x263   : > { %v809_v31 = vadd.f32 %v6534_v50, %v512_v18  ;;  %v817_v50 = vadd.f32 %v6532_v49, %v514_v33 }
 0x266   : > { %2678 = vperm.xlu0 %5377, %v2668_v20   ;;  %v806_v20 = vadd.f32 %v6530_v46, %v511_v15 }
 0x268   : > { %v2031_v37 = vadd.f32 %v6514_v8, %v806_v20 }
 0x26a   : > { %3333 = vperm.xlu0 %5377, %v3327_v22  }
 0x26e   : > { %3343 = vperm.xlu0 %5377, %v3329_v24   ;;  %v4950_v24 = vpop.f32.mrb[8].mxu1 }
 0x26f   : > { %v1174_v30 = vpop.f32.mrb[9].mxu1 }
 0x270   : > { %v4951_v32 = vpop.f32.mrb[10].mxu1 }
 0x271   : > { %v6591_v35 = vpack.c.bf16 %v4951_v32, %v4950_v24  ;;  %v2691_v24 = vadd.f32 %v6526_v40, %v822_v28 }
 0x272   : > { %3348 = vperm.xlu0 %5377, %v3330_v25   ;;  %v513_v25 = vld [vmem:[%s6476_s16 + $0x30] sm:$0xff] }
 0x273   : > { %v814_v46 = vadd.f32 %v6528_v43, %v513_v25 }
 0x297   : > { %v1388_v36 = vpop.trf.xlu0  ;;  %v1621_v48 = vpop.trf.xlu1 }
 0x298   : > { %4960 = vmatprep.mubr.msk.bf16.mxu1 %vm1396_vm0, %v1388_v36  ;;  %v1177_v36 = vpop.f32.mrb[11].mxu1 }
 0x299   : > { %v6596_v61 = vpack.c.bf16 %v1177_v36, %v1174_v30  ;;  %v4954_v43 = vpop.f32.mrb[12].mxu1 }
 0x29b   : > { %v1389_v44 = vpop.trf.xlu0  ;;  %v1622_v52 = vpop.trf.xlu1 }
 0x29c   : > { %4961 = vmatmul.mubr.msk.bf16.vlgmr.msra.gmra.mrb[16].mxu1 %vm1396_vm0, %v1389_v44 }
 0x29d   : > { %4977 = vmatpush3.bf16.msra.mxu1 %v1205_v45  ;;  %v2033_v45 = vadd.f32 %v6516_v9, %v814_v46 }
 0x29e   : > { %4978 = vmatprep.subr.bf16.mxu1 %v1206_v41 }
 0x29f   : > { %v1390_v47 = vpop.trf.xlu0  ;;  %v1623_v55 = vpop.trf.xlu1 }
 0x2a0   : > { %4964 = vmatprep.mubr.msk.bf16.mxu1 %vm1396_vm0, %v1390_v47  ;;  %v2035_v47 = vmul.f32 0.17677669, %v2031_v37 }
 0x2a1   : > { %4979 = vmatpush3.bf16.msra.mxu1 %v1206_v41 }
 0x2a2   : > { %5016 = vmatprep.subr.bf16.mxu1 %v1223_v14 }
 0x2a3   : > { %v1391_v51 = vpop.trf.xlu0  ;;  %v1624_v57 = vpop.trf.xlu1 }
 0x2a4   : > { %4965 = vmatmul.mubr.msk.bf16.gmra.mrb[20].mxu1 %vm1396_vm0, %v1391_v51 }
 0x2a7   : > { %v1392_v53 = vpop.trf.xlu0  ;;  %v1625_v59 = vpop.trf.xlu1 }
 0x2a8   : > { %4968 = vmatprep.mubr.msk.bf16.mxu1 %vm1396_vm0, %v1392_v53  ;;  %v1190_v53 = vpop.f32.mrb[13].mxu1 }
 0x2ab   : > { %v1393_v54 = vpop.trf.xlu0  ;;  %v1626_v62 = vpop.trf.xlu1 }
 0x2ac   : > { %4969 = vmatmul.mubr.msk.bf16.gmra.mrb[24].mxu1 %vm1396_vm0, %v1393_v54 }
 0x2af   : > { %v1394_v56 = vpop.trf.xlu0  ;;  %v1627_v63 = vpop.trf.xlu1 }
 0x2b0   : > { %4972 = vmatprep.mubr.msk.bf16.mxu1 %vm1396_vm0, %v1394_v56  ;;  %v4955_v56 = vpop.f32.mrb[14].mxu1 }
 0x2b1   : > { %v1193_v49 = vpop.f32.mrb[15].mxu1 }
 0x2b2   : > { %v6604_v0 = vpack.c.bf16 %v1193_v49, %v1190_v53 }
 0x2b3   : > { %v1395_v58 = vpop.trf.xlu0  ;;  %v1628_v3 = vpop.trf.xlu1 }
 0x2b4   : > { %4973 = vmatmul.mubr.msk.bf16.gmra.mrb[28].mxu1 %vm1396_vm0, %v1395_v58  ;;  %v6601_v58 = vpack.c.bf16 %v4955_v56, %v4954_v43  ;;  %8447 = vst [vmem:[#allocation34_spill] sm:$0xff] %v6604_v0 }
 0x2b5   : > { %4980 = vmatprep.mubr.msk.bf16.mxu1 %vm1396_vm0, %v1621_v48 }
 0x2b6   : > { %8446 = vst [vmem:[#allocation33_spill] sm:$0xff] %v6601_v58 }
 0x2bc   : > { %4981 = vmatmul.mubr.msk.bf16.vlgmr.msra.gmra.mrb[32].mxu1 %vm1396_vm0, %v1622_v52 }
 0x2bd   : > { %4984 = vmatprep.mubr.msk.bf16.mxu1 %vm1396_vm0, %v1623_v55  ;;  %5017 = vmatpush3.bf16.msra.mxu1 %v1223_v14 }
 0x2be   : > { %5018 = vmatprep.subr.bf16.mxu1 %v1224_v11 }
 0x2c1   : > { %5019 = vmatpush3.bf16.msra.mxu1 %v1224_v11 }
 0x2c4   : > { %4985 = vmatmul.mubr.msk.bf16.gmra.mrb[36].mxu1 %vm1396_vm0, %v1624_v57 }
 0x2c5   : > { %4988 = vmatprep.mubr.msk.bf16.mxu1 %vm1396_vm0, %v1625_v59  ;;  %v2037_v59 = vmul.f32 0.17677669, %v2033_v45  ;;  %v3292_v45 = vld [vmem:[#allocation12 + $0x60] sm:$0xff] }
 0x2cc   : > { %4989 = vmatmul.mubr.msk.bf16.gmra.mrb[40].mxu1 %vm1396_vm0, %v1626_v62  ;;  %v1996_v62 = vadd.f32 %v6518_v10, %v806_v20 }
 0x2cd   : > { %4992 = vmatprep.mubr.msk.bf16.mxu1 %vm1396_vm0, %v1627_v63 }
 0x2ce   : > { %v2000_v15 = vmul.f32 0.17677669, %v1996_v62 }
 0x2d0   : > { %v2639_v22 = vpop.permute.xlu1 %2638 }
 0x2d1   : > { %v2656_v34 = vadd.f32 %v2639_v22, %v822_v28 }
 0x2d3   : > { %v2660_v42 = vmul.f32 0.17677669, %v2656_v34 }
 0x2d4   : > { %v2644_v38 = vpop.permute.xlu1 %2643  ;;  %4993 = vmatmul.mubr.msk.bf16.gmra.mrb[44].mxu1 %vm1396_vm0, %v1628_v3 }
 0x2d5   : > { %v2657_v12 = vadd.f32 %v2644_v38, %v825_v29  ;;  %v2019_v39 = vpop.permute.xlu0 %2018 }
 0x2d6   : > { %v2032_v41 = vadd.f32 %v2019_v39, %v809_v31 }
 0x2d7   : > { %v2661_v44 = vmul.f32 0.17677669, %v2657_v12 }
 0x2d8   : > { %v2036_v48 = vmul.f32 0.17677669, %v2032_v41  ;;  %v2649_v51 = vpop.permute.xlu1 %2648 }
 0x2d9   : > { %v2029_v52 = vpop.permute.xlu0 %2028  ;;  %v2664_v8 = vpack.c.bf16 %v2661_v44, %v2660_v42  ;;  %v2658_v57 = vadd.f32 %v2649_v51, %v6538_v60  ;;  %v1998_v60 = vadd.f32 %v6524_v19, %v814_v46  ;;  %v3328_v42 = vld [vmem:[#allocation13 + $0x68] sm:$0xff] }
 0x2da   : > { %v2039_v54 = vpack.c.bf16 %v2036_v48, %v2035_v47  ;;  %v2034_v55 = vadd.f32 %v2029_v52, %v817_v50 }
 0x2db   : > { %v2662_v13 = vmul.f32 0.17677669, %v2658_v57  ;;  %v2002_v22 = vmul.f32 0.17677669, %v1998_v60 }
 0x2dc   : > { %v2038_v63 = vmul.f32 0.17677669, %v2034_v55  ;;  %2041 = vxpose.xlu0.c.b16.start [1/2] (short) %v2039_v54, 128  ;;  %v2654_v9 = vpop.permute.xlu1 %2653 }
 0x2dd   : > { %v2659_v2 = vadd.f32 %v2654_v9, %v6543_v1  ;;  %v1984_v3 = vpop.permute.xlu0 %1983 }
 0x2de   : > { %v2040_v7 = vpack.c.bf16 %v2038_v63, %v2037_v59  ;;  %v1997_v11 = vadd.f32 %v1984_v3, %v809_v31  ;;  %v2695_v31 = vmul.f32 0.17677669, %v2691_v24 }
 0x2df   : > { %v2663_v14 = vmul.f32 0.17677669, %v2659_v2 }
 0x2e0   : > { %v2001_v16 = vmul.f32 0.17677669, %v1997_v11  ;;  %2042 = vxpose.xlu0.c.b16.end [2/2] (short) %v2040_v7, 128 }
 0x2e1   : > { %v2665_v17 = vpack.c.bf16 %v2663_v14, %v2662_v13  ;;  %v1994_v18 = vpop.permute.xlu0 %1993 }
 0x2e2   : > { %v2004_v10 = vpack.c.bf16 %v2001_v16, %v2000_v15  ;;  %v1999_v20 = vadd.f32 %v1994_v18, %v817_v50 }
 0x2e4   : > { %v2003_v25 = vmul.f32 0.17677669, %v1999_v20  ;;  %2273 = vxpose.xlu1.c.b16.start [1/2] (short) %v2004_v10, 128 }
 0x2e5   : > { %v2679_v1 = vpop.permute.xlu0 %2678 }
 0x2e6   : > { %v2005_v30 = vpack.c.bf16 %v2003_v25, %v2002_v22  ;;  %v2692_v32 = vadd.f32 %v2679_v1, %v825_v29 }
 0x2e8   : > { %v2696_v33 = vmul.f32 0.17677669, %v2692_v32  ;;  %2274 = vxpose.xlu1.c.b16.end [2/2] (short) %v2005_v30, 128 }
 0x2e9   : > { %v6612_v19 = vpop.permute.xlu0 %3333 }
 0x2ea   : > { %v2699_v34 = vpack.c.bf16 %v2696_v33, %v2695_v31 }
 0x2ed   : > { %v6614_v36 = vpop.permute.xlu0 %3343 }
 0x2f1   : > { %v6616_v40 = vpop.permute.xlu0 %3348 }
 0x2f9   : > { %2701 = vxpose.xlu0.c.b16.start [1/2] (short) %v2699_v34, 128 }
 0x2fd   : > { %2702 = vxpose.xlu0.c.b16.end [2/2] (short) %v2700_v6, 128 }
 0x301   : > { %2933 = vxpose.xlu1.c.b16.start [1/2] (short) %v2664_v8, 128 }
 0x305   : > { %2934 = vxpose.xlu1.c.b16.end [2/2] (short) %v2665_v17, 128 }
 0x342   : > { %v2049_v28 = vpop.trf.xlu0 }
 0x343   : > { %5020 = vmatprep.mubr.msk.bf16.mxu1 %vm1396_vm0, %v2049_v28 }
 0x346   : > { %v2050_v29 = vpop.trf.xlu0 }
 0x347   : > { %5021 = vmatmul.mubr.msk.bf16.vlgmr.msra.gmra.mrb[48].mxu1 %vm1396_vm0, %v2050_v29 }
 0x34a   : > { %v2051_v46 = vpop.trf.xlu0  ;;  %v6648_v49 = vpop.trf.xlu1 }
 0x34b   : > { %5024 = vmatprep.mubr.msk.bf16.mxu1 %vm1396_vm0, %v2051_v46 }
 0x34e   : > { %v2052_v37 = vpop.trf.xlu0  ;;  %v6659_v2 = vpop.trf.xlu1 }
 0x34f   : > { %5025 = vmatmul.mubr.msk.bf16.gmra.mrb[52].mxu1 %vm1396_vm0, %v2052_v37 }
 0x352   : > { %v2053_v4 = vpop.trf.xlu0  ;;  %v6667_v13 = vpop.trf.xlu1 }
 0x353   : > { %5028 = vmatprep.mubr.msk.bf16.mxu1 %vm1396_vm0, %v2053_v4 }
 0x356   : > { %v2054_v5 = vpop.trf.xlu0  ;;  %v6673_v15 = vpop.trf.xlu1 }
 0x357   : > { %5029 = vmatmul.mubr.msk.bf16.gmra.mrb[56].mxu1 %vm1396_vm0, %v2054_v5 }
 0x35a   : > { %v2055_v6 = vpop.trf.xlu0  ;;  %v6681_v10 = vpop.trf.xlu1 }
 0x35b   : > { %5032 = vmatprep.mubr.msk.bf16.mxu1 %vm1396_vm0, %v2055_v6 }
 0x35e   : > { %v2056_v38 = vpop.trf.xlu0  ;;  %v6691_v1 = vpop.trf.xlu1 }
 0x35f   : > { %5033 = vmatmul.mubr.msk.bf16.gmra.mrb[60].mxu1 %vm1396_vm0, %v2056_v38 }
 0x362   : > { %v6693_v30 = vpop.trf.xlu1  ;;  %v6695_v32 = vpop.trf.xlu0 }
 0x366   : > { %v6697_v31 = vpop.trf.xlu1  ;;  %v6699_v33 = vpop.trf.xlu0 }
 0x367   : > { %8448 = vst [vmem:[#allocation35_spill] sm:$0xff] %v6699_v33 }
 0x36a   : > { %v6701_v34 = vpop.trf.xlu1  ;;  %v6703_v28 = vpop.trf.xlu0 }
 0x36b   : > { %8449 = vst [vmem:[#allocation36_spill] sm:$0xff] %v6701_v34  ;;  %8450 = vst [vmem:[#allocation37_spill] sm:$0xff] %v6703_v28 }
 0x36e   : > { %v6705_v29 = vpop.trf.xlu1  ;;  %v6707_v46 = vpop.trf.xlu0 }
 0x36f   : > { %v4962_v12 = vpop.f32.mrb[16].mxu1  ;;  %8451 = vst [vmem:[#allocation38_spill] sm:$0xff] %v6705_v29  ;;  %8452 = vst [vmem:[#allocation39_spill] sm:$0xff] %v6707_v46 }
 0x370   : > { %v1455_v39 = vpop.f32.mrb[17].mxu1  ;;  %1522 = vrot.lane.b32.xlu0 %v4962_v12, %s6063_s21 }
 0x371   : > { %v4963_v50 = vpop.f32.mrb[18].mxu1 }
 0x372   : > { %v1458_v41 = vpop.f32.mrb[19].mxu1  ;;  %v6709_v37 = vpop.trf.xlu1 }
 0x373   : > { %1520 = vrot.lane.b32.xlu1 %v1458_v41, %s6063_s21  ;;  %8453 = vst [vmem:[#allocation40_spill] sm:$0xff] %v6709_v37  ;;  %v6711_v4 = vpop.trf.xlu0 }
 0x374   : > { %1518 = vrot.lane.b32.xlu0 %v1455_v39, %s6063_s21  ;;  %8454 = vst [vmem:[#allocation41_spill] sm:$0xff] %v6711_v4 }
 0x376   : > { %v6713_v5 = vpop.trf.xlu1 }
 0x377   : > { %3338 = vperm.xlu1 %5378, %v3328_v42   ;;  %v6629_v44 = vpop.f32.mrb[20].mxu1  ;;  %8455 = vst [vmem:[#allocation42_spill] sm:$0xff] %v6713_v5  ;;  %v6715_v6 = vpop.trf.xlu0  ;;  %v520_v5 = vld [vmem:[%s6476_s16 + $0x68] sm:$0xff] }
 0x378   : > { %1524 = vrot.lane.b32.xlu0 %v4963_v50, %s6063_s21  ;;  %v6632_v47 = vpop.f32.mrb[21].mxu1  ;;  %8456 = vst [vmem:[#allocation43_spill] sm:$0xff] %v6715_v6  ;;  %v6747_v58 = vadd.f32 %v6560_v27, %v520_v5 }
 0x379   : > { %v4967_v48 = vpop.f32.mrb[22].mxu1 }
 0x37a   : > { %v6634_v51 = vpop.f32.mrb[23].mxu1  ;;  %v6717_v38 = vpop.trf.xlu1 }
 0x37b   : > { %3298 = vperm.xlu1 %5378, %v3292_v45   ;;  %8457 = vst [vmem:[#allocation44_spill] sm:$0xff] %v6717_v38  ;;  %v6719_v12 = vpop.trf.xlu0  ;;  %v521_v38 = vld [vmem:[%s6476_s16 + $0x70] sm:$0xff] }
 0x37c   : > { %8458 = vst [vmem:[#allocation45_spill] sm:$0xff] %v6719_v12 }
 0x37e   : > { %v6721_v39 = vpop.trf.xlu1 }
 0x37f   : > { %1532 = vrot.lane.b32.xlu1 %v4967_v48, %s6063_s21  ;;  %v6637_v43 = vpop.f32.mrb[24].mxu1  ;;  %8459 = vst [vmem:[#allocation46_spill] sm:$0xff] %v6721_v39  ;;  %v6723_v50 = vpop.trf.xlu0 }
 0x380   : > { %v6639_v52 = vpop.f32.mrb[25].mxu1  ;;  %8460 = vst [vmem:[#allocation47_spill] sm:$0xff] %v6723_v50 }
 0x381   : > { %v4971_v8 = vpop.f32.mrb[26].mxu1 }
 0x382   : > { %v1490_v53 = vpop.f32.mrb[27].mxu1  ;;  %v6725_v41 = vpop.trf.xlu1 }
 0x383   : > { %1540 = vrot.lane.b32.xlu1 %v4971_v8, %s6063_s21  ;;  %8461 = vst [vmem:[#allocation48_spill] sm:$0xff] %v6725_v41 }
 0x386   : > { %v6727_v48 = vpop.trf.xlu1 }
 0x387   : > { %1536 = vrot.lane.b32.xlu1 %v1490_v53, %s6063_s21  ;;  %v6643_v54 = vpop.f32.mrb[28].mxu1  ;;  %8462 = vst [vmem:[#allocation49_spill] sm:$0xff] %v6727_v48  ;;  %v519_v53 = vld [vmem:[%s6476_s16 + $0x60] sm:$0xff]  ;;  %v6742_v48 = vadd.f32 %v6554_v21, %v521_v38 }
 0x388   : > { %v6645_v55 = vpop.f32.mrb[29].mxu1  ;;  %v6734_v39 = vadd.f32 %v6556_v23, %v519_v53 }
 0x389   : > { %v4975_v56 = vpop.f32.mrb[30].mxu1 }
 0x38a   : > { %v1506_v57 = vpop.f32.mrb[31].mxu1 }
 0x38b   : > { %1548 = vrot.lane.b32.xlu1 %v4975_v56, %s6063_s21 }
 0x38f   : > { %1544 = vrot.lane.b32.xlu1 %v1506_v57, %s6063_s21  ;;  %v6651_v59 = vpop.f32.mrb[32].mxu1  ;;  %v522_v57 = vld [vmem:[%s6476_s16 + $0x78] sm:$0xff] }
 0x390   : > { %v6653_v62 = vpop.f32.mrb[33].mxu1  ;;  %v6739_v41 = vadd.f32 %v6558_v26, %v522_v57  ;;  %v3353_v26 = vadd.f32 %v6614_v36, %v6742_v48 }
 0x391   : > { %v6655_v63 = vpop.f32.mrb[34].mxu1 }
 0x392   : > { %v6657_v9 = vpop.f32.mrb[35].mxu1  ;;  %v3357_v34 = vmul.f32 0.17677669, %v3353_v26 }
 0x397   : > { %v6661_v3 = vpop.f32.mrb[36].mxu1 }
 0x398   : > { %v6663_v7 = vpop.f32.mrb[37].mxu1 }
 0x399   : > { %v6665_v11 = vpop.f32.mrb[38].mxu1 }
 0x39a   : > { %v6669_v14 = vpop.f32.mrb[39].mxu1 }
 0x39f   : > { %v6671_v60 = vpop.f32.mrb[40].mxu1 }
 0x3a0   : > { %v6675_v16 = vpop.f32.mrb[41].mxu1 }
 0x3a1   : > { %v6677_v17 = vpop.f32.mrb[42].mxu1 }
 0x3a2   : > { %v6679_v18 = vpop.f32.mrb[43].mxu1 }
 0x3a7   : > { %v6683_v20 = vpop.f32.mrb[44].mxu1 }
 0x3a8   : > { %v6685_v22 = vpop.f32.mrb[45].mxu1 }
 0x3a9   : > { %v6687_v24 = vpop.f32.mrb[46].mxu1 }
 0x3aa   : > { %v6689_v25 = vpop.f32.mrb[47].mxu1 }
 0x3e2   : > { %v1523_v42 = vpop.permute.xlu0 %1522 }
 0x3e5   : > { %v1521_v56 = vpop.permute.xlu1 %1520 }
 0x3e6   : > { %v1519_v45 = vpop.permute.xlu0 %1518 }
 0x3ea   : > { %v1525_v8 = vpop.permute.xlu0 %1524 }
 0x3eb   : > { %1563 = vrot.lane.b32.xlu1 %v1525_v8, %s6064_s29  ;;  %v3351_v8 = vadd.f32 %v6612_v19, %v6734_v39 }
 0x3ed   : > { %v3355_v53 = vmul.f32 0.17677669, %v3351_v8 }
 0x3ef   : > { %1555 = vrot.lane.b32.xlu1 %v1521_v56, %s6065_s17  ;;  %v3354_v56 = vadd.f32 %v6616_v40, %v6739_v41  ;;  %v3293_v40 = vld [vmem:[#allocation12 + $0x68] sm:$0xff] }
 0x3f1   : > { %v3358_v21 = vmul.f32 0.17677669, %v3354_v56 }
 0x3f3   : > { %v3360_v27 = vpack.c.bf16 %v3358_v21, %v3357_v34 }
 0x3f6   : > { %v3339_v37 = vpop.permute.xlu1 %3338 }
 0x3f7   : > { %v3352_v23 = vadd.f32 %v3339_v37, %v6747_v58 }
 0x3f9   : > { %v3356_v57 = vmul.f32 0.17677669, %v3352_v23 }
 0x3fa   : > { %v6754_v29 = vpop.permute.xlu1 %3298 }
 0x3fb   : > { %v3359_v38 = vpack.c.bf16 %v3356_v57, %v3355_v53 }
 0x3fd   : > { %3361 = vxpose.xlu0.c.b16.start [1/2] (short) %v3359_v38, 128 }
 0x3fe   : > { %v1533_v19 = vpop.permute.xlu1 %1532 }
 0x3ff   : > { %1579 = vrot.lane.b32.xlu1 %v1533_v19, %s6066_s27 }
 0x401   : > { %3362 = vxpose.xlu0.c.b16.end [2/2] (short) %v3360_v27, 128 }
 0x422   : > { %3303 = vperm.xlu0 %5377, %v3293_v40  }
 0x426   : > { %1530 = vrot.lane.b32.xlu0 %v6629_v44, %s6063_s21  ;;  %v6775_v44 = vpop.f32.mrb[48].mxu1 }
 0x42a   : > { %1526 = vrot.lane.b32.xlu0 %v6632_v47, %s6063_s21  ;;  %v6777_v47 = vpop.f32.mrb[49].mxu1 }
 0x42e   : > { %1528 = vrot.lane.b32.xlu0 %v6634_v51, %s6063_s21  ;;  %v6779_v51 = vpop.f32.mrb[50].mxu1 }
 0x432   : > { %1538 = vrot.lane.b32.xlu0 %v6637_v43, %s6063_s21  ;;  %v6781_v43 = vpop.f32.mrb[51].mxu1 }
 0x436   : > { %1534 = vrot.lane.b32.xlu0 %v6639_v52, %s6063_s21 }
 0x43a   : > { %1546 = vrot.lane.b32.xlu0 %v6643_v54, %s6063_s21  ;;  %v6785_v54 = vpop.f32.mrb[52].mxu1 }
 0x43e   : > { %1542 = vrot.lane.b32.xlu0 %v6645_v55, %s6063_s21  ;;  %v6787_v55 = vpop.f32.mrb[53].mxu1 }
 0x43f   : > { %v6789_v34 = vpop.f32.mrb[54].mxu1 }
 0x440   : > { %v6791_v37 = vpop.f32.mrb[55].mxu1 }
 0x441   : > { %v6803_v23 = vpop.f32.mrb[56].mxu1 }
 0x442   : > { %1559 = vrot.lane.b32.xlu0 %v1523_v42, %s6067_s3  ;;  %v6805_v53 = vpop.f32.mrb[57].mxu1 }
 0x443   : > { %v6809_v57 = vpop.f32.mrb[58].mxu1 }
 0x444   : > { %v6811_v21 = vpop.f32.mrb[59].mxu1 }
 0x445   : > { %v6815_v19 = vpop.f32.mrb[60].mxu1 }
 0x446   : > { %1551 = vrot.lane.b32.xlu0 %v1519_v45, %s6068_s13  ;;  %v6817_v27 = vpop.f32.mrb[61].mxu1 }
 0x447   : > { %v6819_v40 = vpop.f32.mrb[62].mxu1 }
 0x463   : > { %v6773_v36 = vpop.trf.xlu0 }
 0x464   : > { %8463 = vst [vmem:[#allocation50_spill] sm:$0xff] %v6773_v36 }
 0x467   : > { %v6783_v52 = vpop.trf.xlu0 }
 0x468   : > { %8464 = vst [vmem:[#allocation51_spill] sm:$0xff] %v6783_v52 }
 0x46b   : > { %v6793_v5 = vpop.trf.xlu0 }
 0x46c   : > { %8465 = vst [vmem:[#allocation52_spill] sm:$0xff] %v6793_v5 }
 0x46f   : > { %v6795_v42 = vpop.trf.xlu0 }
 0x470   : > { %8466 = vst [vmem:[#allocation53_spill] sm:$0xff] %v6795_v42 }
 0x473   : > { %v6797_v45 = vpop.trf.xlu0 }
 0x474   : > { %8467 = vst [vmem:[#allocation54_spill] sm:$0xff] %v6797_v45 }
 0x477   : > { %v6799_v8 = vpop.trf.xlu0 }
 0x478   : > { %8468 = vst [vmem:[#allocation55_spill] sm:$0xff] %v6799_v8 }
 0x47b   : > { %v6801_v56 = vpop.trf.xlu0 }
 0x47c   : > { %8469 = vst [vmem:[#allocation56_spill] sm:$0xff] %v6801_v56  ;;  %v6821_v56 = vpop.f32.mrb[63].mxu1 }
 0x47f   : > { %v6807_v26 = vpop.trf.xlu0 }
 0x480   : > { %8470 = vst [vmem:[#allocation57_spill] sm:$0xff] %v6807_v26  ;;  %v1541_v26 = vpop.permute.xlu1 %1540 }
 0x484   : > { %v1537_v5 = vpop.permute.xlu1 %1536 }
 0x4a1   : > { %v6813_v38 = vpop.permute.xlu0 %3303 }
 0x4a5   : > { %v1531_v8 = vpop.permute.xlu0 %1530 }
 0x4a6   : > { %1575 = vrot.lane.b32.xlu0 %v1531_v8, %s6069_s19 }
 0x4a9   : > { %v1527_v45 = vpop.permute.xlu0 %1526 }
 0x4aa   : > { %1567 = vrot.lane.b32.xlu0 %v1527_v45, %s6070_s22  ;;  %v1549_v45 = vpop.permute.xlu1 %1548 }
 0x4ad   : > { %v1529_v42 = vpop.permute.xlu0 %1528 }
 0x4ae   : > { %1571 = vrot.lane.b32.xlu1 %v1529_v42, %s6071_s20  ;;  %v1545_v42 = vpop.permute.xlu1 %1544 }
 0x4b1   : > { %v1539_v52 = vpop.permute.xlu0 %1538 }
 0x4b2   : > { %1591 = vrot.lane.b32.xlu0 %v1539_v52, %s6072_s23  ;;  %1595 = vrot.lane.b32.xlu1 %v1541_v26, %s6073_s14 }
 0x4b5   : > { %v1535_v36 = vpop.permute.xlu0 %1534 }
 0x4b6   : > { %1583 = vrot.lane.b32.xlu0 %v1535_v36, %s6074_s25  ;;  %1587 = vrot.lane.b32.xlu1 %v1537_v5, %s6075_s26  ;;  %v1229_v36 = vlaneseq  ;;  %v1564_v5 = vpop.permute.xlu1 %1563 }
 0x4b8   : > { %v6834_v50 = vshrl.u32 %v1229_v36, 7 }
 0x4b9   : > { %v1547_v8 = vpop.permute.xlu0 %1546 }
 0x4ba   : > { %1607 = vrot.lane.b32.xlu0 %v1547_v8, %s6076_s4  ;;  %1611 = vrot.lane.b32.xlu1 %v1549_v45, %s6077_s1  ;;  %8471 = vst [vmem:[#allocation58_spill] sm:$0xff] %v6834_v50  ;;  %v6837_v12 = vadd.s32 16, %v6834_v50  ;;  %v6839_v8 = vand.u32 127, %v1229_v36  ;;  %v6845_v4 = vadd.s32 8, %v6834_v50 }
 0x4bc   : > { %8472 = vst [vmem:[#allocation59_spill] sm:$0xff] %v6837_v12  ;;  %8473 = vst [vmem:[#allocation60_spill] sm:$0xff] %v6839_v8  ;;  %vm1250_vm1 = vcmp.gt.s32.totalorder %v6839_v8, %v6837_v12  ;;  %vm1248_vm2 = vcmp.gt.s32.totalorder %v6839_v8, %v6834_v50  ;;  %vm1249_vm3 = vcmp.gt.s32.totalorder %v6839_v8, %v6845_v4 }
 0x4bd   : > { %v1543_v52 = vpop.permute.xlu0 %1542  ;;  %8474 = vst [vmem:[#allocation61_spill] sm:$0xff] %v6845_v4 }
 0x4be   : > { %1599 = vrot.lane.b32.xlu0 %v1543_v52, %s6078_s30  ;;  %1603 = vrot.lane.b32.xlu1 %v1545_v42, %s6079_s9  ;;  %v1556_v52 = vpop.permute.xlu1 %1555 }
 0x4bf   : > { %v1691_v36 = vadd.f32 %v6657_v9, %v1556_v52 }
 0x4c1   : > { %v1560_v26 = vpop.permute.xlu0 %1559  ;;  %v6872_v9 = vsel %vm1249_vm3, -1e+30, %v1691_v36 }
 0x4c2   : > { %v1696_v45 = vadd.f32 %v6651_v59, %v1560_v26  ;;  %v6858_v59 = vadd.s32 24, %v6834_v50  ;;  %v1580_v26 = vpop.permute.xlu1 %1579 }
 0x4c4   : > { %v6851_v46 = vsel %vm1250_vm1, -1e+30, %v1696_v45  ;;  %8475 = vst [vmem:[#allocation62_spill] sm:$0xff] %v6858_v59  ;;  %vm1251_vm4 = vcmp.gt.s32.totalorder %v6839_v8, %v6858_v59  ;;  %v6877_v45 = vadd.s32 56, %v6834_v50 }
 0x4c5   : > { %v1552_v6 = vpop.permute.xlu0 %1551 }
 0x4c6   : > { %v1688_v42 = vadd.f32 %v6653_v62, %v1552_v6  ;;  %v1699_v62 = vadd.f32 %v6655_v63, %v1564_v5  ;;  %8476 = vst [vmem:[#allocation63_spill] sm:$0xff] %v6877_v45  ;;  %v1715_v63 = vadd.f32 %v6665_v11, %v1580_v26  ;;  %vm1255_vm5 = vcmp.gt.s32.totalorder %v6839_v8, %v6877_v45 }
 0x4c7   : > { %v6896_v11 = vadd.s32 48, %v6834_v50 }
 0x4c8   : > { %v6866_v6 = vsel %vm1248_vm2, -1e+30, %v1688_v42  ;;  %v6884_v5 = vsel %vm1251_vm4, -1e+30, %v1699_v62  ;;  %v6892_v52 = vsel %vm1255_vm5, -1e+30, %v1715_v63 }
 0x4c9   : > { %v3294_v42 = vld [vmem:[#allocation12 + $0x70] sm:$0xff]  ;;  %8477 = vst [vmem:[#allocation64_spill] sm:$0xff] %v6896_v11  ;;  %vm1254_vm6 = vcmp.gt.s32.totalorder %v6839_v8, %v6896_v11  ;;  %v6901_v62 = vadd.s32 32, %v6834_v50  ;;  %v6928_v11 = vadd.s32 88, %v6834_v50 }
 0x4cb   : > { %8478 = vst [vmem:[#allocation65_spill] sm:$0xff] %v6901_v62  ;;  %vm1252_vm7 = vcmp.gt.s32.totalorder %v6839_v8, %v6901_v62  ;;  %8481 = vst [vmem:[#allocation68_spill] sm:$0xff] %v6928_v11  ;;  %vm1259_vm10 = vcmp.gt.s32.totalorder %v6839_v8, %v6928_v11  ;;  %v6942_v62 = vadd.s32 64, %v6834_v50 }
 0x4cd   : > { %8482 = vst [vmem:[#allocation69_spill] sm:$0xff] %v6942_v62  ;;  %vm1256_vm11 = vcmp.gt.s32.totalorder %v6839_v8, %v6942_v62 }
 0x4dd   : > { %1770 = vmax.xlane.f32.xlu0 %v6851_v46 }
 0x4e1   : > { %1766 = vmax.xlane.f32.xlu0 %v6866_v6 }
 0x4e2   : > { %1768 = vmax.xlane.f32.xlu1 %v6872_v9 }
 0x4e5   : > { %1772 = vmax.xlane.f32.xlu0 %v6884_v5 }
 0x4e9   : > { %1780 = vmax.xlane.f32.xlu0 %v6892_v52 }
 0x4f3   : > { %3308 = vperm.xlu1 %5378, %v3294_v42   ;;  %v6913_v42 = vadd.s32 40, %v6834_v50 }
 0x4f5   : > { %8479 = vst [vmem:[#allocation66_spill] sm:$0xff] %v6913_v42  ;;  %vm1253_vm8 = vcmp.gt.s32.totalorder %v6839_v8, %v6913_v42 }
 0x518   : > { %v1576_v36 = vpop.permute.xlu0 %1575 }
 0x519   : > { %v1712_v26 = vadd.f32 %v6661_v3, %v1576_v36 }
 0x51b   : > { %v6907_v63 = vsel %vm1254_vm6, -1e+30, %v1712_v26  ;;  %v6925_v26 = vadd.s32 80, %v6834_v50 }
 0x51c   : > { %v1568_v45 = vpop.permute.xlu0 %1567  ;;  %1778 = vmax.xlane.f32.xlu1 %v6907_v63 }
 0x51d   : > { %v1704_v4 = vadd.f32 %v6663_v7, %v1568_v45  ;;  %8480 = vst [vmem:[#allocation67_spill] sm:$0xff] %v6925_v26  ;;  %vm1258_vm9 = vcmp.gt.s32.totalorder %v6839_v8, %v6925_v26 }
 0x51f   : > { %v6919_v3 = vsel %vm1252_vm7, -1e+30, %v1704_v4 }
 0x520   : > { %1774 = vmax.xlane.f32.xlu1 %v6919_v3  ;;  %v1572_v36 = vpop.permute.xlu1 %1571 }
 0x521   : > { %v1707_v59 = vadd.f32 %v6669_v14, %v1572_v36  ;;  %v6945_v14 = vadd.s32 72, %v6834_v50 }
 0x523   : > { %v6934_v7 = vsel %vm1253_vm8, -1e+30, %v1707_v59  ;;  %8483 = vst [vmem:[#allocation70_spill] sm:$0xff] %v6945_v14  ;;  %vm8367_vm12 = vcmp.gt.s32.totalorder %v6839_v8, %v6945_v14 }
 0x524   : > { %v1592_v4 = vpop.permute.xlu0 %1591  ;;  %1776 = vmax.xlane.f32.xlu0 %v6934_v7  ;;  %v1596_v45 = vpop.permute.xlu1 %1595 }
 0x525   : > { %v1728_v36 = vadd.f32 %v6671_v60, %v1592_v4  ;;  %v1731_v59 = vadd.f32 %v6677_v17, %v1596_v45  ;;  %v6966_v60 = vadd.s32 112, %v6834_v50  ;;  %v6969_v17 = vadd.s32 120, %v6834_v50 }
 0x527   : > { %v6952_v42 = vsel %vm1258_vm9, -1e+30, %v1728_v36  ;;  %v6957_v12 = vsel %vm1259_vm10, -1e+30, %v1731_v59  ;;  %8484 = vst [vmem:[#allocation71_spill] sm:$0xff] %v6966_v60  ;;  %8485 = vst [vmem:[#allocation72_spill] sm:$0xff] %v6969_v17  ;;  %vm1262_vm13 = vcmp.gt.s32.totalorder %v6839_v8, %v6966_v60  ;;  %vm1263_vm14 = vcmp.gt.s32.totalorder %v6839_v8, %v6969_v17 }
 0x528   : > { %v1584_v0 = vpop.permute.xlu0 %1583  ;;  %1786 = vmax.xlane.f32.xlu1 %v6952_v42  ;;  %1788 = vmax.xlane.f32.xlu0 %v6957_v12  ;;  %v1588_v28 = vpop.permute.xlu1 %1587 }
 0x529   : > { %v1720_v4 = vadd.f32 %v6675_v16, %v1584_v0  ;;  %v1723_v45 = vadd.f32 %v6679_v18, %v1588_v28  ;;  %v6990_v0 = vadd.s32 96, %v6834_v50  ;;  %v6993_v16 = vadd.s32 104, %v6834_v50 }
 0x52b   : > { %v6976_v36 = vsel %vm1256_vm11, -1e+30, %v1720_v4  ;;  %v6981_v59 = vsel %vm8367_vm12, -1e+30, %v1723_v45  ;;  %8486 = vst [vmem:[#allocation73_spill] sm:$0xff] %v6990_v0  ;;  %8487 = vst [vmem:[#allocation74_spill] sm:$0xff] %v6993_v16  ;;  %vm1260_vm15 = vcmp.gt.s32.totalorder %v6839_v8, %v6990_v0  ;;  %vm1261_vm12 = vcmp.gt.s32.totalorder %v6839_v8, %v6993_v16 }
 0x52c   : > { %v1608_v11 = vpop.permute.xlu0 %1607  ;;  %1782 = vmax.xlane.f32.xlu1 %v6976_v36  ;;  %1784 = vmax.xlane.f32.xlu0 %v6981_v59  ;;  %v1612_v26 = vpop.permute.xlu1 %1611 }
 0x52d   : > { %v1744_v18 = vadd.f32 %v6683_v20, %v1608_v11  ;;  %v1747_v28 = vadd.f32 %v6687_v24, %v1612_v26 }
 0x52f   : > { %v7000_v4 = vsel %vm1262_vm13, -1e+30, %v1744_v18  ;;  %v7005_v45 = vsel %vm1263_vm14, -1e+30, %v1747_v28  ;;  %v3295_v18 = vld [vmem:[#allocation12 + $0x78] sm:$0xff] }
 0x530   : > { %v1600_v14 = vpop.permute.xlu0 %1599  ;;  %1794 = vmax.xlane.f32.xlu1 %v7000_v4  ;;  %1796 = vmax.xlane.f32.xlu0 %v7005_v45  ;;  %v1604_v62 = vpop.permute.xlu1 %1603 }
 0x531   : > { %v1736_v20 = vadd.f32 %v6685_v22, %v1600_v14  ;;  %v1739_v24 = vadd.f32 %v6689_v25, %v1604_v62 }
 0x533   : > { %v7018_v11 = vsel %vm1260_vm15, -1e+30, %v1736_v20  ;;  %v7023_v26 = vsel %vm1261_vm12, -1e+30, %v1739_v24 }
 0x534   : > { %1790 = vmax.xlane.f32.xlu1 %v7018_v11  ;;  %1792 = vmax.xlane.f32.xlu0 %v7023_v26 }
 0x545   : > { %3313 = vperm.xlu1 %5378, %v3295_v18  }
 0x56a   : > { %v1771_v28 = vpop.xlane.xlu0 %1770 }
 0x56b   : > { %v1800_v22 = vsub.f32 %v6851_v46, %v1771_v28 }
 0x56d   : > { %v1818_v25 = vmul.f32 1.442695, %v1800_v22 }
 0x56e   : > { %v1767_v62 = vpop.xlane.xlu0 %1766 }
 0x56f   : > { %5427 = vpow2.f32 %v1818_v25  ;;  %v1798_v14 = vsub.f32 %v6866_v6, %v1767_v62  ;;  %v1769_v20 = vpop.xlane.xlu1 %1768 }
 0x570   : > { %v1799_v24 = vsub.f32 %v6872_v9, %v1769_v20 }
 0x571   : > { %v1814_v0 = vmul.f32 1.442695, %v1798_v14 }
 0x572   : > { %v1773_v17 = vpop.xlane.xlu0 %1772  ;;  %v1816_v8 = vmul.f32 1.442695, %v1799_v24 }
 0x573   : > { %5429 = vpow2.f32 %v1814_v0  ;;  %v1801_v16 = vsub.f32 %v6884_v5, %v1773_v17 }
 0x575   : > { %v1820_v60 = vmul.f32 1.442695, %v1801_v16 }
 0x576   : > { %v1781_v50 = vpop.xlane.xlu0 %1780 }
 0x577   : > { %5431 = vpow2.f32 %v1820_v60  ;;  %v1805_v18 = vsub.f32 %v6892_v52, %v1781_v50  ;;  %v7047_v52 = vpop.permute.xlu1 %3308 }
 0x578   : > { %5433 = vpow2.f32 %v1816_v8 }
 0x579   : > { %v7032_v46 = vpop.eup %5427  ;;  %v1828_v6 = vmul.f32 1.442695, %v1805_v18 }
 0x57a   : > { %1850 = vadd.xlane.f32.xlu1 %v7032_v46 }
 0x57b   : > { %5435 = vpow2.f32 %v1828_v6 }
 0x57d   : > { %v7035_v28 = vpop.eup %5429 }
 0x57e   : > { %1846 = vadd.xlane.f32.xlu1 %v7035_v28 }
 0x581   : > { %v7038_v9 = vpop.eup %5431 }
 0x582   : > { %1852 = vadd.xlane.f32.xlu0 %v7038_v9  ;;  %v7041_v5 = vpop.eup %5433 }
 0x585   : > { %v7044_v50 = vpop.eup %5435 }
 0x586   : > { %1848 = vadd.xlane.f32.xlu0 %v7041_v5 }
 0x58a   : > { %1860 = vadd.xlane.f32.xlu0 %v7044_v50 }
 0x5a9   : > { %v1779_v8 = vpop.xlane.xlu1 %1778 }
 0x5aa   : > { %v1804_v60 = vsub.f32 %v6907_v63, %v1779_v8 }
 0x5ac   : > { %v1826_v17 = vmul.f32 1.442695, %v1804_v60 }
 0x5ad   : > { %v1775_v0 = vpop.xlane.xlu1 %1774 }
 0x5ae   : > { %5437 = vpow2.f32 %v1826_v17  ;;  %v1802_v16 = vsub.f32 %v6919_v3, %v1775_v0 }
 0x5b0   : > { %v1822_v22 = vmul.f32 1.442695, %v1802_v16 }
 0x5b1   : > { %v1777_v25 = vpop.xlane.xlu0 %1776 }
 0x5b2   : > { %5439 = vpow2.f32 %v1822_v22  ;;  %v1803_v62 = vsub.f32 %v6934_v7, %v1777_v25 }
 0x5b4   : > { %v1824_v14 = vmul.f32 1.442695, %v1803_v62 }
 0x5b5   : > { %v1789_v20 = vpop.xlane.xlu0 %1788  ;;  %v1787_v24 = vpop.xlane.xlu1 %1786 }
 0x5b6   : > { %5441 = vpow2.f32 %v1824_v14  ;;  %v1809_v18 = vsub.f32 %v6957_v12, %v1789_v20  ;;  %v1808_v6 = vsub.f32 %v6952_v42, %v1787_v24 }
 0x5b8   : > { %v7054_v33 = vpop.eup %5437  ;;  %v1836_v63 = vmul.f32 1.442695, %v1809_v18  ;;  %v1834_v8 = vmul.f32 1.442695, %v1808_v6 }
 0x5b9   : > { %v1785_v60 = vpop.xlane.xlu0 %1784  ;;  %1858 = vadd.xlane.f32.xlu1 %v7054_v33  ;;  %v1783_v3 = vpop.xlane.xlu1 %1782 }
 0x5ba   : > { %5443 = vpow2.f32 %v1836_v63  ;;  %v1807_v17 = vsub.f32 %v6981_v59, %v1785_v60  ;;  %v1806_v7 = vsub.f32 %v6976_v36, %v1783_v3  ;;  %v5405_v63 = vld [vmem:[#allocation9 + $0x50] sm:$0xff]   ;;  %v5407_v60 = vld [vmem:[#allocation9 + $0x60] sm:$0xff]   ;;  %v5408_v3 = vld [vmem:[#allocation9 + $0x68] sm:$0xff]  }
 0x5bb   : > { %5445 = vpow2.f32 %v1834_v8  ;;  %v5406_v8 = vld [vmem:[#allocation9 + $0x58] sm:$0xff]   ;;  %4896 = vmatprep.mubr.bf16.mxu0 %v5405_v63 }
 0x5bc   : > { %v7059_v0 = vpop.eup %5439  ;;  %v1832_v16 = vmul.f32 1.442695, %v1807_v17  ;;  %v1830_v12 = vmul.f32 1.442695, %v1806_v7  ;;  %4897 = vmatmul.mubr.bf16.gmra.mrb[20].mxu0 %v5406_v8  ;;  %v5409_v17 = vld [vmem:[#allocation9 + $0x70] sm:$0xff]   ;;  %v5411_v7 = vld [vmem:[#allocation9 + $0x80] sm:$0xff]  }
 0x5bd   : > { %1854 = vadd.xlane.f32.xlu1 %v7059_v0  ;;  %v1795_v42 = vpop.xlane.xlu1 %1794  ;;  %4900 = vmatprep.mubr.bf16.mxu0 %v5407_v60 }
 0x5be   : > { %5447 = vpow2.f32 %v1832_v16  ;;  %v1812_v22 = vsub.f32 %v7000_v4, %v1795_v42  ;;  %v3316_v16 = vadd.f32 %v6754_v29, %v6734_v39  ;;  %v7112_v39 = vpop.xlane.xlu0 %1796 }
 0x5bf   : > { %5449 = vpow2.f32 %v1830_v12 }
 0x5c0   : > { %v7063_v25 = vpop.eup %5441  ;;  %v1842_v62 = vmul.f32 1.442695, %v1812_v22  ;;  %v3320_v42 = vmul.f32 0.17677669, %v3316_v16 }
 0x5c1   : > { %1856 = vadd.xlane.f32.xlu0 %v7063_v25  ;;  %v1791_v59 = vpop.xlane.xlu1 %1790 }
 0x5c2   : > { %v1810_v36 = vsub.f32 %v7018_v11, %v1791_v59  ;;  %5451 = vpow2.f32 %v1842_v62 }
 0x5c4   : > { %v7067_v14 = vpop.eup %5443  ;;  %v1838_v20 = vmul.f32 1.442695, %v1810_v36  ;;  %4901 = vmatmul.mubr.bf16.gmra.mrb[24].mxu0 %v5408_v3 }
 0x5c5   : > { %v7069_v24 = vpop.eup %5445  ;;  %1868 = vadd.xlane.f32.xlu0 %v7067_v14  ;;  %4904 = vmatprep.mubr.bf16.mxu0 %v5409_v17 }
 0x5c6   : > { %1866 = vadd.xlane.f32.xlu1 %v7069_v24  ;;  %5453 = vpow2.f32 %v1838_v20 }
 0x5c8   : > { %v7073_v4 = vpop.eup %5447 }
 0x5c9   : > { %v7075_v18 = vpop.eup %5449  ;;  %1864 = vadd.xlane.f32.xlu0 %v7073_v4 }
 0x5ca   : > { %1862 = vadd.xlane.f32.xlu1 %v7075_v18 }
 0x5cc   : > { %v7079_v11 = vpop.eup %5451 }
 0x5ce   : > { %1874 = vadd.xlane.f32.xlu1 %v7079_v11 }
 0x5d0   : > { %v7082_v6 = vpop.eup %5453 }
 0x5d2   : > { %1870 = vadd.xlane.f32.xlu1 %v7082_v6 }
 0x5df   : > { %2178 = vrot.lane.b32.xlu0 %v6777_v47, %s6063_s21  ;;  %v5410_v47 = vld [vmem:[#allocation9 + $0x78] sm:$0xff]  }
 0x5e0   : > { %4905 = vmatmul.mubr.bf16.gmra.mrb[28].mxu0 %v5410_v47 }
 0x5e1   : > { %4908 = vmatprep.mubr.bf16.mxu0 %v5411_v7 }
 0x5e3   : > { %2180 = vrot.lane.b32.xlu0 %v6781_v43, %s6063_s21  ;;  %v3317_v43 = vadd.f32 %v6813_v38, %v6747_v58 }
 0x5e7   : > { %2182 = vrot.lane.b32.xlu0 %v6775_v44, %s6063_s21  ;;  %v3314_v44 = vpop.permute.xlu1 %3313 }
 0x5e8   : > { %v3319_v12 = vadd.f32 %v3314_v44, %v6739_v41 }
 0x5ea   : > { %v3323_v38 = vmul.f32 0.17677669, %v3319_v12 }
 0x5eb   : > { %2184 = vrot.lane.b32.xlu0 %v6779_v51, %s6063_s21  ;;  %v5412_v51 = vld [vmem:[#allocation9 + $0x88] sm:$0xff]  }
 0x5ec   : > { %4909 = vmatmul.mubr.bf16.gmra.mrb[32].mxu0 %v5412_v51 }
 0x5ef   : > { %2186 = vrot.lane.b32.xlu0 %v6787_v55, %s6063_s21  ;;  %v3321_v55 = vmul.f32 0.17677669, %v3317_v43 }
 0x5f1   : > { %v3324_v58 = vpack.c.bf16 %v3321_v55, %v3320_v42 }
 0x5f3   : > { %2188 = vrot.lane.b32.xlu0 %v6791_v37, %s6063_s21  ;;  %v3318_v37 = vadd.f32 %v7047_v52, %v6742_v48  ;;  %v7116_v48 = vpop.xlane.xlu0 %1792 }
 0x5f5   : > { %v3322_v22 = vmul.f32 0.17677669, %v3318_v37 }
 0x5f7   : > { %2190 = vrot.lane.b32.xlu0 %v6785_v54, %s6063_s21  ;;  %v3325_v29 = vpack.c.bf16 %v3323_v38, %v3322_v22 }
 0x5fb   : > { %2194 = vrot.lane.b32.xlu0 %v6805_v53, %s6063_s21 }
 0x5ff   : > { %3593 = vxpose.xlu1.c.b16.start [1/2] (short) %v3324_v58, 128  ;;  %2196 = vrot.lane.b32.xlu0 %v6811_v21, %s6063_s21 }
 0x603   : > { %3594 = vxpose.xlu1.c.b16.end [2/2] (short) %v3325_v29, 128  ;;  %2198 = vrot.lane.b32.xlu0 %v6803_v23, %s6063_s21 }
 0x607   : > { %2200 = vrot.lane.b32.xlu0 %v6809_v57, %s6063_s21  ;;  %v1851_v41 = vpop.xlane.xlu1 %1850 }
 0x60b   : > { %2202 = vrot.lane.b32.xlu0 %v6817_v27, %s6063_s21  ;;  %v1847_v54 = vpop.xlane.xlu1 %1846 }
 0x60c   : > { %5455 = vrcp.f32 %v1847_v54 }
 0x60f   : > { %v1853_v53 = vpop.xlane.xlu0 %1852  ;;  %2204 = vrot.lane.b32.xlu0 %v6821_v56, %s6063_s21 }
 0x610   : > { %5457 = vrcp.f32 %v1853_v53 }
 0x611   : > { %5459 = vrcp.f32 %v1851_v41 }
 0x613   : > { %2206 = vrot.lane.b32.xlu0 %v6815_v19, %s6063_s21  ;;  %v1849_v23 = vpop.xlane.xlu0 %1848 }
 0x614   : > { %5461 = vrcp.f32 %v1849_v23 }
 0x616   : > { %v5456_v57 = vpop.eup %5455 }
 0x617   : > { %v1894_v27 = vmul.f32 %v5456_v57, %v7035_v28  ;;  %v1861_v8 = vpop.xlane.xlu0 %1860 }
 0x61a   : > { %v5458_v21 = vpop.eup %5457 }
 0x61b   : > { %v5460_v52 = vpop.eup %5459  ;;  %v1897_v56 = vmul.f32 %v5458_v21, %v7038_v9 }
 0x61c   : > { %v1896_v20 = vmul.f32 %v5460_v52, %v7032_v46 }
 0x61e   : > { %v5462_v62 = vpop.eup %5461  ;;  %v1911_v19 = vpack.c.bf16 %v1897_v56, %v1896_v20 }
 0x61f   : > { %2192 = vrot.lane.b32.xlu1 %v6789_v34, %s6063_s21  ;;  %v1895_v59 = vmul.f32 %v5462_v62, %v7041_v5 }
 0x621   : > { %v1910_v36 = vpack.c.bf16 %v1895_v59, %v1894_v27 }
 0x623   : > { %2208 = vrot.lane.b32.xlu1 %v6819_v40, %s6063_s21  ;;  %4996 = vmatprep.subr.bf16.mxu0 %v1910_v36 }
 0x624   : > { %4997 = vmatpush3.bf16.xpose.msra.mxu0 %v1910_v36 }
 0x625   : > { %4998 = vmatprep.subr.bf16.mxu0 %v1911_v19 }
 0x62c   : > { %4999 = vmatpush3.bf16.xpose.msra.mxu0 %v1911_v19 }
 0x646   : > { %v1859_v63 = vpop.xlane.xlu1 %1858 }
 0x647   : > { %5463 = vrcp.f32 %v1859_v63 }
 0x64a   : > { %v1855_v34 = vpop.xlane.xlu1 %1854 }
 0x64b   : > { %5465 = vrcp.f32 %v1855_v34 }
 0x64c   : > { %5467 = vrcp.f32 %v1861_v8 }
 0x64e   : > { %v1857_v28 = vpop.xlane.xlu0 %1856 }
 0x64f   : > { %5469 = vrcp.f32 %v1857_v28 }
 0x651   : > { %v5464_v60 = vpop.eup %5463 }
 0x652   : > { %v1869_v9 = vpop.xlane.xlu0 %1868  ;;  %v1900_v16 = vmul.f32 %v5464_v60, %v7054_v33  ;;  %v1811_v60 = vsub.f32 %v7023_v26, %v7116_v48 }
 0x653   : > { %v1867_v5 = vpop.xlane.xlu1 %1866 }
 0x655   : > { %v5466_v3 = vpop.eup %5465 }
 0x656   : > { %v1865_v46 = vpop.xlane.xlu0 %1864  ;;  %v5468_v17 = vpop.eup %5467  ;;  %v1898_v44 = vmul.f32 %v5466_v3, %v7059_v0 }
 0x657   : > { %5471 = vrcp.f32 %v1865_v46  ;;  %v1863_v40 = vpop.xlane.xlu1 %1862  ;;  %v1901_v12 = vmul.f32 %v5468_v17, %v7044_v50  ;;  %v1840_v46 = vmul.f32 1.442695, %v1811_v60 }
 0x658   : > { %5473 = vrcp.f32 %v1863_v40 }
 0x659   : > { %v5470_v47 = vpop.eup %5469  ;;  %5475 = vrcp.f32 %v1869_v9  ;;  %v1913_v37 = vpack.c.bf16 %v1901_v12, %v1900_v16  ;;  %v1813_v9 = vsub.f32 %v7005_v45, %v7112_v39 }
 0x65a   : > { %v2179_v43 = vpop.permute.xlu0 %2178  ;;  %v1899_v7 = vmul.f32 %v5470_v47, %v7063_v25  ;;  %5477 = vrcp.f32 %v1867_v5  ;;  %v529_v47 = vld [vmem:[%s6476_s16 + $0xb0] sm:$0xff] }
 0x65b   : > { %v7135_v51 = vpop.xlane.xlu1 %1874  ;;  %2211 = vrot.lane.b32.xlu0 %v2179_v43, %s6068_s13  ;;  %v1844_v5 = vmul.f32 1.442695, %v1813_v9  ;;  %v527_v43 = vld [vmem:[%s6476_s16 + $0xa0] sm:$0xff] }
 0x65c   : > { %v1912_v55 = vpack.c.bf16 %v1899_v7, %v1898_v44  ;;  %v530_v44 = vld [vmem:[%s6476_s16 + $0xb8] sm:$0xff] }
 0x65d   : > { %5479 = vpow2.f32 %v1844_v5 }
 0x65e   : > { %v2181_v42 = vpop.permute.xlu0 %2180  ;;  %5000 = vmatprep.subr.bf16.mxu0 %v1912_v55  ;;  %5481 = vpow2.f32 %v1840_v46  ;;  %v537_v46 = vld [vmem:[%s6476_s16 + $0xf0] sm:$0xff] }
 0x65f   : > { %2215 = vrot.lane.b32.xlu1 %v2181_v42, %s6065_s17  ;;  %5001 = vmatpush3.bf16.xpose.msra.mxu0 %v1912_v55  ;;  %v7140_v25 = vpop.xlane.xlu1 %1870  ;;  %v528_v42 = vld [vmem:[%s6476_s16 + $0xa8] sm:$0xff] }
 0x660   : > { %5002 = vmatprep.subr.bf16.mxu0 %v1913_v37  ;;  %5483 = vrcp.f32 %v7140_v25 }
 0x661   : > { %v5472_v0 = vpop.eup %5471 }
 0x662   : > { %v5474_v33 = vpop.eup %5473  ;;  %v2183_v58 = vpop.permute.xlu0 %2182  ;;  %v1903_v38 = vmul.f32 %v5472_v0, %v7073_v4 }
 0x663   : > { %2219 = vrot.lane.b32.xlu0 %v2183_v58, %s6067_s3  ;;  %v1902_v22 = vmul.f32 %v5474_v33, %v7075_v18  ;;  %v5476_v29 = vpop.eup %5475  ;;  %v5413_v33 = vld [vmem:[#allocation9 + $0x90] sm:$0xff]  }
 0x664   : > { %v5478_v53 = vpop.eup %5477  ;;  %v1905_v4 = vmul.f32 %v5476_v29, %v7067_v14  ;;  %v531_v29 = vld [vmem:[%s6476_s16 + $0xc0] sm:$0xff]  ;;  %4912 = vmatprep.mubr.bf16.mxu0 %v5413_v33 }
 0x665   : > { %v7145_v50 = vpop.trf.xlu1  ;;  %v1914_v54 = vpack.c.bf16 %v1903_v38, %v1902_v22  ;;  %v1904_v21 = vmul.f32 %v5478_v53, %v7069_v24  ;;  %v5414_v38 = vld [vmem:[#allocation9 + $0x98] sm:$0xff]   ;;  %v533_v22 = vld [vmem:[%s6476_s16 + $0xd0] sm:$0xff]  ;;  %v5415_v53 = vld [vmem:[#allocation9 + $0xa0] sm:$0xff]  }
 0x666   : > { %v2185_v41 = vpop.permute.xlu0 %2184  ;;  %4913 = vmatmul.mubr.bf16.gmra.mrb[36].mxu0 %v5414_v38  ;;  %v542_v38 = vld [vmem:[%s6476_s16 + $0x118] sm:$0xff] }
 0x667   : > { %2223 = vrot.lane.b32.xlu1 %v2185_v41, %s6064_s29  ;;  %5003 = vmatpush3.bf16.xpose.msra.mxu0 %v1913_v37  ;;  %v1915_v62 = vpack.c.bf16 %v1905_v4, %v1904_v21  ;;  %v7179_v45 = vpop.eup %5479  ;;  %v532_v4 = vld [vmem:[%s6476_s16 + $0xc8] sm:$0xff] }
 0x668   : > { %5004 = vmatprep.subr.bf16.mxu0 %v1914_v54  ;;  %v7182_v26 = vpop.eup %5481  ;;  %4916 = vmatprep.mubr.bf16.mxu0 %v5415_v53 }
 0x669   : > { %v7148_v23 = vpop.trf.xlu1 }
 0x66a   : > { %v2187_v57 = vpop.permute.xlu0 %2186 }
 0x66b   : > { %2227 = vrot.lane.b32.xlu0 %v2187_v57, %s6070_s22 }
 0x66d   : > { %v7153_v18 = vpop.trf.xlu1 }
 0x66e   : > { %v2189_v52 = vpop.permute.xlu0 %2188 }
 0x66f   : > { %2231 = vrot.lane.b32.xlu1 %v2189_v52, %s6071_s20  ;;  %5005 = vmatpush3.bf16.xpose.msra.mxu0 %v1914_v54  ;;  %v534_v54 = vld [vmem:[%s6476_s16 + $0xd8] sm:$0xff] }
 0x670   : > { %5006 = vmatprep.subr.bf16.mxu0 %v1915_v62 }
 0x671   : > { %v7157_v59 = vpop.trf.xlu1 }
 0x672   : > { %v2191_v27 = vpop.permute.xlu0 %2190 }
 0x673   : > { %2235 = vrot.lane.b32.xlu0 %v2191_v27, %s6069_s19 }
 0x675   : > { %v7160_v14 = vpop.trf.xlu1 }
 0x676   : > { %v2195_v56 = vpop.permute.xlu0 %2194 }
 0x677   : > { %2243 = vrot.lane.b32.xlu0 %v2195_v56, %s6074_s25  ;;  %5007 = vmatpush3.bf16.xpose.msra.mxu0 %v1915_v62 }
 0x679   : > { %v7163_v20 = vpop.trf.xlu1 }
 0x67a   : > { %v2197_v24 = vpop.permute.xlu0 %2196 }
 0x67d   : > { %v7165_v63 = vpop.trf.xlu1 }
 0x67e   : > { %v2199_v36 = vpop.permute.xlu0 %2198 }
 0x67f   : > { %2251 = vrot.lane.b32.xlu0 %v2199_v36, %s6072_s23 }
 0x681   : > { %v7168_v34 = vpop.trf.xlu1 }
 0x682   : > { %v2201_v19 = vpop.permute.xlu0 %2200 }
 0x686   : > { %v2203_v8 = vpop.permute.xlu0 %2202 }
 0x687   : > { %2259 = vrot.lane.b32.xlu0 %v2203_v8, %s6078_s30  ;;  %v5416_v8 = vld [vmem:[#allocation9 + $0xa8] sm:$0xff]  }
 0x688   : > { %4917 = vmatmul.mubr.bf16.gmra.mrb[40].mxu0 %v5416_v8 }
 0x68a   : > { %v2205_v3 = vpop.permute.xlu0 %2204 }
 0x68e   : > { %v2207_v27 = vpop.permute.xlu0 %2206 }
 0x68f   : > { %v4898_v39 = vpop.f32.mrb[20].mxu0 }
 0x690   : > { %v869_v48 = vpop.f32.mrb[21].mxu0  ;;  %v878_v16 = vadd.f32 %v4898_v39, %v529_v47 }
 0x691   : > { %v2193_v28 = vpop.permute.xlu1 %2192  ;;  %v4899_v17 = vpop.f32.mrb[22].mxu0  ;;  %v870_v55 = vadd.f32 %v869_v48, %v527_v43  ;;  %v536_v43 = vld [vmem:[%s6476_s16 + $0xe8] sm:$0xff] }
 0x692   : > { %2239 = vrot.lane.b32.xlu1 %v2193_v28, %s6066_s27  ;;  %v872_v7 = vpop.f32.mrb[23].mxu0  ;;  %v881_v12 = vadd.f32 %v4899_v17, %v530_v44 }
 0x693   : > { %v873_v37 = vadd.f32 %v872_v7, %v528_v42  ;;  %v5417_v7 = vld [vmem:[#allocation9 + $0xb0] sm:$0xff]  }
 0x694   : > { %v7189_v0 = vpack.c.bf16 %v881_v12, %v878_v16  ;;  %v5418_v12 = vld [vmem:[#allocation9 + $0xb8] sm:$0xff]   ;;  %4920 = vmatprep.mubr.bf16.mxu0 %v5417_v7 }
 0x695   : > { %v2209_v40 = vpop.permute.xlu1 %2208  ;;  %v7191_v58 = vpack.c.bf16 %v873_v37, %v870_v55  ;;  %v541_v55 = vld [vmem:[%s6476_s16 + $0x110] sm:$0xff]  ;;  %v539_v37 = vld [vmem:[%s6476_s16 + $0x100] sm:$0xff]  ;;  %4921 = vmatmul.mubr.bf16.gmra.mrb[44].mxu0 %v5418_v12 }
 0x696   : > { %2247 = vrot.lane.b32.xlu1 %v2197_v24, %s6075_s26  ;;  %v549_v12 = vld [vmem:[%s6476_s16 + $0x150] sm:$0xff] }
 0x697   : > { %v4902_v41 = vpop.f32.mrb[24].mxu0 }
 0x698   : > { %v894_v57 = vadd.f32 %v4902_v41, %v533_v22  ;;  %v885_v21 = vpop.f32.mrb[25].mxu0 }
 0x699   : > { %v886_v52 = vadd.f32 %v885_v21, %v531_v29  ;;  %v4903_v62 = vpop.f32.mrb[26].mxu0  ;;  %v540_v21 = vld [vmem:[%s6476_s16 + $0x108] sm:$0xff] }
 0x69a   : > { %2255 = vrot.lane.b32.xlu1 %v2201_v19, %s6073_s14  ;;  %v897_v56 = vadd.f32 %v4903_v62, %v534_v54  ;;  %v888_v24 = vpop.f32.mrb[27].mxu0 }
 0x69b   : > { %v889_v36 = vadd.f32 %v888_v24, %v532_v4 }
 0x69c   : > { %v7198_v19 = vpack.c.bf16 %v897_v56, %v894_v57 }
 0x69d   : > { %v7200_v28 = vpack.c.bf16 %v889_v36, %v886_v52 }
 0x69e   : > { %2263 = vrot.lane.b32.xlu1 %v2205_v3, %s6079_s9  ;;  %v535_v3 = vld [vmem:[%s6476_s16 + $0xe0] sm:$0xff] }
 0x6a2   : > { %2271 = vrot.lane.b32.xlu1 %v2209_v40, %s6077_s1  ;;  %v538_v40 = vld [vmem:[%s6476_s16 + $0xf8] sm:$0xff] }
 0x6a6   : > { %1876 = vadd.xlane.f32.xlu0 %v7179_v45 }
 0x6aa   : > { %1872 = vadd.xlane.f32.xlu0 %v7182_v26 }
 0x6b3   : > { %v4906_v9 = vpop.f32.mrb[28].mxu0 }
 0x6b4   : > { %v901_v5 = vpop.f32.mrb[29].mxu0  ;;  %v910_v48 = vadd.f32 %v4906_v9, %v537_v46 }
 0x6b5   : > { %v4907_v60 = vpop.f32.mrb[30].mxu0  ;;  %v902_v17 = vadd.f32 %v901_v5, %v535_v3  ;;  %v5484_v3 = vpop.eup %5483 }
 0x6b6   : > { %v904_v39 = vpop.f32.mrb[31].mxu0  ;;  %v913_v47 = vadd.f32 %v4907_v60, %v538_v40 }
 0x6b7   : > { %v905_v44 = vadd.f32 %v904_v39, %v536_v43 }
 0x6b8   : > { %v7206_v16 = vpack.c.bf16 %v913_v47, %v910_v48 }
 0x6b9   : > { %v7209_v42 = vpack.c.bf16 %v905_v44, %v902_v17  ;;  %v1906_v17 = vmul.f32 %v5484_v3, %v7082_v6  ;;  %v553_v3 = vld [vmem:[%s6476_s16 + $0x170] sm:$0xff] }
 0x6bf   : > { %v4910_v33 = vpop.f32.mrb[32].mxu0 }
 0x6c0   : > { %2267 = vrot.lane.b32.xlu0 %v2207_v27, %s6076_s4  ;;  %v926_v22 = vadd.f32 %v4910_v33, %v541_v55  ;;  %v917_v29 = vpop.f32.mrb[33].mxu0  ;;  %v547_v33 = vld [vmem:[%s6476_s16 + $0x140] sm:$0xff] }
 0x6c1   : > { %v918_v41 = vadd.f32 %v917_v29, %v539_v37  ;;  %v4911_v54 = vpop.f32.mrb[34].mxu0  ;;  %v8497_v37 = vld [vmem:[#allocation47_spill] sm:$0xff]  ;;  %v550_v29 = vld [vmem:[%s6476_s16 + $0x158] sm:$0xff] }
 0x6c2   : > { %v929_v53 = vadd.f32 %v4911_v54, %v542_v38  ;;  %v920_v57 = vpop.f32.mrb[35].mxu0  ;;  %v8498_v38 = vld [vmem:[#allocation36_spill] sm:$0xff] }
 0x6c3   : > { %v921_v4 = vadd.f32 %v920_v57, %v540_v21 }
 0x6c4   : > { %v1214_v52 = vpack.c.bf16 %v929_v53, %v926_v22  ;;  %v548_v53 = vld [vmem:[%s6476_s16 + $0x148] sm:$0xff] }
 0x6c5   : > { %v1213_v62 = vpack.c.bf16 %v921_v4, %v918_v41 }
 0x6c7   : > { %5012 = vmatprep.mubr.bf16.mxu0 %v1213_v62 }
 0x6cd   : > { %v7214_v27 = vpop.permute.xlu0 %2211 }
 0x6d5   : > { %v7216_v56 = vpop.permute.xlu0 %2219 }
 0x6dd   : > { %v7218_v24 = vpop.permute.xlu0 %2227 }
 0x6e5   : > { %v7220_v36 = vpop.permute.xlu0 %2235 }
 0x6e9   : > { %v7222_v8 = vpop.permute.xlu0 %2243 }
 0x6f1   : > { %v7224_v9 = vpop.permute.xlu0 %2251 }
 0x6f9   : > { %v7226_v5 = vpop.permute.xlu0 %2259 }
 0x733   : > { %v1877_v60 = vpop.xlane.xlu0 %1876 }
 0x734   : > { %5485 = vrcp.f32 %v1877_v60 }
 0x735   : > { %5487 = vrcp.f32 %v7135_v51  ;;  %v544_v51 = vld [vmem:[%s6476_s16 + $0x128] sm:$0xff] }
 0x737   : > { %v1873_v46 = vpop.xlane.xlu0 %1872 }
 0x738   : > { %5489 = vrcp.f32 %v1873_v46 }
 0x73e   : > { %v5486_v40 = vpop.eup %5485 }
 0x73f   : > { %v5488_v39 = vpop.eup %5487  ;;  %v1909_v43 = vmul.f32 %v5486_v40, %v7179_v45  ;;  %v8503_v40 = vld [vmem:[#allocation38_spill] sm:$0xff] }
 0x740   : > { %v1908_v7 = vmul.f32 %v5488_v39, %v7079_v11  ;;  %v551_v39 = vld [vmem:[%s6476_s16 + $0x160] sm:$0xff] }
 0x742   : > { %v5490_v48 = vpop.eup %5489  ;;  %v1917_v25 = vpack.c.bf16 %v1909_v43, %v1908_v7  ;;  %v8505_v43 = vld [vmem:[#allocation33_spill] sm:$0xff] }
 0x743   : > { %v1907_v47 = vmul.f32 %v5490_v48, %v7182_v26  ;;  %v8504_v48 = vld [vmem:[#allocation40_spill] sm:$0xff] }
 0x745   : > { %v1916_v44 = vpack.c.bf16 %v1907_v47, %v1906_v17  ;;  %v554_v47 = vld [vmem:[%s6476_s16 + $0x178] sm:$0xff] }
 0x747   : > { %5008 = vmatprep.subr.bf16.mxu0 %v1916_v44 }
 0x748   : > { %5009 = vmatpush3.bf16.xpose.msra.mxu0 %v1916_v44 }
 0x749   : > { %5010 = vmatprep.subr.bf16.mxu0 %v1917_v25 }
 0x750   : > { %5011 = vmatpush3.bf16.xpose.msra.mxu0 %v1917_v25  ;;  %v552_v25 = vld [vmem:[%s6476_s16 + $0x168] sm:$0xff] }
 0x751   : > { %5036 = vmatprep.subr.bf16.mxu0 %v7191_v58 }
 0x757   : > { %5013 = vmatmul.mubr.bf16.vlgmr.msra.gmra.mrb[48].mxu0 %v1214_v52 }
 0x758   : > { %5037 = vmatpush3.bf16.msra.mxu0 %v7191_v58  ;;  %5040 = vmatprep.mubr.msk.bf16.mxu0 %vm1396_vm0, %v6648_v49  ;;  %v8490_v49 = vld [vmem:[#allocation34_spill] sm:$0xff] }
 0x759   : > { %5038 = vmatprep.subr.bf16.mxu0 %v7189_v0 }
 0x75c   : > { %5039 = vmatpush3.bf16.msra.mxu0 %v7189_v0 }
 0x75d   : > { %5076 = vmatprep.subr.bf16.mxu0 %v6596_v61 }
 0x75f   : > { %5041 = vmatmul.mubr.msk.bf16.vlgmr.msra.gmra.mrb[52].mxu0 %vm1396_vm0, %v6659_v2  ;;  %v8491_v2 = vld [vmem:[#allocation39_spill] sm:$0xff] }
 0x760   : > { %5044 = vmatprep.mubr.msk.bf16.mxu0 %vm1396_vm0, %v6667_v13  ;;  %5077 = vmatpush3.bf16.msra.mxu0 %v6596_v61  ;;  %v8489_v61 = vld [vmem:[#allocation37_spill] sm:$0xff] }
 0x761   : > { %5078 = vmatprep.subr.bf16.mxu0 %v6591_v35  ;;  %v8492_v13 = vld [vmem:[#allocation41_spill] sm:$0xff] }
 0x764   : > { %5079 = vmatpush3.bf16.msra.mxu0 %v6591_v35  ;;  %v8488_v35 = vld [vmem:[#allocation35_spill] sm:$0xff] }
 0x765   : > { %5096 = vmatprep.subr.bf16.mxu0 %v7200_v28 }
 0x767   : > { %5045 = vmatmul.mubr.msk.bf16.gmra.mrb[56].mxu0 %vm1396_vm0, %v6673_v15  ;;  %v545_v15 = vld [vmem:[%s6476_s16 + $0x130] sm:$0xff] }
 0x768   : > { %5048 = vmatprep.mubr.msk.bf16.mxu0 %vm1396_vm0, %v6681_v10  ;;  %v8493_v10 = vld [vmem:[#allocation43_spill] sm:$0xff] }
 0x76f   : > { %5049 = vmatmul.mubr.msk.bf16.gmra.mrb[60].mxu0 %vm1396_vm0, %v6691_v1  ;;  %v543_v1 = vld [vmem:[%s6476_s16 + $0x120] sm:$0xff] }
 0x770   : > { %5052 = vmatprep.mubr.msk.bf16.mxu0 %vm1396_vm0, %v6693_v30  ;;  %v8494_v30 = vld [vmem:[#allocation45_spill] sm:$0xff] }
 0x777   : > { %5053 = vmatmul.mubr.msk.bf16.gmra.mrb[64].mxu0 %vm1396_vm0, %v6697_v31  ;;  %v546_v31 = vld [vmem:[%s6476_s16 + $0x138] sm:$0xff]  ;;  %s8246_s16 = scalar_lea.hbm %s8634_s6, %s4675_s11 }
 0x778   : > { %5080 = vmatprep.mubr.msk.bf16.mxu0 %vm1396_vm0, %v6695_v32  ;;  %v4914_v32 = vpop.f32.mrb[36].mxu0 }
 0x779   : > { %v7280_v11 = vadd.f32 %v4914_v32, %v545_v15  ;;  %v933_v6 = vpop.f32.mrb[37].mxu0  ;;  %v8512_v32 = vld [vmem:[#allocation46_spill] sm:$0xff] }
 0x77a   : > { %v934_v45 = vadd.f32 %v933_v6, %v543_v1  ;;  %v4915_v26 = vpop.f32.mrb[38].mxu0  ;;  %v8510_v1 = vld [vmem:[#allocation42_spill] sm:$0xff]  ;;  %v8514_v6 = vld [vmem:[#allocation49_spill] sm:$0xff] }
 0x77b   : > { %8495 = vst [vmem:[#allocation35_spill] sm:$0xff] %v7280_v11  ;;  %v7283_v0 = vadd.f32 %v4915_v26, %v546_v31  ;;  %v936_v58 = vpop.f32.mrb[39].mxu0  ;;  %v8513_v31 = vld [vmem:[#allocation48_spill] sm:$0xff] }
 0x77c   : > { %v4918_v22 = vpop.f32.mrb[40].mxu0  ;;  %v8517_v26 = vld [vmem:[#allocation52_spill] sm:$0xff] }
 0x77d   : > { %8496 = vst [vmem:[#allocation37_spill] sm:$0xff] %v7283_v0  ;;  %v7294_v41 = vadd.f32 %v4918_v22, %v549_v12  ;;  %v949_v54 = vpop.f32.mrb[41].mxu0  ;;  %v8521_v12 = vld [vmem:[#allocation56_spill] sm:$0xff] }
 0x77e   : > { %v7297_v57 = vadd.f32 %v949_v54, %v547_v33  ;;  %v4919_v21 = vpop.f32.mrb[42].mxu0 }
 0x77f   : > { %5081 = vmatmul.mubr.msk.bf16.vlgmr.msra.gmra.mrb[68].mxu0 %vm1396_vm0, %v8488_v35  ;;  %8499 = vst [vmem:[#allocation34_spill] sm:$0xff] %v7294_v41  ;;  %v7299_v4 = vadd.f32 %v4919_v21, %v550_v29  ;;  %v952_v52 = vpop.f32.mrb[43].mxu0 }
 0x780   : > { %5097 = vmatpush3.bf16.msra.mxu0 %v7200_v28  ;;  %5084 = vmatprep.mubr.msk.bf16.mxu0 %vm1396_vm0, %v8489_v61  ;;  %8500 = vst [vmem:[#allocation39_spill] sm:$0xff] %v7297_v57  ;;  %v7301_v62 = vadd.f32 %v952_v52, %v548_v53  ;;  %v4922_v17 = vpop.f32.mrb[44].mxu0  ;;  %v8523_v52 = vld [vmem:[#allocation60_spill] sm:$0xff] }
 0x781   : > { %5098 = vmatprep.subr.bf16.mxu0 %v7198_v19  ;;  %8501 = vst [vmem:[#allocation41_spill] sm:$0xff] %v7299_v4  ;;  %v7316_v44 = vadd.f32 %v4922_v17, %v553_v3  ;;  %v965_v7 = vpop.f32.mrb[45].mxu0 }
 0x782   : > { %8502 = vst [vmem:[#allocation43_spill] sm:$0xff] %v7301_v62  ;;  %v7319_v35 = vadd.f32 %v965_v7, %v551_v39  ;;  %v4923_v61 = vpop.f32.mrb[46].mxu0 }
 0x783   : > { %8506 = vst [vmem:[#allocation45_spill] sm:$0xff] %v7316_v44 }
 0x784   : > { %5099 = vmatpush3.bf16.msra.mxu0 %v7198_v19  ;;  %v937_v19 = vadd.f32 %v936_v58, %v544_v51  ;;  %8507 = vst [vmem:[#allocation47_spill] sm:$0xff] %v7319_v35  ;;  %v8515_v51 = vld [vmem:[#allocation50_spill] sm:$0xff]  ;;  %v8518_v58 = vld [vmem:[#allocation53_spill] sm:$0xff] }
 0x785   : > { %5136 = vmatprep.subr.bf16.mxu0 %v8490_v49 }
 0x786   : > { %v1215_v55 = vpack.c.bf16 %v937_v19, %v934_v45  ;;  %v8516_v45 = vld [vmem:[#allocation51_spill] sm:$0xff]  ;;  %v8519_v19 = vld [vmem:[#allocation54_spill] sm:$0xff] }
 0x787   : > { %5085 = vmatmul.mubr.msk.bf16.gmra.mrb[72].mxu0 %vm1396_vm0, %v8491_v2  ;;  %v7321_v2 = vadd.f32 %v4923_v61, %v554_v47 }
 0x788   : > { %5088 = vmatprep.mubr.msk.bf16.mxu0 %vm1396_vm0, %v8492_v13  ;;  %5072 = vmatprep.mubr.bf16.mxu1 %v1215_v55  ;;  %v968_v13 = vpop.f32.mrb[47].mxu0  ;;  %v8520_v55 = vld [vmem:[#allocation55_spill] sm:$0xff] }
 0x789   : > { %8508 = vst [vmem:[#allocation36_spill] sm:$0xff] %v7321_v2 }
 0x78f   : > { %5089 = vmatmul.mubr.msk.bf16.gmra.mrb[76].mxu0 %vm1396_vm0, %v8493_v10 }
 0x790   : > { %5092 = vmatprep.mubr.msk.bf16.mxu0 %vm1396_vm0, %v8494_v30  ;;  %v8511_v30 = vld [vmem:[#allocation44_spill] sm:$0xff] }
 0x797   : > { %5093 = vmatmul.mubr.msk.bf16.gmra.mrb[80].mxu0 %vm1396_vm0, %v8497_v37 }
 0x798   : > { %5100 = vmatprep.mubr.msk.bf16.mxu0 %vm1396_vm0, %v8498_v38 }
 0x79f   : > { %5101 = vmatmul.mubr.msk.bf16.vlgmr.msra.gmra.mrb[84].mxu0 %vm1396_vm0, %v8503_v40 }
 0x7a0   : > { %5137 = vmatpush3.bf16.msra.mxu0 %v8490_v49  ;;  %5104 = vmatprep.mubr.msk.bf16.mxu0 %vm1396_vm0, %v8504_v48  ;;  %v7324_v49 = vadd.f32 %v968_v13, %v552_v25 }
 0x7a1   : > { %5138 = vmatprep.subr.bf16.mxu0 %v8505_v43 }
 0x7a2   : > { %8509 = vst [vmem:[#allocation38_spill] sm:$0xff] %v7324_v49 }
 0x7a4   : > { %5139 = vmatpush3.bf16.msra.mxu0 %v8505_v43 }
 0x7a5   : > { %5156 = vmatprep.subr.bf16.mxu0 %v7209_v42 }
 0x7a7   : > { %5105 = vmatmul.mubr.msk.bf16.gmra.mrb[88].mxu0 %vm1396_vm0, %v8510_v1 }
 0x7a8   : > { %5108 = vmatprep.mubr.msk.bf16.mxu0 %vm1396_vm0, %v8511_v30 }
 0x7af   : > { %5109 = vmatmul.mubr.msk.bf16.gmra.mrb[92].mxu0 %vm1396_vm0, %v8512_v32 }
 0x7b0   : > { %5112 = vmatprep.mubr.msk.bf16.mxu0 %vm1396_vm0, %v8513_v31 }
 0x7b7   : > { %5113 = vmatmul.mubr.msk.bf16.gmra.mrb[96].mxu0 %vm1396_vm0, %v8514_v6 }
 0x7b8   : > { %5140 = vmatprep.mubr.msk.bf16.mxu0 %vm1396_vm0, %v8515_v51 }
 0x7bf   : > { %5141 = vmatmul.mubr.msk.bf16.vlgmr.msra.gmra.mrb[100].mxu0 %vm1396_vm0, %v8516_v45 }
 0x7c0   : > { %5157 = vmatpush3.bf16.msra.mxu0 %v7209_v42  ;;  %5144 = vmatprep.mubr.msk.bf16.mxu0 %vm1396_vm0, %v8517_v26  ;;  %v8522_v42 = vld [vmem:[#allocation57_spill] sm:$0xff] }
 0x7c1   : > { %5158 = vmatprep.subr.bf16.mxu0 %v7206_v16 }
 0x7c4   : > { %5159 = vmatpush3.bf16.msra.mxu0 %v7206_v16 }
 0x7c7   : > { %5145 = vmatmul.mubr.msk.bf16.gmra.mrb[104].mxu0 %vm1396_vm0, %v8518_v58 }
 0x7c8   : > { %5148 = vmatprep.mubr.msk.bf16.mxu0 %vm1396_vm0, %v8519_v19 }
 0x7cf   : > { %5149 = vmatmul.mubr.msk.bf16.gmra.mrb[108].mxu0 %vm1396_vm0, %v8520_v55 }
 0x7d0   : > { %5152 = vmatprep.mubr.msk.bf16.mxu0 %vm1396_vm0, %v8521_v12 }
 0x7d7   : > { %5153 = vmatmul.mubr.msk.bf16.gmra.mrb[112].mxu0 %vm1396_vm0, %v8522_v42 }
 0x7d8   : > { %5160 = vmatprep.mubr.msk.bf16.mxu0 %vm1396_vm0, %v7145_v50  ;;  %v2216_v50 = vpop.permute.xlu1 %2215 }
 0x7dc   : > { %v2224_v37 = vpop.permute.xlu1 %2223 }
 0x7df   : > { %5161 = vmatmul.mubr.msk.bf16.vlgmr.msra.gmra.mrb[116].mxu0 %vm1396_vm0, %v7148_v23 }
 0x7e0   : > { %5164 = vmatprep.mubr.msk.bf16.mxu0 %vm1396_vm0, %v7153_v18  ;;  %v2232_v22 = vpop.permute.xlu1 %2231 }
 0x7e7   : > { %5165 = vmatmul.mubr.msk.bf16.gmra.mrb[120].mxu0 %vm1396_vm0, %v7157_v59 }
 0x7e8   : > { %5168 = vmatprep.mubr.msk.bf16.mxu0 %vm1396_vm0, %v7160_v14 }
 0x7ef   : > { %5169 = vmatmul.mubr.msk.bf16.gmra.mrb[124].mxu0 %vm1396_vm0, %v7163_v20 }
 0x7f0   : > { %5172 = vmatprep.mubr.msk.bf16.mxu0 %vm1396_vm0, %v7165_v63  ;;  %v2240_v63 = vpop.permute.xlu1 %2239 }
 0x7f4   : > { %v2248_v47 = vpop.permute.xlu1 %2247 }
 0x7f7   : > { %5173 = vmatmul.mubr.msk.bf16.gmra.mrb[128].mxu0 %vm1396_vm0, %v7168_v34 }
 0x7f8   : > { %v2256_v58 = vpop.permute.xlu1 %2255 }
 0x82a   : > { %v5014_v23 = vpop.f32.mrb[48].mxu0 }
 0x82b   : > { %v1952_v16 = vpop.f32.mrb[49].mxu0 }
 0x82c   : > { %v5015_v18 = vpop.f32.mrb[50].mxu0 }
 0x82d   : > { %v3984_v33 = vpack.c.bf16 %v5015_v18, %v5014_v23  ;;  %v1955_v38 = vpop.f32.mrb[51].mxu0 }
 0x82e   : > { %v3983_v59 = vpack.c.bf16 %v1955_v38, %v1952_v16 }
 0x830   : > { %5196 = vmatprep.subr.bf16.mxu0 %v3983_v59 }
 0x831   : > { %5197 = vmatpush3.bf16.msra.mxu0 %v3983_v59 }
 0x832   : > { %v5042_v14 = vpop.f32.mrb[52].mxu0  ;;  %5198 = vmatprep.subr.bf16.mxu0 %v3984_v33 }
 0x833   : > { %v2356_v20 = vadd.f32 %v5042_v14, %v7216_v56  ;;  %v2347_v29 = vpop.f32.mrb[53].mxu0 }
 0x834   : > { %v5043_v54 = vpop.f32.mrb[54].mxu0  ;;  %v2348_v34 = vadd.f32 %v2347_v29, %v7214_v27 }
 0x835   : > { %v2359_v53 = vadd.f32 %v5043_v54, %v2224_v37  ;;  %v2350_v21 = vpop.f32.mrb[55].mxu0  ;;  %5199 = vmatpush3.bf16.msra.mxu0 %v3984_v33  ;;  %v7381_v40 = vsel %vm1250_vm1, -1e+30, %v2356_v20 }
 0x836   : > { %2430 = vmax.xlane.f32.xlu0 %v7381_v40  ;;  %v2351_v39 = vadd.f32 %v2350_v21, %v2216_v50  ;;  %v7393_v17 = vsel %vm1248_vm2, -1e+30, %v2348_v34  ;;  %v8537_v21 = vld [vmem:[#allocation70_spill] sm:$0xff] }
 0x837   : > { %v7387_v56 = vsel %vm1251_vm4, -1e+30, %v2359_v53  ;;  %vm8538_vm0 = vcmp.gt.s32.totalorder %v8523_v52, %v8537_v21 }
 0x838   : > { %2432 = vmax.xlane.f32.xlu1 %v7387_v56  ;;  %v7400_v13 = vsel %vm1249_vm3, -1e+30, %v2351_v39 }
 0x83a   : > { %v5046_v43 = vpop.f32.mrb[56].mxu0  ;;  %2426 = vmax.xlane.f32.xlu0 %v7393_v17 }
 0x83b   : > { %v2372_v7 = vadd.f32 %v5046_v43, %v7220_v36  ;;  %v2363_v25 = vpop.f32.mrb[57].mxu0 }
 0x83c   : > { %v5047_v1 = vpop.f32.mrb[58].mxu0  ;;  %2428 = vmax.xlane.f32.xlu1 %v7400_v13  ;;  %v2364_v30 = vadd.f32 %v2363_v25, %v7218_v24 }
 0x83d   : > { %v2375_v32 = vadd.f32 %v5047_v1, %v2240_v63  ;;  %v2366_v31 = vpop.f32.mrb[59].mxu0  ;;  %v7407_v51 = vsel %vm1254_vm6, -1e+30, %v2372_v7  ;;  %v2268_v63 = vpop.permute.xlu0 %2267 }
 0x83e   : > { %2438 = vmax.xlane.f32.xlu0 %v7407_v51  ;;  %v2367_v36 = vadd.f32 %v2366_v31, %v2232_v22  ;;  %v7419_v19 = vsel %vm1252_vm7, -1e+30, %v2364_v30  ;;  %v2264_v22 = vpop.permute.xlu1 %2263 }
 0x83f   : > { %v7413_v26 = vsel %vm1255_vm5, -1e+30, %v2375_v32 }
 0x840   : > { %2440 = vmax.xlane.f32.xlu1 %v7413_v26  ;;  %v7426_v23 = vsel %vm1253_vm8, -1e+30, %v2367_v36 }
 0x842   : > { %v5050_v55 = vpop.f32.mrb[60].mxu0  ;;  %2434 = vmax.xlane.f32.xlu0 %v7419_v19 }
 0x843   : > { %v2388_v12 = vadd.f32 %v5050_v55, %v7224_v9  ;;  %v2379_v42 = vpop.f32.mrb[61].mxu0 }
 0x844   : > { %v5051_v16 = vpop.f32.mrb[62].mxu0  ;;  %2436 = vmax.xlane.f32.xlu1 %v7426_v23  ;;  %v2380_v37 = vadd.f32 %v2379_v42, %v7222_v8 }
 0x845   : > { %v2391_v18 = vadd.f32 %v5051_v16, %v2256_v58  ;;  %v2382_v33 = vpop.f32.mrb[63].mxu0  ;;  %v7433_v59 = vsel %vm1258_vm9, -1e+30, %v2388_v12 }
 0x846   : > { %8533 = vst [vmem:[#allocation40_spill] sm:$0xff] %v7433_v59  ;;  %2446 = vmax.xlane.f32.xlu0 %v7433_v59  ;;  %v2383_v9 = vadd.f32 %v2382_v33, %v2248_v47  ;;  %v7445_v29 = vsel %vm1256_vm11, -1e+30, %v2380_v37  ;;  %v2272_v47 = vpop.permute.xlu1 %2271 }
 0x847   : > { %v7439_v20 = vsel %vm1259_vm10, -1e+30, %v2391_v18 }
 0x848   : > { %8535 = vst [vmem:[#allocation33_spill] sm:$0xff] %v7439_v20  ;;  %2448 = vmax.xlane.f32.xlu1 %v7439_v20  ;;  %v7451_v39 = vsel %vm8538_vm0, -1e+30, %v2383_v9 }
 0x84a   : > { %v5054_v54 = vpop.f32.mrb[64].mxu0  ;;  %2442 = vmax.xlane.f32.xlu0 %v7445_v29 }
 0x84b   : > { %v2404_v34 = vadd.f32 %v5054_v54, %v2268_v63  ;;  %v2395_v53 = vpop.f32.mrb[65].mxu0 }
 0x84c   : > { %v5055_v43 = vpop.f32.mrb[66].mxu0  ;;  %2444 = vmax.xlane.f32.xlu1 %v7451_v39  ;;  %v2396_v7 = vadd.f32 %v2395_v53, %v7226_v5 }
 0x84d   : > { %v2407_v25 = vadd.f32 %v5055_v43, %v2272_v47  ;;  %v2398_v1 = vpop.f32.mrb[67].mxu0  ;;  %v7458_v32 = vsel %vm1262_vm13, -1e+30, %v2404_v34 }
 0x84e   : > { %8540 = vst [vmem:[#allocation42_spill] sm:$0xff] %v7458_v32  ;;  %2454 = vmax.xlane.f32.xlu0 %v7458_v32  ;;  %v2399_v31 = vadd.f32 %v2398_v1, %v2264_v22  ;;  %v7470_v5 = vsel %vm1260_vm15, -1e+30, %v2396_v7 }
 0x84f   : > { %v7464_v58 = vsel %vm1263_vm14, -1e+30, %v2407_v25  ;;  %8544 = vst [vmem:[#allocation46_spill] sm:$0xff] %v7470_v5 }
 0x850   : > { %8542 = vst [vmem:[#allocation44_spill] sm:$0xff] %v7464_v58  ;;  %2456 = vmax.xlane.f32.xlu1 %v7464_v58  ;;  %v7476_v37 = vsel %vm1261_vm12, -1e+30, %v2399_v31 }
 0x851   : > { %8546 = vst [vmem:[#allocation48_spill] sm:$0xff] %v7476_v37 }
 0x852   : > { %v5082_v12 = vpop.f32.mrb[68].mxu0  ;;  %2450 = vmax.xlane.f32.xlu0 %v7470_v5 }
 0x853   : > { %v2775_v42 = vpop.f32.mrb[69].mxu0 }
 0x854   : > { %v5083_v18 = vpop.f32.mrb[70].mxu0  ;;  %2452 = vmax.xlane.f32.xlu1 %v7476_v37 }
 0x855   : > { %v2778_v33 = vpop.f32.mrb[71].mxu0 }
 0x85a   : > { %v5086_v22 = vpop.f32.mrb[72].mxu0 }
 0x85b   : > { %v2791_v9 = vpop.f32.mrb[73].mxu0 }
 0x85c   : > { %v5087_v63 = vpop.f32.mrb[74].mxu0 }
 0x85d   : > { %v2794_v54 = vpop.f32.mrb[75].mxu0 }
 0x862   : > { %v5090_v34 = vpop.f32.mrb[76].mxu0 }
 0x863   : > { %v2807_v53 = vpop.f32.mrb[77].mxu0 }
 0x864   : > { %v5091_v47 = vpop.f32.mrb[78].mxu0 }
 0x865   : > { %v2810_v43 = vpop.f32.mrb[79].mxu0  ;;  %2844 = vrot.lane.b32.xlu1 %v5083_v18, %s6063_s21 }
 0x868   : > { %2842 = vrot.lane.b32.xlu0 %v5082_v12, %s6063_s21 }
 0x869   : > { %2840 = vrot.lane.b32.xlu1 %v2778_v33, %s6063_s21 }
 0x86a   : > { %v5094_v7 = vpop.f32.mrb[80].mxu0 }
 0x86b   : > { %v2823_v25 = vpop.f32.mrb[81].mxu0 }
 0x86c   : > { %v5095_v1 = vpop.f32.mrb[82].mxu0  ;;  %2838 = vrot.lane.b32.xlu0 %v2775_v42, %s6063_s21 }
 0x86d   : > { %v2826_v31 = vpop.f32.mrb[83].mxu0  ;;  %2852 = vrot.lane.b32.xlu1 %v5087_v63, %s6063_s21 }
 0x870   : > { %2850 = vrot.lane.b32.xlu0 %v5086_v22, %s6063_s21 }
 0x871   : > { %2848 = vrot.lane.b32.xlu1 %v2794_v54, %s6063_s21 }
 0x872   : > { %v7486_v15 = vpop.f32.mrb[84].mxu0 }
 0x873   : > { %v7488_v10 = vpop.f32.mrb[85].mxu0 }
 0x874   : > { %v7490_v18 = vpop.f32.mrb[86].mxu0  ;;  %2846 = vrot.lane.b32.xlu0 %v2791_v9, %s6063_s21 }
 0x875   : > { %v7493_v12 = vpop.f32.mrb[87].mxu0  ;;  %2860 = vrot.lane.b32.xlu1 %v5091_v47, %s6063_s21 }
 0x878   : > { %2858 = vrot.lane.b32.xlu0 %v5090_v34, %s6063_s21 }
 0x879   : > { %2856 = vrot.lane.b32.xlu1 %v2810_v43, %s6063_s21 }
 0x87a   : > { %v7498_v42 = vpop.f32.mrb[88].mxu0 }
 0x87b   : > { %v7500_v33 = vpop.f32.mrb[89].mxu0 }
 0x87c   : > { %v7502_v22 = vpop.f32.mrb[90].mxu0  ;;  %2854 = vrot.lane.b32.xlu0 %v2807_v53, %s6063_s21 }
 0x87d   : > { %v7505_v63 = vpop.f32.mrb[91].mxu0  ;;  %2868 = vrot.lane.b32.xlu1 %v5095_v1, %s6063_s21 }
 0x880   : > { %2866 = vrot.lane.b32.xlu0 %v5094_v7, %s6063_s21 }
 0x881   : > { %2864 = vrot.lane.b32.xlu1 %v2826_v31, %s6063_s21 }
 0x882   : > { %v7510_v9 = vpop.f32.mrb[92].mxu0 }
 0x883   : > { %v7512_v54 = vpop.f32.mrb[93].mxu0 }
 0x884   : > { %v7514_v34 = vpop.f32.mrb[94].mxu0  ;;  %2862 = vrot.lane.b32.xlu0 %v2823_v25, %s6063_s21 }
 0x885   : > { %v7517_v47 = vpop.f32.mrb[95].mxu0 }
 0x88a   : > { %v7519_v43 = vpop.f32.mrb[96].mxu0 }
 0x88b   : > { %v7521_v53 = vpop.f32.mrb[97].mxu0 }
 0x88c   : > { %v7523_v60 = vpop.f32.mrb[98].mxu0 }
 0x88d   : > { %8547 = vst [vmem:[#allocation49_spill] sm:$0xff] %v7523_v60  ;;  %v7525_v1 = vpop.f32.mrb[99].mxu0 }
 0x88e   : > { %8548 = vst [vmem:[#allocation50_spill] sm:$0xff] %v7525_v1 }
 0x892   : > { %v5142_v7 = vpop.f32.mrb[100].mxu0 }
 0x893   : > { %v3435_v31 = vpop.f32.mrb[101].mxu0  ;;  %3502 = vrot.lane.b32.xlu0 %v5142_v7, %s6063_s21 }
 0x894   : > { %v5143_v46 = vpop.f32.mrb[102].mxu0 }
 0x895   : > { %v3438_v28 = vpop.f32.mrb[103].mxu0  ;;  %3504 = vrot.lane.b32.xlu1 %v5143_v46, %s6063_s21 }
 0x897   : > { %3498 = vrot.lane.b32.xlu0 %v3435_v31, %s6063_s21 }
 0x899   : > { %3500 = vrot.lane.b32.xlu1 %v3438_v28, %s6063_s21 }
 0x89a   : > { %v5146_v25 = vpop.f32.mrb[104].mxu0 }
 0x89b   : > { %v3451_v44 = vpop.f32.mrb[105].mxu0  ;;  %3510 = vrot.lane.b32.xlu0 %v5146_v25, %s6063_s21 }
 0x89c   : > { %v5147_v2 = vpop.f32.mrb[106].mxu0 }
 0x89d   : > { %v3454_v35 = vpop.f32.mrb[107].mxu0  ;;  %3512 = vrot.lane.b32.xlu1 %v5147_v2, %s6063_s21 }
 0x89f   : > { %3506 = vrot.lane.b32.xlu0 %v3451_v44, %s6063_s21 }
 0x8a1   : > { %3508 = vrot.lane.b32.xlu1 %v3454_v35, %s6063_s21 }
 0x8a2   : > { %v5150_v7 = vpop.f32.mrb[108].mxu0 }
 0x8a3   : > { %v3467_v49 = vpop.f32.mrb[109].mxu0  ;;  %3518 = vrot.lane.b32.xlu0 %v5150_v7, %s6063_s21 }
 0x8a4   : > { %v5151_v46 = vpop.f32.mrb[110].mxu0 }
 0x8a5   : > { %v3470_v31 = vpop.f32.mrb[111].mxu0  ;;  %3520 = vrot.lane.b32.xlu1 %v5151_v46, %s6063_s21 }
 0x8a7   : > { %3514 = vrot.lane.b32.xlu0 %v3467_v49, %s6063_s21 }
 0x8a9   : > { %3516 = vrot.lane.b32.xlu1 %v3470_v31, %s6063_s21 }
 0x8aa   : > { %v5154_v28 = vpop.f32.mrb[112].mxu0 }
 0x8ab   : > { %v3483_v25 = vpop.f32.mrb[113].mxu0  ;;  %3526 = vrot.lane.b32.xlu0 %v5154_v28, %s6063_s21 }
 0x8ac   : > { %v5155_v2 = vpop.f32.mrb[114].mxu0 }
 0x8ad   : > { %v3486_v44 = vpop.f32.mrb[115].mxu0  ;;  %3528 = vrot.lane.b32.xlu1 %v5155_v2, %s6063_s21 }
 0x8af   : > { %3522 = vrot.lane.b32.xlu0 %v3483_v25, %s6063_s21 }
 0x8b1   : > { %3524 = vrot.lane.b32.xlu1 %v3486_v44, %s6063_s21  ;;  %s8635_s21 = sld [smem:[#allocation31_spill]] }
 0x8b2   : > { %v7543_v35 = vpop.f32.mrb[116].mxu0 }
 0x8b3   : > { %8549 = vst [vmem:[#allocation51_spill] sm:$0xff] %v7543_v35  ;;  %v7545_v7 = vpop.f32.mrb[117].mxu0 }
 0x8b4   : > { %8550 = vst [vmem:[#allocation52_spill] sm:$0xff] %v7545_v7  ;;  %v7547_v46 = vpop.f32.mrb[118].mxu0 }
 0x8b5   : > { %8551 = vst [vmem:[#allocation53_spill] sm:$0xff] %v7547_v46  ;;  %v7549_v49 = vpop.f32.mrb[119].mxu0 }
 0x8b6   : > { %8552 = vst [vmem:[#allocation54_spill] sm:$0xff] %v7549_v49 }
 0x8b7   : > { %p8636_p10 = scmp.ne.s32.totalorder %s8635_s21, 0 }
 0x8ba   : > { %v7551_v31 = vpop.f32.mrb[120].mxu0 }
 0x8bb   : > { %8553 = vst [vmem:[#allocation55_spill] sm:$0xff] %v7551_v31  ;;  %v7553_v41 = vpop.f32.mrb[121].mxu0 }
 0x8bc   : > { %8554 = vst [vmem:[#allocation56_spill] sm:$0xff] %v7553_v41  ;;  %v7555_v28 = vpop.f32.mrb[122].mxu0 }
 0x8bd   : > { %8555 = vst [vmem:[#allocation57_spill] sm:$0xff] %v7555_v28  ;;  %v7557_v4 = vpop.f32.mrb[123].mxu0 }
 0x8be   : > { %8556 = vst [vmem:[#allocation60_spill] sm:$0xff] %v7557_v4 }
 0x8c2   : > { %v7559_v2 = vpop.f32.mrb[124].mxu0 }
 0x8c3   : > { %8557 = vst [vmem:[#allocation59_spill] sm:$0xff] %v7559_v2  ;;  %v2431_v25 = vpop.xlane.xlu0 %2430  ;;  %v7561_v44 = vpop.f32.mrb[125].mxu0 }
 0x8c4   : > { %8558 = vst [vmem:[#allocation62_spill] sm:$0xff] %v7561_v44  ;;  %v7563_v57 = vpop.f32.mrb[126].mxu0  ;;  %v8612_v50 = vld [vmem:[#allocation57_spill] sm:$0xff] }
 0x8c5   : > { %8559 = vst [vmem:[#allocation58_spill] sm:$0xff] %v7563_v57  ;;  %v7565_v62 = vpop.f32.mrb[127].mxu0  ;;  %v2433_v11 = vpop.xlane.xlu1 %2432  ;;  %v8611_v24 = vld [vmem:[#allocation60_spill] sm:$0xff] }
 0x8c6   : > { %8560 = vst [vmem:[#allocation61_spill] sm:$0xff] %v7565_v62 }
 0x8c7   : > { %v2427_v0 = vpop.xlane.xlu0 %2426 }
 0x8c9   : > { %v2429_v46 = vpop.xlane.xlu1 %2428 }
 0x8ca   : > { %v7567_v49 = vpop.f32.mrb[128].mxu0 }
 0x8cb   : > { %8561 = vst [vmem:[#allocation64_spill] sm:$0xff] %v7567_v49  ;;  %v7569_v58 = vpop.xlane.xlu0 %2438  ;;  %v7571_v41 = vpop.f32.mrb[129].mxu0 }
 0x8cc   : > { %8562 = vst [vmem:[#allocation63_spill] sm:$0xff] %v7571_v41  ;;  %v7573_v28 = vpop.f32.mrb[130].mxu0 }
 0x8cd   : > { %8563 = vst [vmem:[#allocation65_spill] sm:$0xff] %v7573_v28  ;;  %v7575_v4 = vpop.f32.mrb[131].mxu0  ;;  %v2441_v35 = vpop.xlane.xlu1 %2440 }
 0x8ce   : > { %8564 = vst [vmem:[#allocation66_spill] sm:$0xff] %v7575_v4 }
 0x8cf   : > { %v2435_v37 = vpop.xlane.xlu0 %2434 }
 0x8d1   : > { %v7577_v7 = vpop.xlane.xlu1 %2436 }
 0x8d3   : > { %v7579_v57 = vpop.xlane.xlu0 %2446 }
 0x8d4   : > { %8565 = vst [vmem:[#allocation67_spill] sm:$0xff] %v7579_v57 }
 0x8d5   : > { %v7581_v62 = vpop.xlane.xlu1 %2448 }
 0x8d6   : > { %8566 = vst [vmem:[#allocation68_spill] sm:$0xff] %v7581_v62 }
 0x8d7   : > { %v7583_v32 = vpop.xlane.xlu0 %2442 }
 0x8d9   : > { %v7585_v20 = vpop.xlane.xlu1 %2444 }
 0x8db   : > { %v7587_v49 = vpop.xlane.xlu0 %2454 }
 0x8dc   : > { %8567 = vst [vmem:[#allocation69_spill] sm:$0xff] %v7587_v49 }
 0x8dd   : > { %v7589_v5 = vpop.xlane.xlu1 %2456 }
 0x8de   : > { %8568 = vst [vmem:[#allocation71_spill] sm:$0xff] %v7589_v5 }
 0x8df   : > { %v7591_v41 = vpop.xlane.xlu0 %2450 }
 0x8e0   : > { %8569 = vst [vmem:[#allocation73_spill] sm:$0xff] %v7591_v41  ;;  %v2460_v41 = vsub.f32 %v7381_v40, %v2431_v25  ;;  %v2462_v25 = vsub.f32 %v7419_v19, %v2435_v37 }
 0x8e1   : > { %v7593_v28 = vpop.xlane.xlu1 %2452 }
 0x8e2   : > { %8570 = vst [vmem:[#allocation75_spill] sm:$0xff] %v7593_v28  ;;  %v2478_v2 = vmul.f32 1.442695, %v2460_v41 }
 0x8e3   : > { %v2843_v4 = vpop.permute.xlu0 %2842 }
 0x8e4   : > { %2879 = vrot.lane.b32.xlu0 %v2843_v4, %s6067_s3  ;;  %v2458_v4 = vsub.f32 %v7393_v17, %v2427_v0 }
 0x8e5   : > { %v2845_v59 = vpop.permute.xlu1 %2844  ;;  %v8606_v27 = vld [vmem:[#allocation71_spill] sm:$0xff] }
 0x8e6   : > { %2883 = vrot.lane.b32.xlu1 %v2845_v59, %s6064_s29  ;;  %v2461_v59 = vsub.f32 %v7387_v56, %v2433_v11 }
 0x8e7   : > { %v2839_v57 = vpop.permute.xlu0 %2838 }
 0x8e8   : > { %2871 = vrot.lane.b32.xlu0 %v2839_v57, %s6068_s13  ;;  %v2474_v57 = vmul.f32 1.442695, %v2458_v4  ;;  %v2482_v4 = vmul.f32 1.442695, %v2462_v25 }
 0x8e9   : > { %v2841_v62 = vpop.permute.xlu1 %2840 }
 0x8ea   : > { %2875 = vrot.lane.b32.xlu1 %v2841_v62, %s6065_s17  ;;  %v2480_v62 = vmul.f32 1.442695, %v2461_v59  ;;  %5491 = vpow2.f32 %v2474_v57 }
 0x8eb   : > { %v2851_v44 = vpop.permute.xlu0 %2850 }
 0x8ec   : > { %2895 = vrot.lane.b32.xlu0 %v2851_v44, %s6069_s19  ;;  %v2459_v44 = vsub.f32 %v7400_v13, %v2429_v46  ;;  %5493 = vpow2.f32 %v2480_v62  ;;  %v2465_v13 = vsub.f32 %v7413_v26, %v2441_v35 }
 0x8ed   : > { %v2853_v5 = vpop.permute.xlu1 %2852  ;;  %5495 = vpow2.f32 %v2478_v2 }
 0x8ee   : > { %2899 = vrot.lane.b32.xlu1 %v2853_v5, %s6066_s27  ;;  %v2476_v5 = vmul.f32 1.442695, %v2459_v44  ;;  %v2488_v46 = vmul.f32 1.442695, %v2465_v13 }
 0x8ef   : > { %v2847_v49 = vpop.permute.xlu0 %2846 }
 0x8f0   : > { %2887 = vrot.lane.b32.xlu0 %v2847_v49, %s6070_s22  ;;  %5497 = vpow2.f32 %v2476_v5 }
 0x8f1   : > { %v2849_v28 = vpop.permute.xlu1 %2848  ;;  %5499 = vpow2.f32 %v2488_v46 }
 0x8f2   : > { %2891 = vrot.lane.b32.xlu1 %v2849_v28, %s6071_s20  ;;  %v2464_v28 = vsub.f32 %v7407_v51, %v7569_v58 }
 0x8f3   : > { %v2859_v41 = vpop.permute.xlu0 %2858 }
 0x8f4   : > { %v7607_v31 = vpop.eup %5491  ;;  %v2486_v2 = vmul.f32 1.442695, %v2464_v28 }
 0x8f5   : > { %v2861_v40 = vpop.permute.xlu1 %2860 }
 0x8f6   : > { %v7610_v49 = vpop.eup %5493  ;;  %5501 = vpow2.f32 %v2486_v2 }
 0x8f7   : > { %v7613_v11 = vpop.eup %5495  ;;  %v2855_v56 = vpop.permute.xlu0 %2854  ;;  %5503 = vpow2.f32 %v2482_v4  ;;  %v2466_v4 = vsub.f32 %v7445_v29, %v7583_v32 }
 0x8f9   : > { %v2857_v17 = vpop.permute.xlu1 %2856 }
 0x8fa   : > { %v7616_v0 = vpop.eup %5497 }
 0x8fb   : > { %v7627_v59 = vpop.eup %5499  ;;  %v2867_v57 = vpop.permute.xlu0 %2866 }
 0x8fc   : > { %8571 = vst [vmem:[#allocation76_spill] sm:$0xff] %v7627_v59 }
 0x8fd   : > { %v2869_v26 = vpop.permute.xlu1 %2868 }
 0x8ff   : > { %v2863_v51 = vpop.permute.xlu0 %2862 }
 0x900   : > { %v7630_v62 = vpop.eup %5501 }
 0x901   : > { %8572 = vst [vmem:[#allocation77_spill] sm:$0xff] %v7630_v62  ;;  %v7633_v35 = vpop.eup %5503  ;;  %v2865_v19 = vpop.permute.xlu1 %2864 }
 0x902   : > { %8573 = vst [vmem:[#allocation78_spill] sm:$0xff] %v7633_v35 }
 0x905   : > { %v7636_v58 = vpop.permute.xlu0 %3502 }
 0x907   : > { %v3505_v37 = vpop.permute.xlu1 %3504 }
 0x909   : > { %v7638_v44 = vpop.permute.xlu0 %3498 }
 0x90b   : > { %v3501_v5 = vpop.permute.xlu1 %3500 }
 0x90f   : > { %2506 = vadd.xlane.f32.xlu0 %v7607_v31 }
 0x913   : > { %2512 = vadd.xlane.f32.xlu0 %v7610_v49 }
 0x916   : > { %2510 = vadd.xlane.f32.xlu1 %v7613_v11 }
 0x91a   : > { %2508 = vadd.xlane.f32.xlu1 %v7616_v0 }
 0x929   : > { %2911 = vrot.lane.b32.xlu0 %v2859_v41, %s6072_s23  ;;  %v3511_v41 = vpop.permute.xlu0 %3510 }
 0x92b   : > { %2915 = vrot.lane.b32.xlu1 %v2861_v40, %s6073_s14  ;;  %v7642_v40 = vpop.permute.xlu1 %3512 }
 0x92d   : > { %2903 = vrot.lane.b32.xlu0 %v2855_v56, %s6074_s25  ;;  %v7644_v56 = vpop.permute.xlu0 %3506 }
 0x92f   : > { %2907 = vrot.lane.b32.xlu1 %v2857_v17, %s6075_s26  ;;  %v2463_v17 = vsub.f32 %v7426_v23, %v7577_v7  ;;  %v3509_v13 = vpop.permute.xlu1 %3508 }
 0x931   : > { %v2484_v46 = vmul.f32 1.442695, %v2463_v17  ;;  %v3519_v28 = vpop.permute.xlu0 %3518 }
 0x933   : > { %5505 = vpow2.f32 %v2484_v46  ;;  %v7649_v2 = vpop.permute.xlu1 %3520 }
 0x935   : > { %v3515_v25 = vpop.permute.xlu0 %3514 }
 0x93d   : > { %v7657_v16 = vpop.eup %5505 }
 0x93e   : > { %8575 = vst [vmem:[#allocation80_spill] sm:$0xff] %v7657_v16 }
 0x94c   : > { %2520 = vadd.xlane.f32.xlu0 %v7627_v59 }
 0x953   : > { %2518 = vadd.xlane.f32.xlu1 %v7630_v62  ;;  %v2467_v62 = vsub.f32 %v7451_v39, %v7585_v20 }
 0x957   : > { %2514 = vadd.xlane.f32.xlu1 %v7633_v35 }
 0x962   : > { %2927 = vrot.lane.b32.xlu0 %v2867_v57, %s6076_s4  ;;  %v7653_v57 = vpop.permute.xlu1 %3516 }
 0x966   : > { %v7660_v23 = vpop.permute.xlu1 %3528 }
 0x967   : > { %8576 = vst [vmem:[#allocation81_spill] sm:$0xff] %v7660_v23 }
 0x968   : > { %2931 = vrot.lane.b32.xlu1 %v2869_v26, %s6077_s1  ;;  %v7655_v26 = vpop.permute.xlu0 %3526 }
 0x969   : > { %8574 = vst [vmem:[#allocation79_spill] sm:$0xff] %v7655_v26 }
 0x96a   : > { %v3525_v46 = vpop.permute.xlu1 %3524 }
 0x96c   : > { %2923 = vrot.lane.b32.xlu1 %v2865_v19, %s6079_s9  ;;  %v2490_v19 = vmul.f32 1.442695, %v2466_v4  ;;  %v3523_v7 = vpop.permute.xlu0 %3522 }
 0x96e   : > { %5507 = vpow2.f32 %v2490_v19  ;;  %v2884_v36 = vpop.permute.xlu1 %2883 }
 0x970   : > { %v7662_v17 = vpop.permute.xlu0 %2879 }
 0x972   : > { %v2876_v32 = vpop.permute.xlu1 %2875 }
 0x974   : > { %v7664_v1 = vpop.permute.xlu0 %2871 }
 0x976   : > { %v7672_v4 = vpop.permute.xlu1 %2899 }
 0x978   : > { %v7666_v29 = vpop.eup %5507  ;;  %v7669_v26 = vpop.permute.xlu0 %2895 }
 0x979   : > { %8577 = vst [vmem:[#allocation82_spill] sm:$0xff] %v7666_v29 }
 0x97a   : > { %v2892_v59 = vpop.permute.xlu1 %2891 }
 0x97c   : > { %v7674_v23 = vpop.permute.xlu0 %2887 }
 0x981   : > { %2516 = vadd.xlane.f32.xlu0 %v7657_v16 }
 0x990   : > { %2522 = vadd.xlane.f32.xlu1 %v7666_v29  ;;  %v2492_v29 = vmul.f32 1.442695, %v2467_v62 }
 0x997   : > { %2919 = vrot.lane.b32.xlu0 %v2863_v51, %s6078_s30 }
 0x99c   : > { %v2507_v19 = vpop.xlane.xlu0 %2506 }
 0x99d   : > { %5509 = vrcp.f32 %v2507_v19 }
 0x9a0   : > { %v2513_v35 = vpop.xlane.xlu0 %2512 }
 0x9a1   : > { %3543 = vrot.lane.b32.xlu1 %v3505_v37, %s6064_s29  ;;  %s4360_s29 = scalar_lea.sflag [#allocation5], %s6460_s18 }
 0x9a3   : > { %v2511_v16 = vpop.xlane.xlu1 %2510 }
 0x9a4   : > { %5511 = vrcp.f32 %v2511_v16 }
 0x9a5   : > { %3535 = vrot.lane.b32.xlu1 %v3501_v5, %s6065_s17  ;;  %5513 = vrcp.f32 %v2513_v35 }
 0x9a7   : > { %v2509_v51 = vpop.xlane.xlu1 %2508  ;;  %v5510_v60 = vpop.eup %5509 }
 0x9a8   : > { %5515 = vrcp.f32 %v2509_v51  ;;  %v2554_v39 = vmul.f32 %v5510_v60, %v7607_v31  ;;  %v3019_v60 = vadd.f32 %v7490_v18, %v2884_v36  ;;  %v3011_v31 = vadd.f32 %v7493_v12, %v2876_v32 }
 0x9a9   : > { %3555 = vrot.lane.b32.xlu1 %v3511_v41, %s6069_s19  ;;  %5517 = vpow2.f32 %v2492_v29 }
 0x9aa   : > { %v7716_v36 = vsel %vm1249_vm3, -1e+30, %v3011_v31  ;;  %v8582_v31 = vld [vmem:[#allocation77_spill] sm:$0xff] }
 0x9ad   : > { %3551 = vrot.lane.b32.xlu1 %v3509_v13, %s6071_s20 }
 0x9ae   : > { %v5512_v37 = vpop.eup %5511 }
 0x9af   : > { %v5514_v21 = vpop.eup %5513  ;;  %v2556_v16 = vmul.f32 %v5512_v37, %v7613_v11 }
 0x9b0   : > { %v2557_v41 = vmul.f32 %v5514_v21, %v7610_v49  ;;  %v2912_v21 = vpop.permute.xlu0 %2911  ;;  %v7707_v49 = vsel %vm1251_vm4, -1e+30, %v3019_v60  ;;  %v8581_v60 = vld [vmem:[#allocation80_spill] sm:$0xff] }
 0x9b1   : > { %3571 = vrot.lane.b32.xlu1 %v3519_v28, %s6072_s23  ;;  %v3048_v12 = vadd.f32 %v7510_v9, %v2912_v21  ;;  %v3016_v28 = vadd.f32 %v7486_v15, %v7662_v17  ;;  %v3024_v15 = vadd.f32 %v7500_v33, %v7674_v23 }
 0x9b2   : > { %v5516_v20 = vpop.eup %5515  ;;  %v2571_v13 = vpack.c.bf16 %v2557_v41, %v2556_v16  ;;  %v8579_v16 = vld [vmem:[#allocation49_spill] sm:$0xff]  ;;  %v8580_v41 = vld [vmem:[#allocation78_spill] sm:$0xff] }
 0x9b3   : > { %v2555_v5 = vmul.f32 %v5516_v20, %v7616_v0  ;;  %v7686_v62 = vpop.eup %5517  ;;  %v3027_v0 = vadd.f32 %v7505_v63, %v2892_v59  ;;  %v7731_v59 = vsel %vm1258_vm9, -1e+30, %v3048_v12  ;;  %v7778_v17 = vsel %vm1252_vm7, -1e+30, %v3024_v15 }
 0x9b4   : > { %v2904_v11 = vpop.permute.xlu0 %2903 }
 0x9b5   : > { %3563 = vrot.lane.b32.xlu1 %v3515_v25, %s6074_s25  ;;  %v2570_v35 = vpack.c.bf16 %v2555_v5, %v2554_v39  ;;  %v3040_v63 = vadd.f32 %v7512_v54, %v2904_v11  ;;  %v7754_v25 = vsel %vm1250_vm1, -1e+30, %v3016_v28 }
 0x9b6   : > { %2524 = vadd.xlane.f32.xlu0 %v7686_v62 }
 0x9b7   : > { %5056 = vmatprep.subr.bf16.mxu1 %v2570_v35 }
 0x9b8   : > { %5057 = vmatpush3.bf16.xpose.msra.mxu1 %v2570_v35 }
 0x9b9   : > { %3579 = vrot.lane.b32.xlu1 %v3523_v7, %s6078_s30  ;;  %5058 = vmatprep.subr.bf16.mxu1 %v2571_v13  ;;  %v3032_v7 = vadd.f32 %v7498_v42, %v7669_v26  ;;  %v3035_v42 = vadd.f32 %v7502_v22, %v7672_v4 }
 0x9bb   : > { %v7785_v29 = vsel %vm1255_vm5, -1e+30, %v3035_v42 }
 0x9c0   : > { %5059 = vmatpush3.bf16.xpose.msra.mxu1 %v2571_v13 }
 0x9cc   : > { %3539 = vrot.lane.b32.xlu0 %v7636_v58, %s6067_s3  ;;  %v7724_v58 = vsel %vm1253_vm8, -1e+30, %v3027_v0 }
 0x9d0   : > { %3531 = vrot.lane.b32.xlu0 %v7638_v44, %s6068_s13 }
 0x9d4   : > { %3547 = vrot.lane.b32.xlu0 %v7644_v56, %s6070_s22  ;;  %v2916_v56 = vpop.permute.xlu1 %2915 }
 0x9d5   : > { %v3051_v33 = vadd.f32 %v7514_v34, %v2916_v56 }
 0x9d7   : > { %v7799_v34 = vsel %vm1259_vm10, -1e+30, %v3051_v33 }
 0x9d8   : > { %3559 = vrot.lane.b32.xlu0 %v7642_v40, %s6066_s27  ;;  %v7738_v40 = vsel %vm1256_vm11, -1e+30, %v3040_v63  ;;  %s6080_s27 = smov [#allocation18]  }
 0x9d9   : > { %v2521_v18 = vpop.xlane.xlu0 %2520  ;;  %s5961_s3 = sshll.u32 %s6080_s27, 4  ;;  %s5962_s3 = int_to_ptr.vmem [resolvable:$false] %s5961_s3 }
 0x9da   : > { %s5963_s13 = scalar_lea.vmem %s5962_s3, 4096 }
 0x9dc   : > { %3575 = vrot.lane.b32.xlu0 %v7649_v2, %s6073_s14  ;;  %v2908_v2 = vpop.permute.xlu1 %2907 }
 0x9dd   : > { %3092 = vmax.xlane.f32.xlu1 %v7707_v49  ;;  %v2928_v44 = vpop.permute.xlu0 %2927  ;;  %v3043_v4 = vadd.f32 %v7517_v47, %v2908_v2 }
 0x9de   : > { %v3064_v9 = vadd.f32 %v7519_v43, %v2928_v44  ;;  %v3008_v43 = vadd.f32 %v7488_v10, %v7664_v1  ;;  %v7770_v1 = vsel %vm1254_vm6, -1e+30, %v3032_v7  ;;  %v8584_v44 = vld [vmem:[#allocation50_spill] sm:$0xff] }
 0x9df   : > { %v7805_v5 = vsel %vm8538_vm0, -1e+30, %v3043_v4 }
 0x9e0   : > { %3567 = vrot.lane.b32.xlu0 %v7653_v57, %s6075_s26  ;;  %v7744_v54 = vsel %vm1262_vm13, -1e+30, %v3064_v9  ;;  %v2519_v57 = vpop.xlane.xlu1 %2518 }
 0x9e1   : > { %3088 = vmax.xlane.f32.xlu1 %v7716_v36  ;;  %5519 = vrcp.f32 %v2519_v57 }
 0x9e4   : > { %3583 = vrot.lane.b32.xlu0 %v3525_v46, %s6079_s9  ;;  %v7762_v46 = vsel %vm1248_vm2, -1e+30, %v3008_v43  ;;  %v2515_v10 = vpop.xlane.xlu1 %2514 }
 0x9e5   : > { %3096 = vmax.xlane.f32.xlu1 %v7724_v58  ;;  %5521 = vrcp.f32 %v2515_v10  ;;  %v8587_v10 = vld [vmem:[#allocation79_spill] sm:$0xff] }
 0x9e6   : > { %5523 = vrcp.f32 %v2521_v18  ;;  %v8583_v18 = vld [vmem:[#allocation76_spill] sm:$0xff] }
 0x9e8   : > { %v2932_v32 = vpop.permute.xlu1 %2931 }
 0x9e9   : > { %3106 = vmax.xlane.f32.xlu1 %v7731_v59  ;;  %v3067_v35 = vadd.f32 %v8579_v16, %v2932_v32 }
 0x9eb   : > { %v5520_v51 = vpop.eup %5519  ;;  %v7817_v28 = vsel %vm1263_vm14, -1e+30, %v3067_v35  ;;  %v8593_v35 = vld [vmem:[#allocation81_spill] sm:$0xff] }
 0x9ec   : > { %v2924_v39 = vpop.permute.xlu1 %2923  ;;  %v2560_v11 = vmul.f32 %v5520_v51, %v8582_v31  ;;  %v8595_v31 = vld [vmem:[#allocation73_spill] sm:$0xff] }
 0x9ed   : > { %3102 = vmax.xlane.f32.xlu1 %v7738_v40  ;;  %v3059_v9 = vadd.f32 %v8584_v44, %v2924_v39  ;;  %v8592_v39 = vld [vmem:[#allocation40_spill] sm:$0xff] }
 0x9ee   : > { %v8597_v44 = vld [vmem:[#allocation68_spill] sm:$0xff] }
 0x9ef   : > { %v5522_v37 = vpop.eup %5521  ;;  %v7825_v7 = vsel %vm1261_vm12, -1e+30, %v3059_v9  ;;  %v8598_v9 = vld [vmem:[#allocation33_spill] sm:$0xff] }
 0x9f0   : > { %v2558_v13 = vmul.f32 %v5522_v37, %v8580_v41  ;;  %v8590_v37 = vld [vmem:[#allocation62_spill] sm:$0xff] }
 0x9f1   : > { %3114 = vmax.xlane.f32.xlu1 %v7744_v54 }
 0xa03   : > { %3090 = vmax.xlane.f32.xlu0 %v7754_v25 }
 0xa07   : > { %3086 = vmax.xlane.f32.xlu0 %v7762_v46 }
 0xa0b   : > { %3098 = vmax.xlane.f32.xlu0 %v7770_v1 }
 0xa0e   : > { %v2517_v26 = vpop.xlane.xlu0 %2516 }
 0xa0f   : > { %5525 = vrcp.f32 %v2517_v26  ;;  %3094 = vmax.xlane.f32.xlu0 %v7778_v17  ;;  %v8588_v26 = vld [vmem:[#allocation55_spill] sm:$0xff] }
 0xa12   : > { %v2920_v23 = vpop.permute.xlu0 %2919 }
 0xa13   : > { %v3056_v22 = vadd.f32 %v7521_v53, %v2920_v23  ;;  %3100 = vmax.xlane.f32.xlu0 %v7785_v29  ;;  %v5524_v53 = vpop.eup %5523 }
 0xa14   : > { %v2561_v12 = vmul.f32 %v5524_v53, %v8583_v18 }
 0xa15   : > { %v7793_v19 = vsel %vm1260_vm15, -1e+30, %v3056_v22  ;;  %v8589_v22 = vld [vmem:[#allocation59_spill] sm:$0xff] }
 0xa16   : > { %3110 = vmax.xlane.f32.xlu1 %v7793_v19  ;;  %v2573_v2 = vpack.c.bf16 %v2561_v12, %v2560_v11  ;;  %v8596_v11 = vld [vmem:[#allocation46_spill] sm:$0xff] }
 0xa17   : > { %3108 = vmax.xlane.f32.xlu0 %v7799_v34 }
 0xa19   : > { %v5526_v20 = vpop.eup %5525 }
 0xa1a   : > { %v2559_v21 = vmul.f32 %v5526_v20, %v8581_v60  ;;  %v8591_v20 = vld [vmem:[#allocation67_spill] sm:$0xff] }
 0xa1b   : > { %3104 = vmax.xlane.f32.xlu0 %v7805_v5  ;;  %v2468_v16 = vsub.f32 %v8592_v39, %v8591_v20 }
 0xa1c   : > { %v2572_v0 = vpack.c.bf16 %v2559_v21, %v2558_v13  ;;  %v8594_v13 = vld [vmem:[#allocation63_spill] sm:$0xff] }
 0xa1d   : > { %v2523_v63 = vpop.xlane.xlu1 %2522  ;;  %v2494_v21 = vmul.f32 1.442695, %v2468_v16 }
 0xa1e   : > { %5060 = vmatprep.subr.bf16.mxu1 %v2572_v0 }
 0xa1f   : > { %5061 = vmatpush3.bf16.xpose.msra.mxu1 %v2572_v0  ;;  %3116 = vmax.xlane.f32.xlu0 %v7817_v28  ;;  %5527 = vpow2.f32 %v2494_v21  ;;  %v2470_v0 = vsub.f32 %v8596_v11, %v8595_v31  ;;  %v8604_v11 = vld [vmem:[#allocation82_spill] sm:$0xff] }
 0xa20   : > { %5062 = vmatprep.subr.bf16.mxu1 %v2573_v2  ;;  %5529 = vrcp.f32 %v2523_v63  ;;  %v8601_v63 = vld [vmem:[#allocation52_spill] sm:$0xff] }
 0xa21   : > { %v7820_v43 = vpop.permute.xlu1 %3543  ;;  %v2498_v12 = vmul.f32 1.442695, %v2470_v0 }
 0xa23   : > { %3112 = vmax.xlane.f32.xlu0 %v7825_v7 }
 0xa25   : > { %v3536_v15 = vpop.permute.xlu1 %3535 }
 0xa27   : > { %3587 = vrot.lane.b32.xlu1 %v8587_v10, %s6076_s4  ;;  %5063 = vmatpush3.bf16.xpose.msra.mxu1 %v2573_v2  ;;  %v2469_v2 = vsub.f32 %v8598_v9, %v8597_v44 }
 0xa29   : > { %v3556_v42 = vpop.permute.xlu1 %3555 }
 0xa2a   : > { %v7831_v33 = vadd.f32 %v8588_v26, %v3556_v42  ;;  %v8599_v42 = vld [vmem:[#allocation69_spill] sm:$0xff]  ;;  %v8600_v26 = vld [vmem:[#allocation42_spill] sm:$0xff] }
 0xa2d   : > { %v7833_v23 = vpop.permute.xlu1 %3551 }
 0xa31   : > { %v3572_v32 = vpop.permute.xlu1 %3571 }
 0xa32   : > { %v7836_v4 = vadd.f32 %v8589_v22, %v3572_v32  ;;  %v2472_v32 = vsub.f32 %v8600_v26, %v8599_v42  ;;  %v2496_v22 = vmul.f32 1.442695, %v2469_v2  ;;  %v8605_v2 = vld [vmem:[#allocation51_spill] sm:$0xff]  ;;  %v8607_v26 = vld [vmem:[#allocation44_spill] sm:$0xff] }
 0xa34   : > { %v2502_v39 = vmul.f32 1.442695, %v2472_v32  ;;  %v2473_v32 = vsub.f32 %v8607_v26, %v8606_v27  ;;  %v8005_v57 = vsel %vm1258_vm9, -1e+30, %v7836_v4 }
 0xa35   : > { %v3564_v51 = vpop.permute.xlu1 %3563 }
 0xa36   : > { %v7839_v53 = vadd.f32 %v8590_v37, %v3564_v51  ;;  %v7854_v51 = vpop.eup %5527 }
 0xa37   : > { %v5530_v20 = vpop.eup %5529 }
 0xa38   : > { %v2562_v0 = vmul.f32 %v5530_v20, %v8604_v11 }
 0xa39   : > { %3591 = vrot.lane.b32.xlu0 %v8593_v35, %s6077_s1  ;;  %v3580_v41 = vpop.permute.xlu1 %3579  ;;  %v8602_v35 = vld [vmem:[#allocation75_spill] sm:$0xff] }
 0xa3a   : > { %v7846_v60 = vadd.f32 %v8594_v13, %v3580_v41  ;;  %v8603_v41 = vld [vmem:[#allocation48_spill] sm:$0xff] }
 0xa3b   : > { %v2471_v13 = vsub.f32 %v8603_v41, %v8602_v35 }
 0xa43   : > { %v2525_v18 = vpop.xlane.xlu0 %2524 }
 0xa44   : > { %5531 = vrcp.f32 %v2525_v18 }
 0xa45   : > { %5533 = vpow2.f32 %v2498_v12  ;;  %v2500_v12 = vmul.f32 1.442695, %v2471_v13  ;;  %v8610_v13 = vld [vmem:[#allocation53_spill] sm:$0xff] }
 0xa46   : > { %5535 = vpow2.f32 %v2496_v22 }
 0xa47   : > { %v3540_v10 = vpop.permute.xlu0 %3539  ;;  %5537 = vpow2.f32 %v2502_v39 }
 0xa48   : > { %v3676_v42 = vadd.f32 %v8605_v2, %v3540_v10  ;;  %5539 = vpow2.f32 %v2500_v12  ;;  %v2504_v10 = vmul.f32 1.442695, %v2473_v32 }
 0xa4a   : > { %v7877_v22 = vsel %vm1250_vm1, -1e+30, %v3676_v42  ;;  %5541 = vpow2.f32 %v2504_v10  ;;  %vm8614_vm1 = vmmov %vm8538_vm0 }
 0xa4b   : > { %v3532_v37 = vpop.permute.xlu0 %3531  ;;  %2526 = vadd.xlane.f32.xlu1 %v7854_v51 }
 0xa4c   : > { %v3668_v16 = vadd.f32 %v8601_v63, %v3532_v37  ;;  %v8608_v37 = vld [vmem:[#allocation54_spill] sm:$0xff] }
 0xa4d   : > { %v3671_v20 = vadd.f32 %v8608_v37, %v3536_v15 }
 0xa4e   : > { %v5532_v21 = vpop.eup %5531  ;;  %v7863_v31 = vsel %vm1248_vm2, -1e+30, %v3668_v16  ;;  %v8609_v16 = vld [vmem:[#allocation56_spill] sm:$0xff] }
 0xa4f   : > { %3746 = vmax.xlane.f32.xlu1 %v7863_v31  ;;  %v2563_v18 = vmul.f32 %v5532_v21, %v7686_v62  ;;  %v7868_v9 = vpop.eup %5533  ;;  %v3548_v39 = vpop.permute.xlu0 %3547  ;;  %v7891_v3 = vsel %vm1249_vm3, -1e+30, %v3671_v20  ;;  %v3679_v21 = vadd.f32 %v8610_v13, %v7820_v43 }
 0xa50   : > { %v7879_v62 = vpop.eup %5535  ;;  %v3684_v35 = vadd.f32 %v8609_v16, %v3548_v39 }
 0xa51   : > { %v2574_v44 = vpack.c.bf16 %v2563_v18, %v2562_v0  ;;  %v7884_v63 = vpop.eup %5537  ;;  %v7908_v61 = vsel %vm1251_vm4, -1e+30, %v3679_v21  ;;  %v3687_v0 = vadd.f32 %v8611_v24, %v7833_v23  ;;  %v8615_v21 = vld [vmem:[#allocation58_spill] sm:$0xff] }
 0xa52   : > { %v7897_v15 = vsel %vm1252_vm7, -1e+30, %v3684_v35  ;;  %v7899_v41 = vpop.eup %5539 }
 0xa53   : > { %2530 = vadd.xlane.f32.xlu1 %v7868_v9  ;;  %5064 = vmatprep.subr.bf16.mxu1 %v2574_v44  ;;  %v7919_v43 = vsel %vm1253_vm8, -1e+30, %v3687_v0  ;;  %v3560_v42 = vpop.permute.xlu0 %3559 }
 0xa54   : > { %5065 = vmatpush3.bf16.xpose.msra.mxu1 %v2574_v44  ;;  %v7911_v11 = vpop.eup %5541  ;;  %v3695_v20 = vadd.f32 %v8612_v50, %v3560_v42 }
 0xa57   : > { %3750 = vmax.xlane.f32.xlu1 %v7877_v22  ;;  %v3576_v32 = vpop.permute.xlu0 %3575 }
 0xa58   : > { %2528 = vadd.xlane.f32.xlu0 %v7879_v62  ;;  %v3711_v24 = vadd.f32 %v8615_v21, %v3576_v32 }
 0xa5b   : > { %2534 = vadd.xlane.f32.xlu1 %v7884_v63 }
 0xa5c   : > { %3748 = vmax.xlane.f32.xlu0 %v7891_v3 }
 0xa5f   : > { %3754 = vmax.xlane.f32.xlu1 %v7897_v15 }
 0xa60   : > { %2532 = vadd.xlane.f32.xlu0 %v7899_v41 }
 0xa64   : > { %3752 = vmax.xlane.f32.xlu0 %v7908_v61 }
 0xa68   : > { %2536 = vadd.xlane.f32.xlu0 %v7911_v11 }
 0xa6a   : > { %v3093_v18 = vpop.xlane.xlu1 %3092 }
 0xa6b   : > { %v3121_v2 = vsub.f32 %v7707_v49, %v3093_v18  ;;  %v3568_v49 = vpop.permute.xlu0 %3567  ;;  %v7952_v18 = vsel %vm1259_vm10, -1e+30, %v3711_v24 }
 0xa6c   : > { %3756 = vmax.xlane.f32.xlu0 %v7919_v43 }
 0xa6d   : > { %v3140_v27 = vmul.f32 1.442695, %v3121_v2 }
 0xa6e   : > { %v3089_v48 = vpop.xlane.xlu1 %3088 }
 0xa6f   : > { %v3119_v12 = vsub.f32 %v7716_v36, %v3089_v48  ;;  %v7932_v36 = vsel %vm1255_vm5, -1e+30, %v3695_v20  ;;  %v3584_v45 = vpop.permute.xlu0 %3583 }
 0xa71   : > { %v3136_v44 = vmul.f32 1.442695, %v3119_v12 }
 0xa72   : > { %v3097_v23 = vpop.xlane.xlu1 %3096 }
 0xa73   : > { %5543 = vpow2.f32 %v3136_v44  ;;  %v3123_v26 = vsub.f32 %v7724_v58, %v3097_v23  ;;  %v8613_v58 = vld [vmem:[#allocation61_spill] sm:$0xff] }
 0xa74   : > { %5545 = vpow2.f32 %v3140_v27  ;;  %v3703_v16 = vadd.f32 %v8613_v58, %v3568_v49 }
 0xa75   : > { %v3144_v39 = vmul.f32 1.442695, %v3123_v26 }
 0xa76   : > { %v7942_v35 = vsel %vm8614_vm1, -1e+30, %v3703_v16 }
 0xa77   : > { %5547 = vpow2.f32 %v3144_v39  ;;  %v3107_v39 = vpop.xlane.xlu1 %3106 }
 0xa7b   : > { %v3103_v24 = vpop.xlane.xlu1 %3102 }
 0xa7d   : > { %v7925_v37 = vpop.eup %5543 }
 0xa7e   : > { %3168 = vadd.xlane.f32.xlu0 %v7925_v37  ;;  %v7935_v10 = vpop.eup %5545 }
 0xa81   : > { %v7945_v13 = vpop.eup %5547 }
 0xa82   : > { %3760 = vmax.xlane.f32.xlu0 %v7932_v36 }
 0xa86   : > { %3172 = vadd.xlane.f32.xlu0 %v7935_v10 }
 0xa8a   : > { %3764 = vmax.xlane.f32.xlu0 %v7942_v35 }
 0xa8e   : > { %3176 = vadd.xlane.f32.xlu0 %v7945_v13 }
 0xa90   : > { %v3091_v0 = vpop.xlane.xlu0 %3090 }
 0xa91   : > { %v3120_v2 = vsub.f32 %v7754_v25, %v3091_v0  ;;  %v7966_v25 = vsel %vm1254_vm6, -1e+30, %v7831_v33 }
 0xa92   : > { %3768 = vmax.xlane.f32.xlu0 %v7952_v18 }
 0xa93   : > { %v3138_v27 = vmul.f32 1.442695, %v3120_v2 }
 0xa94   : > { %v3087_v47 = vpop.xlane.xlu0 %3086 }
 0xa95   : > { %v3118_v48 = vsub.f32 %v7762_v46, %v3087_v47  ;;  %v8616_v47 = vld [vmem:[#allocation66_spill] sm:$0xff] }
 0xa97   : > { %v3134_v12 = vmul.f32 1.442695, %v3118_v48  ;;  %v3719_v48 = vadd.f32 %v8616_v47, %v3584_v45 }
 0xa98   : > { %v3099_v44 = vpop.xlane.xlu0 %3098 }
 0xa99   : > { %5549 = vpow2.f32 %v3134_v12  ;;  %v7993_v45 = vsel %vm1261_vm12, -1e+30, %v3719_v48 }
 0xa9a   : > { %5551 = vpow2.f32 %v3138_v27  ;;  %v3115_v27 = vpop.xlane.xlu1 %3114 }
 0xa9b   : > { %v3132_v56 = vsub.f32 %v7744_v54, %v3115_v27 }
 0xa9c   : > { %v3095_v42 = vpop.xlane.xlu0 %3094 }
 0xa9d   : > { %v3122_v26 = vsub.f32 %v7778_v17, %v3095_v42  ;;  %v3124_v17 = vsub.f32 %v7770_v1, %v3099_v44  ;;  %v7982_v1 = vsel %vm1256_vm11, -1e+30, %v7839_v53  ;;  %v3162_v55 = vmul.f32 1.442695, %v3132_v56 }
 0xa9f   : > { %v3142_v46 = vmul.f32 1.442695, %v3122_v26  ;;  %v3146_v0 = vmul.f32 1.442695, %v3124_v17 }
 0xaa0   : > { %v3101_v23 = vpop.xlane.xlu0 %3100 }
 0xaa1   : > { %v3125_v14 = vsub.f32 %v7785_v29, %v3101_v23 }
 0xaa3   : > { %v7959_v32 = vpop.eup %5549  ;;  %v3148_v50 = vmul.f32 1.442695, %v3125_v14  ;;  %v3128_v14 = vsub.f32 %v7731_v59, %v3107_v39  ;;  %v8026_v59 = vsel %vm1260_vm15, -1e+30, %v7846_v60 }
 0xaa4   : > { %3166 = vadd.xlane.f32.xlu1 %v7959_v32  ;;  %v3109_v20 = vpop.xlane.xlu0 %3108  ;;  %v7971_v58 = vpop.eup %5551 }
 0xaa5   : > { %5553 = vpow2.f32 %v3148_v50  ;;  %v3129_v6 = vsub.f32 %v7799_v34, %v3109_v20  ;;  %v3111_v50 = vpop.xlane.xlu1 %3110  ;;  %v3154_v38 = vmul.f32 1.442695, %v3128_v14 }
 0xaa6   : > { %5555 = vpow2.f32 %v3142_v46  ;;  %v3130_v4 = vsub.f32 %v7793_v19, %v3111_v50 }
 0xaa7   : > { %v3156_v34 = vmul.f32 1.442695, %v3129_v6 }
 0xaa8   : > { %v3105_v49 = vpop.xlane.xlu0 %3104  ;;  %3758 = vmax.xlane.f32.xlu1 %v7966_v25  ;;  %v3158_v17 = vmul.f32 1.442695, %v3130_v4 }
 0xaa9   : > { %v3127_v29 = vsub.f32 %v7805_v5, %v3105_v49  ;;  %v3126_v5 = vsub.f32 %v7738_v40, %v3103_v24  ;;  %v3588_v39 = vpop.permute.xlu1 %3587 }
 0xaab   : > { %v3152_v16 = vmul.f32 1.442695, %v3127_v29  ;;  %v3150_v8 = vmul.f32 1.442695, %v3126_v5 }
 0xaac   : > { %v3117_v21 = vpop.xlane.xlu0 %3116  ;;  %3170 = vadd.xlane.f32.xlu1 %v7971_v58 }
 0xaad   : > { %5557 = vpow2.f32 %v3152_v16  ;;  %v3133_v40 = vsub.f32 %v7817_v28, %v3117_v21  ;;  %v8618_v16 = vld [vmem:[#allocation64_spill] sm:$0xff] }
 0xaae   : > { %5559 = vpow2.f32 %v3146_v0  ;;  %v3724_v21 = vadd.f32 %v8618_v16, %v3588_v39 }
 0xaaf   : > { %v7975_v33 = vpop.eup %5553  ;;  %5561 = vpow2.f32 %v3156_v34  ;;  %v3164_v28 = vmul.f32 1.442695, %v3133_v40 }
 0xab0   : > { %v3113_v12 = vpop.xlane.xlu0 %3112  ;;  %3762 = vmax.xlane.f32.xlu1 %v7982_v1  ;;  %3180 = vadd.xlane.f32.xlu0 %v7975_v33  ;;  %v7988_v2 = vpop.eup %5555  ;;  %5563 = vpow2.f32 %v3150_v8  ;;  %v8043_v24 = vsel %vm1262_vm13, -1e+30, %v3724_v21 }
 0xab1   : > { %v3131_v44 = vsub.f32 %v7825_v7, %v3113_v12  ;;  %v8617_v7 = vld [vmem:[#allocation65_spill] sm:$0xff] }
 0xab3   : > { %v3160_v42 = vmul.f32 1.442695, %v3131_v44 }
 0xab4   : > { %v3592_v53 = vpop.permute.xlu0 %3591  ;;  %3174 = vadd.xlane.f32.xlu1 %v7988_v2  ;;  %3772 = vmax.xlane.f32.xlu0 %v7993_v45 }
 0xab5   : > { %v3727_v26 = vadd.f32 %v8617_v7, %v3592_v53  ;;  %5565 = vpow2.f32 %v3160_v42 }
 0xab6   : > { %5567 = vpow2.f32 %v3164_v28 }
 0xab7   : > { %v7998_v23 = vpop.eup %5557  ;;  %v8015_v46 = vsel %vm1263_vm14, -1e+30, %v3727_v26  ;;  %5569 = vpow2.f32 %v3154_v38 }
 0xab8   : > { %3766 = vmax.xlane.f32.xlu1 %v8005_v57  ;;  %3184 = vadd.xlane.f32.xlu0 %v7998_v23  ;;  %v8010_v20 = vpop.eup %5559  ;;  %5571 = vpow2.f32 %v3158_v17 }
 0xab9   : > { %v8020_v49 = vpop.eup %5561  ;;  %5573 = vpow2.f32 %v3162_v55 }
 0xaba   : > { %v8031_v29 = vpop.eup %5563 }
 0xabc   : > { %3178 = vadd.xlane.f32.xlu1 %v8010_v20  ;;  %3776 = vmax.xlane.f32.xlu0 %v8015_v46 }
 0xabf   : > { %v8033_v19 = vpop.eup %5565 }
 0xac0   : > { %3770 = vmax.xlane.f32.xlu1 %v8026_v59  ;;  %3188 = vadd.xlane.f32.xlu0 %v8020_v49  ;;  %v8038_v60 = vpop.eup %5567 }
 0xac1   : > { %v8047_v54 = vpop.eup %5569 }
 0xac2   : > { %v8050_v0 = vpop.eup %5571 }
 0xac3   : > { %v8053_v6 = vpop.eup %5573 }
 0xac4   : > { %3192 = vadd.xlane.f32.xlu0 %v8033_v19  ;;  %3182 = vadd.xlane.f32.xlu1 %v8031_v29 }
 0xac8   : > { %3196 = vadd.xlane.f32.xlu0 %v8038_v60  ;;  %3774 = vmax.xlane.f32.xlu1 %v8043_v24 }
 0xacc   : > { %3186 = vadd.xlane.f32.xlu1 %v8047_v54 }
 0xad0   : > { %3190 = vadd.xlane.f32.xlu1 %v8050_v0 }
 0xad4   : > { %3194 = vadd.xlane.f32.xlu1 %v8053_v6 }
 0xad8   : > { %v2527_v52 = vpop.xlane.xlu1 %2526 }
 0xadc   : > { %v3747_v30 = vpop.xlane.xlu1 %3746 }
 0xadd   : > { %v3778_v47 = vsub.f32 %v7863_v31, %v3747_v30 }
 0xadf   : > { %v3794_v48 = vmul.f32 1.442695, %v3778_v47 }
 0xae0   : > { %v2531_v5 = vpop.xlane.xlu1 %2530 }
 0xae1   : > { %5575 = vpow2.f32 %v3794_v48 }
 0xae2   : > { %5577 = vrcp.f32 %v2527_v52 }
 0xae4   : > { %v3751_v12 = vpop.xlane.xlu1 %3750 }
 0xae5   : > { %v3780_v34 = vsub.f32 %v7877_v22, %v3751_v12  ;;  %v2529_v44 = vpop.xlane.xlu0 %2528 }
 0xae6   : > { %5579 = vrcp.f32 %v2529_v44 }
 0xae7   : > { %v3798_v8 = vmul.f32 1.442695, %v3780_v34 }
 0xae8   : > { %v2535_v53 = vpop.xlane.xlu1 %2534 }
 0xae9   : > { %5581 = vpow2.f32 %v3798_v8  ;;  %v3749_v40 = vpop.xlane.xlu0 %3748 }
 0xaea   : > { %v3779_v42 = vsub.f32 %v7891_v3, %v3749_v40  ;;  %5583 = vrcp.f32 %v2531_v5  ;;  %v8619_v40 = vld [vmem:[#allocation37_spill] sm:$0xff] }
 0xaeb   : > { %v8059_v27 = vpop.eup %5575 }
 0xaec   : > { %v3796_v7 = vmul.f32 1.442695, %v3779_v42  ;;  %3826 = vadd.xlane.f32.xlu1 %v8059_v27  ;;  %v3755_v31 = vpop.xlane.xlu1 %3754  ;;  %v5578_v28 = vpop.eup %5577  ;;  %v8620_v42 = vld [vmem:[#allocation35_spill] sm:$0xff] }
 0xaed   : > { %v3782_v26 = vsub.f32 %v7897_v15, %v3755_v31  ;;  %v2533_v14 = vpop.xlane.xlu0 %2532  ;;  %v2564_v4 = vmul.f32 %v5578_v28, %v7854_v51  ;;  %v8622_v31 = vld [vmem:[#allocation43_spill] sm:$0xff] }
 0xaee   : > { %5585 = vpow2.f32 %v3796_v7  ;;  %v8621_v7 = vpack.c.bf16 %v8619_v40, %v8620_v42 }
 0xaef   : > { %v3802_v22 = vmul.f32 1.442695, %v3782_v26  ;;  %5587 = vrcp.f32 %v2533_v14  ;;  %v8623_v26 = vld [vmem:[#allocation39_spill] sm:$0xff] }
 0xaf0   : > { %v5580_v50 = vpop.eup %5579  ;;  %v8624_v14 = vpack.c.bf16 %v8622_v31, %v8623_v26 }
 0xaf1   : > { %5589 = vpow2.f32 %v3802_v22  ;;  %v3753_v38 = vpop.xlane.xlu0 %3752  ;;  %v2565_v3 = vmul.f32 %v5580_v50, %v7879_v62 }
 0xaf2   : > { %v3781_v39 = vsub.f32 %v7908_v61, %v3753_v38  ;;  %5591 = vrcp.f32 %v2535_v53 }
 0xaf3   : > { %v8066_v56 = vpop.eup %5581  ;;  %v2575_v17 = vpack.c.bf16 %v2565_v3, %v2564_v4 }
 0xaf4   : > { %v3800_v16 = vmul.f32 1.442695, %v3781_v39  ;;  %3830 = vadd.xlane.f32.xlu1 %v8066_v56  ;;  %v5584_v21 = vpop.eup %5583 }
 0xaf5   : > { %v2537_v15 = vpop.xlane.xlu0 %2536  ;;  %5066 = vmatprep.subr.bf16.mxu1 %v2575_v17  ;;  %v2566_v61 = vmul.f32 %v5584_v21, %v7868_v9 }
 0xaf6   : > { %5593 = vpow2.f32 %v3800_v16  ;;  %5067 = vmatpush3.bf16.xpose.msra.mxu1 %v2575_v17 }
 0xaf7   : > { %5595 = vrcp.f32 %v2537_v15 }
 0xaf8   : > { %v8069_v55 = vpop.eup %5585 }
 0xaf9   : > { %v5588_v51 = vpop.eup %5587  ;;  %v3757_v52 = vpop.xlane.xlu0 %3756  ;;  %3828 = vadd.xlane.f32.xlu0 %v8069_v55 }
 0xafa   : > { %v3783_v62 = vsub.f32 %v7919_v43, %v3757_v52  ;;  %v2567_v30 = vmul.f32 %v5588_v51, %v7899_v41 }
 0xafb   : > { %v8075_v47 = vpop.eup %5589 }
 0xafc   : > { %v3804_v48 = vmul.f32 1.442695, %v3783_v62  ;;  %3834 = vadd.xlane.f32.xlu1 %v8075_v47  ;;  %v2576_v5 = vpack.c.bf16 %v2567_v30, %v2566_v61  ;;  %v5592_v12 = vpop.eup %5591 }
 0xafd   : > { %v2568_v43 = vmul.f32 %v5592_v12, %v7884_v63 }
 0xafe   : > { %5597 = vpow2.f32 %v3804_v48  ;;  %5068 = vmatprep.subr.bf16.mxu1 %v2576_v5 }
 0xaff   : > { %5069 = vmatpush3.bf16.xpose.msra.mxu1 %v2576_v5 }
 0xb00   : > { %v8078_v34 = vpop.eup %5593 }
 0xb01   : > { %v5596_v44 = vpop.eup %5595  ;;  %3832 = vadd.xlane.f32.xlu0 %v8078_v34 }
 0xb02   : > { %v2569_v9 = vmul.f32 %v5596_v44, %v7911_v11 }
 0xb04   : > { %v2577_v41 = vpack.c.bf16 %v2569_v9, %v2568_v43 }
 0xb06   : > { %5070 = vmatprep.subr.bf16.mxu1 %v2577_v41 }
 0xb07   : > { %5071 = vmatpush3.bf16.xpose.msra.mxu1 %v2577_v41 }
 0xb08   : > { %v8083_v8 = vpop.eup %5597 }
 0xb09   : > { %3836 = vadd.xlane.f32.xlu0 %v8083_v8 }
 0xb0b   : > { %v3169_v53 = vpop.xlane.xlu0 %3168 }
 0xb0e   : > { %5073 = vmatmul.mubr.bf16.vlgmr.msra.gmra.mrb[64].mxu1 %v8621_v7 }
 0xb0f   : > { %5132 = vmatprep.mubr.bf16.mxu1 %v8624_v14  ;;  %v3761_v28 = vpop.xlane.xlu0 %3760 }
 0xb10   : > { %v3785_v63 = vsub.f32 %v7932_v36, %v3761_v28 }
 0xb12   : > { %v3808_v11 = vmul.f32 1.442695, %v3785_v63 }
 0xb13   : > { %v3173_v22 = vpop.xlane.xlu0 %3172 }
 0xb14   : > { %5599 = vpow2.f32 %v3808_v11 }
 0xb17   : > { %v3765_v50 = vpop.xlane.xlu0 %3764 }
 0xb18   : > { %v3787_v38 = vsub.f32 %v7942_v35, %v3765_v50 }
 0xb1a   : > { %v3812_v4 = vmul.f32 1.442695, %v3787_v38 }
 0xb1b   : > { %v3177_v3 = vpop.xlane.xlu0 %3176 }
 0xb1c   : > { %5601 = vpow2.f32 %v3812_v4 }
 0xb1e   : > { %v8094_v39 = vpop.eup %5599 }
 0xb1f   : > { %3840 = vadd.xlane.f32.xlu0 %v8094_v39  ;;  %v3769_v17 = vpop.xlane.xlu0 %3768 }
 0xb20   : > { %v3789_v16 = vsub.f32 %v7952_v18, %v3769_v17 }
 0xb22   : > { %v3816_v15 = vmul.f32 1.442695, %v3789_v16 }
 0xb24   : > { %5603 = vpow2.f32 %v3816_v15 }
 0xb25   : > { %5605 = vrcp.f32 %v3169_v53 }
 0xb26   : > { %v8098_v21 = vpop.eup %5601 }
 0xb27   : > { %3844 = vadd.xlane.f32.xlu0 %v8098_v21 }
 0xb2e   : > { %v8101_v36 = vpop.eup %5603 }
 0xb2f   : > { %3848 = vadd.xlane.f32.xlu0 %v8101_v36  ;;  %v5606_v18 = vpop.eup %5605 }
 0xb30   : > { %v3215_v44 = vmul.f32 %v5606_v18, %v7925_v37 }
 0xb31   : > { %v3167_v35 = vpop.xlane.xlu1 %3166 }
 0xb32   : > { %5607 = vrcp.f32 %v3167_v35 }
 0xb33   : > { %5609 = vrcp.f32 %v3173_v22 }
 0xb35   : > { %v3759_v51 = vpop.xlane.xlu1 %3758 }
 0xb36   : > { %v3784_v52 = vsub.f32 %v7966_v25, %v3759_v51 }
 0xb38   : > { %v3806_v62 = vmul.f32 1.442695, %v3784_v52 }
 0xb39   : > { %v3171_v61 = vpop.xlane.xlu1 %3170 }
 0xb3a   : > { %5611 = vpow2.f32 %v3806_v62 }
 0xb3b   : > { %5613 = vrcp.f32 %v3171_v61 }
 0xb3c   : > { %v5608_v30 = vpop.eup %5607  ;;  %5615 = vrcp.f32 %v3177_v3 }
 0xb3d   : > { %v3181_v48 = vpop.xlane.xlu0 %3180  ;;  %v3763_v5 = vpop.xlane.xlu1 %3762  ;;  %v3214_v12 = vmul.f32 %v5608_v30, %v7959_v32 }
 0xb3e   : > { %v3786_v43 = vsub.f32 %v7982_v1, %v3763_v5  ;;  %v5610_v42 = vpop.eup %5609 }
 0xb3f   : > { %v3230_v9 = vpack.c.bf16 %v3215_v44, %v3214_v12  ;;  %v3217_v28 = vmul.f32 %v5610_v42, %v7935_v10 }
 0xb40   : > { %v3810_v41 = vmul.f32 1.442695, %v3786_v43 }
 0xb41   : > { %v3773_v53 = vpop.xlane.xlu0 %3772  ;;  %5116 = vmatprep.subr.bf16.mxu1 %v3230_v9  ;;  %v3175_v25 = vpop.xlane.xlu1 %3174 }
 0xb42   : > { %5617 = vpow2.f32 %v3810_v41  ;;  %v3791_v40 = vsub.f32 %v7993_v45, %v3773_v53  ;;  %5117 = vmatpush3.bf16.xpose.msra.mxu1 %v3230_v9 }
 0xb43   : > { %5619 = vrcp.f32 %v3175_v25 }
 0xb44   : > { %v8109_v7 = vpop.eup %5611  ;;  %v3820_v31 = vmul.f32 1.442695, %v3791_v40 }
 0xb45   : > { %v5614_v32 = vpop.eup %5613  ;;  %v3185_v26 = vpop.xlane.xlu0 %3184  ;;  %3838 = vadd.xlane.f32.xlu1 %v8109_v7 }
 0xb46   : > { %v3767_v37 = vpop.xlane.xlu1 %3766  ;;  %5621 = vpow2.f32 %v3820_v31  ;;  %v3216_v14 = vmul.f32 %v5614_v32, %v7971_v58  ;;  %v5616_v38 = vpop.eup %5615 }
 0xb47   : > { %v3788_v1 = vsub.f32 %v8005_v57, %v3767_v37  ;;  %5623 = vrcp.f32 %v3181_v48  ;;  %v3219_v16 = vmul.f32 %v5616_v38, %v7945_v13 }
 0xb48   : > { %v3231_v45 = vpack.c.bf16 %v3217_v28, %v3216_v14 }
 0xb49   : > { %v3814_v63 = vmul.f32 1.442695, %v3788_v1  ;;  %v3777_v11 = vpop.xlane.xlu0 %3776 }
 0xb4a   : > { %v3179_v22 = vpop.xlane.xlu1 %3178  ;;  %v3793_v50 = vsub.f32 %v8015_v46, %v3777_v11  ;;  %5118 = vmatprep.subr.bf16.mxu1 %v3231_v45 }
 0xb4b   : > { %5625 = vpow2.f32 %v3814_v63  ;;  %5119 = vmatpush3.bf16.xpose.msra.mxu1 %v3231_v45 }
 0xb4c   : > { %5627 = vrcp.f32 %v3179_v22  ;;  %v8116_v4 = vpop.eup %5617  ;;  %v3824_v3 = vmul.f32 1.442695, %v3793_v50  ;;  %v3992_v22 = vld [vmem:[#allocation16 + $0x8] sm:$0xff] }
 0xb4d   : > { %v5620_v57 = vpop.eup %5619  ;;  %3842 = vadd.xlane.f32.xlu1 %v8116_v4  ;;  %v3189_v62 = vpop.xlane.xlu0 %3188 }
 0xb4e   : > { %v3771_v58 = vpop.xlane.xlu1 %3770  ;;  %5629 = vpow2.f32 %v3824_v3  ;;  %v3218_v17 = vmul.f32 %v5620_v57, %v7988_v2  ;;  %v3995_v3 = vld [vmem:[#allocation16 + $0x20] sm:$0xff] }
 0xb4f   : > { %v3790_v10 = vsub.f32 %v8026_v59, %v3771_v58  ;;  %5631 = vrcp.f32 %v3185_v26  ;;  %v3991_v57 = vld [vmem:[#allocation16] sm:$0xff] }
 0xb50   : > { %v8122_v15 = vpop.eup %5621  ;;  %v3232_v35 = vpack.c.bf16 %v3219_v16, %v3218_v17  ;;  %v3999_v58 = vld [vmem:[#allocation16 + $0x40] sm:$0xff]  ;;  %v4001_v17 = vld [vmem:[#allocation16 + $0x50] sm:$0xff] }
 0xb51   : > { %v3818_v46 = vmul.f32 1.442695, %v3790_v10  ;;  %3852 = vadd.xlane.f32.xlu0 %v8122_v15  ;;  %v5624_v52 = vpop.eup %5623  ;;  %v3193_v44 = vpop.xlane.xlu0 %3192  ;;  %v3994_v10 = vld [vmem:[#allocation16 + $0x18] sm:$0xff]  ;;  %v4003_v16 = vld [vmem:[#allocation16 + $0x60] sm:$0xff] }
 0xb52   : > { %v3183_v51 = vpop.xlane.xlu1 %3182  ;;  %5120 = vmatprep.subr.bf16.mxu1 %v3232_v35  ;;  %v3221_v30 = vmul.f32 %v5624_v52, %v7975_v33  ;;  %v3998_v52 = vld [vmem:[#allocation16 + $0x38] sm:$0xff] }
 0xb53   : > { %5633 = vpow2.f32 %v3818_v46  ;;  %5121 = vmatpush3.bf16.xpose.msra.mxu1 %v3232_v35  ;;  %v8625_v46 = vld [vmem:[#allocation41_spill] sm:$0xff]  ;;  %v8626_v35 = vld [vmem:[#allocation34_spill] sm:$0xff] }
 0xb54   : > { %5635 = vrcp.f32 %v3183_v51  ;;  %v8627_v51 = vpack.c.bf16 %v8625_v46, %v8626_v35 }
 0xb55   : > { %v8125_v61 = vpop.eup %5625  ;;  %5637 = vrcp.f32 %v3189_v62  ;;  %v3197_v25 = vpop.xlane.xlu0 %3196  ;;  %v8628_v62 = vld [vmem:[#allocation38_spill] sm:$0xff] }
 0xb56   : > { %v5628_v59 = vpop.eup %5627  ;;  %3846 = vadd.xlane.f32.xlu1 %v8125_v61  ;;  %v3775_v13 = vpop.xlane.xlu1 %3774 }
 0xb57   : > { %v3792_v2 = vsub.f32 %v8043_v24, %v3775_v13  ;;  %v3220_v18 = vmul.f32 %v5628_v59, %v8010_v20  ;;  %v8629_v59 = vld [vmem:[#allocation47_spill] sm:$0xff] }
 0xb58   : > { %v8131_v48 = vpop.eup %5629  ;;  %v8630_v13 = vpack.c.bf16 %v8628_v62, %v8629_v59 }
 0xb59   : > { %v3822_v5 = vmul.f32 1.442695, %v3792_v2  ;;  %v3233_v12 = vpack.c.bf16 %v3221_v30, %v3220_v18  ;;  %3856 = vadd.xlane.f32.xlu0 %v8131_v48  ;;  %v5632_v9 = vpop.eup %5631  ;;  %v4005_v2 = vld [vmem:[#allocation16 + $0x70] sm:$0xff]  ;;  %v4000_v30 = vld [vmem:[#allocation16 + $0x48] sm:$0xff] }
 0xb5a   : > { %v3187_v43 = vpop.xlane.xlu1 %3186  ;;  %v3223_v53 = vmul.f32 %v5632_v9, %v7998_v23  ;;  %v4004_v9 = vld [vmem:[#allocation16 + $0x68] sm:$0xff] }
 0xb5b   : > { %5639 = vpow2.f32 %v3822_v5  ;;  %5122 = vmatprep.subr.bf16.mxu1 %v3233_v12 }
 0xb5c   : > { %5641 = vrcp.f32 %v3187_v43  ;;  %5123 = vmatpush3.bf16.xpose.msra.mxu1 %v3233_v12  ;;  %v4002_v12 = vld [vmem:[#allocation16 + $0x58] sm:$0xff] }
 0xb5d   : > { %v8134_v41 = vpop.eup %5633  ;;  %5643 = vrcp.f32 %v3193_v44 }
 0xb5e   : > { %3850 = vadd.xlane.f32.xlu1 %v8134_v41  ;;  %v3191_v33 = vpop.xlane.xlu1 %3190  ;;  %v5636_v20 = vpop.eup %5635 }
 0xb5f   : > { %5645 = vrcp.f32 %v3191_v33  ;;  %v3222_v24 = vmul.f32 %v5636_v20, %v8031_v29  ;;  %v5638_v31 = vpop.eup %5637 }
 0xb60   : > { %v3225_v29 = vmul.f32 %v5638_v31, %v8020_v49 }
 0xb61   : > { %v3234_v40 = vpack.c.bf16 %v3223_v53, %v3222_v24 }
 0xb62   : > { %v3195_v42 = vpop.xlane.xlu1 %3194 }
 0xb63   : > { %5647 = vrcp.f32 %v3195_v42  ;;  %5124 = vmatprep.subr.bf16.mxu1 %v3234_v40 }
 0xb64   : > { %5649 = vrcp.f32 %v3197_v25  ;;  %5125 = vmatpush3.bf16.xpose.msra.mxu1 %v3234_v40  ;;  %v4006_v25 = vld [vmem:[#allocation16 + $0x78] sm:$0xff] }
 0xb65   : > { %v8139_v32 = vpop.eup %5639 }
 0xb66   : > { %v5642_v26 = vpop.eup %5641  ;;  %3854 = vadd.xlane.f32.xlu1 %v8139_v32 }
 0xb67   : > { %v5644_v37 = vpop.eup %5643  ;;  %v3224_v1 = vmul.f32 %v5642_v26, %v8047_v54 }
 0xb68   : > { %v3227_v63 = vmul.f32 %v5644_v37, %v8033_v19  ;;  %v3993_v19 = vld [vmem:[#allocation16 + $0x10] sm:$0xff] }
 0xb69   : > { %v5646_v14 = vpop.eup %5645  ;;  %v3235_v23 = vpack.c.bf16 %v3225_v29, %v3224_v1 }
 0xb6a   : > { %v3226_v28 = vmul.f32 %v5646_v14, %v8050_v0  ;;  %v3997_v0 = vld [vmem:[#allocation16 + $0x30] sm:$0xff] }
 0xb6b   : > { %5126 = vmatprep.subr.bf16.mxu1 %v3235_v23 }
 0xb6c   : > { %v3236_v45 = vpack.c.bf16 %v3227_v63, %v3226_v28  ;;  %5127 = vmatpush3.bf16.xpose.msra.mxu1 %v3235_v23 }
 0xb6d   : > { %v5648_v11 = vpop.eup %5647 }
 0xb6e   : > { %5128 = vmatprep.subr.bf16.mxu1 %v3236_v45  ;;  %v5650_v50 = vpop.eup %5649  ;;  %v3228_v38 = vmul.f32 %v5648_v11, %v8053_v6  ;;  %v3996_v6 = vld [vmem:[#allocation16 + $0x28] sm:$0xff] }
 0xb6f   : > { %4014 = vperm.xlu0 %5377, %v3992_v22   ;;  %v3229_v54 = vmul.f32 %v5650_v50, %v8038_v60 }
 0xb71   : > { %v3237_v49 = vpack.c.bf16 %v3229_v54, %v3228_v38 }
 0xb73   : > { %4029 = vperm.xlu0 %5377, %v3995_v3  }
 0xb74   : > { %5129 = vmatpush3.bf16.xpose.msra.mxu1 %v3236_v45 }
 0xb75   : > { %5130 = vmatprep.subr.bf16.mxu1 %v3237_v49 }
 0xb77   : > { %4009 = vperm.xlu1 %5378, %v3991_v57   ;;  %4039 = vperm.xlu0 %5377, %v3997_v0  }
 0xb79   : > { %v3827_v60 = vpop.xlane.xlu1 %3826 }
 0xb7a   : > { %5651 = vrcp.f32 %v3827_v60 }
 0xb7b   : > { %4019 = vperm.xlu1 %5378, %v3993_v19   ;;  %4049 = vperm.xlu0 %5377, %v3999_v58  }
 0xb7c   : > { %5131 = vmatpush3.bf16.xpose.msra.mxu1 %v3237_v49 }
 0xb7f   : > { %4024 = vperm.xlu1 %5378, %v3994_v10   ;;  %4059 = vperm.xlu0 %5377, %v4001_v17  }
 0xb81   : > { %v3831_v5 = vpop.xlane.xlu1 %3830 }
 0xb83   : > { %4034 = vperm.xlu1 %5378, %v3996_v6   ;;  %5133 = vmatmul.mubr.bf16.vlgmr.msra.gmra.mrb[68].mxu1 %v8627_v51 }
 0xb84   : > { %4069 = vperm.xlu0 %5377, %v4003_v16   ;;  %5192 = vmatprep.mubr.bf16.mxu1 %v8630_v13  ;;  %v5652_v43 = vpop.eup %5651 }
 0xb85   : > { %v3874_v24 = vmul.f32 %v5652_v43, %v8059_v27  ;;  %v8631_v43 = vld [vmem:[#allocation36_spill] sm:$0xff] }
 0xb86   : > { %v3829_v18 = vpop.xlane.xlu0 %3828 }
 0xb87   : > { %4044 = vperm.xlu1 %5378, %v3998_v52   ;;  %5653 = vrcp.f32 %v3829_v18 }
 0xb88   : > { %4079 = vperm.xlu0 %5377, %v4005_v2   ;;  %5655 = vrcp.f32 %v3831_v5 }
 0xb89   : > { %v3835_v20 = vpop.xlane.xlu1 %3834 }
 0xb8b   : > { %4054 = vperm.xlu1 %5378, %v4000_v30  }
 0xb8e   : > { %v3833_v44 = vpop.xlane.xlu0 %3832 }
 0xb8f   : > { %4064 = vperm.xlu1 %5378, %v4002_v12   ;;  %5657 = vrcp.f32 %v3833_v44 }
 0xb90   : > { %5659 = vrcp.f32 %v3835_v20 }
 0xb91   : > { %v5654_v33 = vpop.eup %5653 }
 0xb92   : > { %v3875_v53 = vmul.f32 %v5654_v33, %v8069_v55  ;;  %v5656_v31 = vpop.eup %5655 }
 0xb93   : > { %4074 = vperm.xlu1 %5378, %v4004_v9   ;;  %v3876_v37 = vmul.f32 %v5656_v31, %v8066_v56  ;;  %v8632_v9 = vld [vmem:[#allocation45_spill] sm:$0xff] }
 0xb94   : > { %v3890_v40 = vpack.c.bf16 %v3875_v53, %v3874_v24  ;;  %v8633_v33 = vpack.c.bf16 %v8631_v43, %v8632_v9 }
 0xb96   : > { %v3837_v42 = vpop.xlane.xlu0 %3836  ;;  %5176 = vmatprep.subr.bf16.mxu1 %v3890_v40 }
 0xb97   : > { %4084 = vperm.xlu1 %5378, %v4006_v25   ;;  %5661 = vrcp.f32 %v3837_v42  ;;  %5177 = vmatpush3.bf16.xpose.msra.mxu1 %v3890_v40 }
 0xb99   : > { %v5658_v26 = vpop.eup %5657 }
 0xb9a   : > { %v3877_v1 = vmul.f32 %v5658_v26, %v8078_v34  ;;  %v5660_v14 = vpop.eup %5659 }
 0xb9b   : > { %v3878_v55 = vmul.f32 %v5660_v14, %v8075_v47  ;;  %v5422_v14 = vld [vmem:[#allocation15 + $0x18] sm:$0xff]  }
 0xb9c   : > { %v3891_v29 = vpack.c.bf16 %v3877_v1, %v3876_v37  ;;  %v5420_v1 = vld [vmem:[#allocation15 + $0x8] sm:$0xff]  }
 0xb9e   : > { %5178 = vmatprep.subr.bf16.mxu1 %v3891_v29 }
 0xb9f   : > { %5179 = vmatpush3.bf16.xpose.msra.mxu1 %v3891_v29  ;;  %v5421_v29 = vld [vmem:[#allocation15 + $0x10] sm:$0xff]  }
 0xba1   : > { %v5662_v27 = vpop.eup %5661 }
 0xba2   : > { %v3879_v23 = vmul.f32 %v5662_v27, %v8083_v8  ;;  %v5423_v27 = vld [vmem:[#allocation15 + $0x20] sm:$0xff]  }
 0xba4   : > { %v3892_v28 = vpack.c.bf16 %v3879_v23, %v3878_v55  ;;  %v5424_v55 = vld [vmem:[#allocation15 + $0x28] sm:$0xff]   ;;  %v5425_v23 = vld [vmem:[#allocation15 + $0x30] sm:$0xff]  }
 0xba6   : > { %5180 = vmatprep.subr.bf16.mxu1 %v3892_v28 }
 0xba7   : > { %5181 = vmatpush3.bf16.xpose.msra.mxu1 %v3892_v28  ;;  %v5426_v28 = vld [vmem:[#allocation15 + $0x38] sm:$0xff]  }
 0xbac   : > { %v3841_v63 = vpop.xlane.xlu0 %3840 }
 0xbad   : > { %5663 = vrcp.f32 %v3841_v63 }
 0xbb4   : > { %v3845_v11 = vpop.xlane.xlu0 %3844 }
 0xbb7   : > { %v5664_v34 = vpop.eup %5663 }
 0xbb8   : > { %v3881_v47 = vmul.f32 %v5664_v34, %v8094_v39 }
 0xbbc   : > { %v3849_v50 = vpop.xlane.xlu0 %3848 }
 0xbd2   : > { %v3839_v45 = vpop.xlane.xlu1 %3838 }
 0xbd3   : > { %5665 = vrcp.f32 %v3839_v45 }
 0xbd4   : > { %5667 = vrcp.f32 %v3845_v11 }
 0xbda   : > { %v3843_v56 = vpop.xlane.xlu1 %3842 }
 0xbdb   : > { %5669 = vrcp.f32 %v3843_v56 }
 0xbdc   : > { %5671 = vrcp.f32 %v3849_v50 }
 0xbdd   : > { %v5666_v22 = vpop.eup %5665 }
 0xbde   : > { %v3880_v38 = vmul.f32 %v5666_v22, %v8109_v7  ;;  %v5668_v57 = vpop.eup %5667  ;;  %v3853_v6 = vpop.xlane.xlu0 %3852 }
 0xbdf   : > { %v3883_v7 = vmul.f32 %v5668_v57, %v8098_v21 }
 0xbe0   : > { %v3893_v3 = vpack.c.bf16 %v3881_v47, %v3880_v38 }
 0xbe1   : > { %v5074_v8 = vpop.f32.mrb[64].mxu1 }
 0xbe2   : > { %v2612_v54 = vpop.f32.mrb[65].mxu1  ;;  %5182 = vmatprep.subr.bf16.mxu1 %v3893_v3 }
 0xbe3   : > { %v3847_v49 = vpop.xlane.xlu1 %3846  ;;  %v5075_v0 = vpop.f32.mrb[66].mxu1  ;;  %5183 = vmatpush3.bf16.xpose.msra.mxu1 %v3893_v3 }
 0xbe4   : > { %5673 = vrcp.f32 %v3847_v49  ;;  %v3986_v19 = vpack.c.bf16 %v5075_v0, %v5074_v8  ;;  %v2615_v58 = vpop.f32.mrb[67].mxu1 }
 0xbe5   : > { %v5670_v10 = vpop.eup %5669  ;;  %v3985_v17 = vpack.c.bf16 %v2615_v58, %v2612_v54  ;;  %5675 = vrcp.f32 %v3853_v6 }
 0xbe6   : > { %v3882_v16 = vmul.f32 %v5670_v10, %v8116_v4  ;;  %v5672_v46 = vpop.eup %5671  ;;  %v3857_v51 = vpop.xlane.xlu0 %3856 }
 0xbe7   : > { %5200 = vmatprep.subr.bf16.mxu0 %v3985_v17  ;;  %v3885_v62 = vmul.f32 %v5672_v46, %v8101_v36 }
 0xbe8   : > { %5201 = vmatpush3.bf16.msra.mxu0 %v3985_v17  ;;  %v3894_v39 = vpack.c.bf16 %v3883_v7, %v3882_v16  ;;  %v5686_v17 = vld [vmem:[%s6465_s0 + $0x8] sm:$0xff]  ;;  %v5687_v16 = vld [vmem:[%s6465_s0 + $0x10] sm:$0xff] }
 0xbe9   : > { %5202 = vmatprep.subr.bf16.mxu0 %v3986_v19 }
 0xbea   : > { %5184 = vmatprep.subr.bf16.mxu1 %v3894_v39 }
 0xbeb   : > { %v3851_v60 = vpop.xlane.xlu1 %3850  ;;  %5185 = vmatpush3.bf16.xpose.msra.mxu1 %v3894_v39 }
 0xbec   : > { %5677 = vrcp.f32 %v3851_v60  ;;  %5203 = vmatpush3.bf16.msra.mxu0 %v3986_v19  ;;  %v5685_v19 = vld [vmem:[%s6465_s0] sm:$0xff] }
 0xbed   : > { %5679 = vrcp.f32 %v3857_v51  ;;  %v5688_v51 = vld [vmem:[%s6465_s0 + $0x18] sm:$0xff] }
 0xbee   : > { %v5674_v35 = vpop.eup %5673  ;;  %v4015_v11 = vpop.permute.xlu0 %4014 }
 0xbef   : > { %v3884_v52 = vmul.f32 %v5674_v35, %v8125_v61  ;;  %v5676_v59 = vpop.eup %5675 }
 0xbf0   : > { %v3887_v18 = vmul.f32 %v5676_v59, %v8122_v15 }
 0xbf1   : > { %v3895_v4 = vpack.c.bf16 %v3885_v62, %v3884_v52 }
 0xbf2   : > { %v4030_v34 = vpop.permute.xlu0 %4029 }
 0xbf3   : > { %5186 = vmatprep.subr.bf16.mxu1 %v3895_v4  ;;  %v3855_v21 = vpop.xlane.xlu1 %3854 }
 0xbf4   : > { %5681 = vrcp.f32 %v3855_v21  ;;  %5187 = vmatpush3.bf16.xpose.msra.mxu1 %v3895_v4 }
 0xbf6   : > { %v5678_v13 = vpop.eup %5677  ;;  %v4040_v8 = vpop.permute.xlu0 %4039 }
 0xbf7   : > { %v3886_v2 = vmul.f32 %v5678_v13, %v8134_v41  ;;  %v5680_v5 = vpop.eup %5679  ;;  %v4010_v63 = vpop.permute.xlu1 %4009 }
 0xbf8   : > { %v3889_v36 = vmul.f32 %v5680_v5, %v8131_v48 }
 0xbf9   : > { %v3896_v30 = vpack.c.bf16 %v3887_v18, %v3886_v2  ;;  %v5689_v18 = vld [vmem:[%s6465_s0 + $0x20] sm:$0xff] }
 0xbfa   : > { %v4050_v46 = vpop.permute.xlu0 %4049 }
 0xbfb   : > { %5188 = vmatprep.subr.bf16.mxu1 %v3896_v30  ;;  %v4020_v45 = vpop.permute.xlu1 %4019 }
 0xbfc   : > { %5189 = vmatpush3.bf16.xpose.msra.mxu1 %v3896_v30 }
 0xbfe   : > { %v5682_v12 = vpop.eup %5681  ;;  %v4060_v9 = vpop.permute.xlu0 %4059 }
 0xbff   : > { %v3888_v61 = vmul.f32 %v5682_v12, %v8139_v32  ;;  %v5419_v32 = vld [vmem:[#allocation15] sm:$0xff]   ;;  %v4025_v56 = vpop.permute.xlu1 %4024 }
 0xc00   : > { %5212 = vmatprep.mubr.bf16.mxu0 %v5419_v32 }
 0xc01   : > { %v3897_v44 = vpack.c.bf16 %v3889_v36, %v3888_v61 }
 0xc03   : > { %5190 = vmatprep.subr.bf16.mxu1 %v3897_v44  ;;  %v4035_v22 = vpop.permute.xlu1 %4034 }
 0xc04   : > { %5191 = vmatpush3.bf16.xpose.msra.mxu1 %v3897_v44  ;;  %v5690_v44 = vld [vmem:[%s6465_s0 + $0x28] sm:$0xff] }
 0xc07   : > { %v4045_v0 = vpop.permute.xlu1 %4044 }
 0xc0b   : > { %5193 = vmatmul.mubr.bf16.vlgmr.msra.gmra.mrb[72].mxu1 %v8633_v33  ;;  %v4055_v59 = vpop.permute.xlu1 %4054  ;;  %v5691_v33 = vld [vmem:[%s6465_s0 + $0x30] sm:$0xff] }
 0xc56   : > { %v5134_v20 = vpop.f32.mrb[68].mxu1 }
 0xc57   : > { %v3272_v41 = vpop.f32.mrb[69].mxu1 }
 0xc58   : > { %v5135_v24 = vpop.f32.mrb[70].mxu1 }
 0xc59   : > { %v3988_v15 = vpack.c.bf16 %v5135_v24, %v5134_v20  ;;  %v3275_v53 = vpop.f32.mrb[71].mxu1 }
 0xc5a   : > { %v3987_v25 = vpack.c.bf16 %v3275_v53, %v3272_v41 }
 0xc5c   : > { %5204 = vmatprep.subr.bf16.mxu0 %v3987_v25 }
 0xc5d   : > { %5205 = vmatpush3.bf16.msra.mxu0 %v3987_v25  ;;  %v5692_v25 = vld [vmem:[%s6465_s0 + $0x38] sm:$0xff] }
 0xc5e   : > { %5206 = vmatprep.subr.bf16.mxu0 %v3988_v15 }
 0xc61   : > { %5207 = vmatpush3.bf16.msra.mxu0 %v3988_v15  ;;  %v4065_v15 = vpop.permute.xlu1 %4064 }
 0xcde   : > { %v5194_v48 = vpop.f32.mrb[72].mxu1 }
 0xcdf   : > { %v3932_v40 = vpop.f32.mrb[73].mxu1 }
 0xce0   : > { %v5195_v42 = vpop.f32.mrb[74].mxu1 }
 0xce1   : > { %v3990_v31 = vpack.c.bf16 %v5195_v42, %v5194_v48  ;;  %v3935_v26 = vpop.f32.mrb[75].mxu1 }
 0xce2   : > { %v3989_v37 = vpack.c.bf16 %v3935_v26, %v3932_v40 }
 0xce4   : > { %5208 = vmatprep.subr.bf16.mxu0 %v3989_v37 }
 0xce5   : > { %5209 = vmatpush3.bf16.msra.mxu0 %v3989_v37  ;;  %v5693_v37 = vld [vmem:[%s6465_s0 + $0x40] sm:$0xff] }
 0xce6   : > { %5210 = vmatprep.subr.bf16.mxu0 %v3990_v31 }
 0xce9   : > { %5211 = vmatpush3.bf16.msra.mxu0 %v3990_v31 }
 0xcec   : > { %5213 = vmatmul.mubr.bf16.vlgmr.msra.gmra.mrb[132].mxu0 %v5420_v1 }
 0xced   : > { %5216 = vmatprep.mubr.bf16.mxu0 %v5421_v29 }
 0xcf4   : > { %5217 = vmatmul.mubr.bf16.gmra.mrb[136].mxu0 %v5422_v14 }
 0xcf5   : > { %5220 = vmatprep.mubr.bf16.mxu0 %v5423_v27  ;;  %v4070_v27 = vpop.permute.xlu0 %4069 }
 0xcfc   : > { %5221 = vmatmul.mubr.bf16.gmra.mrb[140].mxu0 %v5424_v55 }
 0xcfd   : > { %5224 = vmatprep.mubr.bf16.mxu0 %v5425_v23 }
 0xd04   : > { %5225 = vmatmul.mubr.bf16.gmra.mrb[144].mxu0 %v5426_v28  ;;  %v5694_v28 = vld [vmem:[%s6465_s0 + $0x48] sm:$0xff] }
 0xdbf   : > { %v5214_v50 = vpop.f32.mrb[132].mxu0 }
 0xdc0   : > { %v4169_v38 = vpop.f32.mrb[133].mxu0  ;;  %v4178_v49 = vadd.f32 %v5214_v50, %v4020_v45  ;;  %v4075_v45 = vpop.permute.xlu1 %4074 }
 0xdc1   : > { %v4170_v47 = vadd.f32 %v4169_v38, %v4010_v63  ;;  %v5215_v3 = vpop.f32.mrb[134].mxu0  ;;  %v5696_v38 = vld [vmem:[%s6465_s0 + $0x58] sm:$0xff] }
 0xdc2   : > { %v4172_v54 = vpop.f32.mrb[135].mxu0  ;;  %v4181_v10 = vadd.f32 %v5215_v3, %v4025_v56  ;;  %v8180_v7 = vadd.f32 %v5687_v16, %v4178_v49  ;;  %v4080_v49 = vpop.permute.xlu0 %4079 }
 0xdc3   : > { %v4173_v57 = vadd.f32 %v4172_v54, %v4015_v11  ;;  %v8174_v58 = vadd.f32 %v5685_v19, %v4170_v47  ;;  %v5695_v11 = vld [vmem:[%s6465_s0 + $0x50] sm:$0xff]  ;;  %v5697_v19 = vld [vmem:[%s6465_s0 + $0x60] sm:$0xff] }
 0xdc4   : > { %v8185_v52 = vadd.f32 %v5688_v51, %v4181_v10 }
 0xdc5   : > { %v8177_v6 = vadd.f32 %v5686_v17, %v4173_v57 }
 0xdc7   : > { %v4248_v39 = vadd.f32 %v8177_v6, %v8174_v58  ;;  %v5218_v60 = vpop.f32.mrb[136].mxu0 }
 0xdc8   : > { %v4185_v35 = vpop.f32.mrb[137].mxu0  ;;  %v4194_v2 = vadd.f32 %v5218_v60, %v4040_v8 }
 0xdc9   : > { %v4249_v62 = vadd.f32 %v4248_v39, %v8180_v7  ;;  %v4186_v4 = vadd.f32 %v4185_v35, %v4030_v34  ;;  %v5219_v21 = vpop.f32.mrb[138].mxu0  ;;  %v4085_v39 = vpop.permute.xlu1 %4084  ;;  %v5698_v35 = vld [vmem:[%s6465_s0 + $0x68] sm:$0xff] }
 0xdca   : > { %v4188_v13 = vpop.f32.mrb[139].mxu0  ;;  %v4197_v36 = vadd.f32 %v5219_v21, %v4045_v0  ;;  %v8197_v20 = vadd.f32 %v5691_v33, %v4194_v2 }
 0xdcb   : > { %v8189_v30 = vadd.f32 %v5689_v18, %v4186_v4  ;;  %v4250_v5 = vadd.f32 %v4249_v62, %v8185_v52  ;;  %v4189_v12 = vadd.f32 %v4188_v13, %v4035_v22  ;;  %v5699_v62 = vld [vmem:[%s6465_s0 + $0x70] sm:$0xff] }
 0xdcc   : > { %v4239_v32 = vadd.f32 %v5692_v25, %v4197_v36 }
 0xdcd   : > { %v4251_v61 = vadd.f32 %v4250_v5, %v8189_v30  ;;  %v8194_v43 = vadd.f32 %v5690_v44, %v4189_v12 }
 0xdcf   : > { %v4252_v41 = vadd.f32 %v4251_v61, %v8194_v43  ;;  %v5222_v24 = vpop.f32.mrb[140].mxu0 }
 0xdd0   : > { %v4201_v53 = vpop.f32.mrb[141].mxu0  ;;  %v4210_v26 = vadd.f32 %v5222_v24, %v4060_v9 }
 0xdd1   : > { %v4253_v48 = vadd.f32 %v4252_v41, %v8197_v20  ;;  %v4202_v40 = vadd.f32 %v4201_v53, %v4050_v46  ;;  %v5223_v42 = vpop.f32.mrb[142].mxu0 }
 0xdd2   : > { %v4204_v31 = vpop.f32.mrb[143].mxu0  ;;  %v4213_v23 = vadd.f32 %v5223_v42, %v4065_v15  ;;  %v4242_v56 = vadd.f32 %v5695_v11, %v4210_v26 }
 0xdd3   : > { %v4240_v1 = vadd.f32 %v5693_v37, %v4202_v40  ;;  %v4254_v29 = vadd.f32 %v4253_v48, %v4239_v32  ;;  %v4205_v14 = vadd.f32 %v4204_v31, %v4055_v59  ;;  %v5700_v59 = vld [vmem:[%s6465_s0 + $0x78] sm:$0xff]  ;;  %s4373_s0 = sshll.u32 %s8236_s24, 4  ;;  %s8248_s0 = int_to_ptr.vmem [resolvable:$true] %s4373_s0 }
 0xdd4   : > { %v4243_v47 = vadd.f32 %v5696_v38, %v4213_v23  ;;  %s5957_s17 = scalar_lea.vmem %s8248_s0, 2048  ;;  %p5964_p1 = scmp.lt.s32.totalorder %s8248_s0, %s5962_s3 }
 0xdd5   : > { %v4255_v55 = vadd.f32 %v4254_v29, %v4240_v1  ;;  %v4241_v63 = vadd.f32 %v5694_v28, %v4205_v14  ;;  %p5958_p6 = scmp.ne.s32.totalorder %s8248_s0, %s5957_s17  ;;  %p5965_p4 = scmp.lt.s32.totalorder %s5963_s13, %s5957_s17 }
 0xdd7   : > { %v4256_v34 = vadd.f32 %v4255_v55, %v4241_v63  ;;  %v5226_v22 = vpop.f32.mrb[144].mxu0  ;;  %p5959_p7 = pnand %p5958_p6, %p8636_p10  ;;  %p5966_p3 = por %p5965_p4, %p5964_p1 }
 0xdd8   : > { %v4217_v50 = vpop.f32.mrb[145].mxu0  ;;  %v4226_v0 = vadd.f32 %v5226_v22, %v4080_v49 }
 0xdd9   : > { %v4257_v3 = vadd.f32 %v4256_v34, %v4242_v56  ;;  %v4218_v8 = vadd.f32 %v4217_v50, %v4070_v27  ;;  %v5227_v54 = vpop.f32.mrb[146].mxu0  ;;  %p5960_p13 = pneg %p5959_p7 }
 0xdda   : > { %v4220_v57 = vpop.f32.mrb[147].mxu0  ;;  %v4229_v46 = vadd.f32 %v5227_v54, %v4085_v39  ;;  %v4246_v4 = vadd.f32 %v5699_v62, %v4226_v0 }
 0xddb   : > { %v4244_v10 = vadd.f32 %v5697_v19, %v4218_v8  ;;  %v4258_v17 = vadd.f32 %v4257_v3, %v4243_v47  ;;  %v4221_v16 = vadd.f32 %v4220_v57, %v4075_v45  ;;  %p5967_p12 = pnand %p5966_p3, %p5960_p13 }
 0xddc   : > { %v4247_v13 = vadd.f32 %v5700_v59, %v4229_v46 }
 0xddd   : > { %v4259_v60 = vadd.f32 %v4258_v17, %v4244_v10  ;;  %v4245_v51 = vadd.f32 %v5698_v35, %v4221_v16 }
 0xddf   : > { %v4260_v21 = vadd.f32 %v4259_v60, %v4245_v51 }
 0xde1   : > { %v4261_v2 = vadd.f32 %v4260_v21, %v4246_v4 }
 0xde3   : > { %v4262_v18 = vadd.f32 %v4261_v2, %v4247_v13 }
 0xde5   : > { %v4263_v5 = vrot.slane %v4262_v18, 4 }
 0xde7   : > { %v4264_v12 = vadd.f32 %v4263_v5, %v4262_v18 }
 0xde9   : > { %v4265_v61 = vrot.slane %v4264_v12, 2 }
 0xdeb   : > { %v4266_v36 = vadd.f32 %v4265_v61, %v4264_v12 }
 0xded   : > { %v4267_v44 = vrot.slane %v4266_v36, 1 }
 0xdef   : > { %v4268_v9 = vadd.f32 %v4267_v44, %v4266_v36 }
 0xdf1   : > { %v4270_v33 = vmul.f32 0.0078125, %v4268_v9 }
 0xdf3   : > { %v4271_v41 = vsub.f32 %v8174_v58, %v4270_v33  ;;  %v4272_v24 = vsub.f32 %v8177_v6, %v4270_v33  ;;  %v4273_v15 = vsub.f32 %v8180_v7, %v4270_v33  ;;  %v4274_v53 = vsub.f32 %v8185_v52, %v4270_v33 }
 0xdf4   : > { %v4275_v25 = vsub.f32 %v8189_v30, %v4270_v33  ;;  %v4276_v48 = vsub.f32 %v8194_v43, %v4270_v33  ;;  %v4277_v40 = vsub.f32 %v8197_v20, %v4270_v33  ;;  %v4278_v42 = vsub.f32 %v4239_v32, %v4270_v33 }
 0xdf5   : > { %v4279_v31 = vsub.f32 %v4240_v1, %v4270_v33  ;;  %v4280_v26 = vsub.f32 %v4241_v63, %v4270_v33  ;;  %v4281_v37 = vsub.f32 %v4242_v56, %v4270_v33  ;;  %v4282_v29 = vsub.f32 %v4243_v47, %v4270_v33 }
 0xdf6   : > { %v8217_v14 = vsub.f32 %v4244_v10, %v4270_v33  ;;  %v8219_v58 = vsub.f32 %v4245_v51, %v4270_v33  ;;  %v8221_v6 = vsub.f32 %v4246_v4, %v4270_v33  ;;  %v8223_v7 = vsub.f32 %v4247_v13, %v4270_v33 }
 0xdf7   : > { %v4287_v52 = vmul.f32 %v4271_v41, %v4271_v41  ;;  %v4288_v27 = vmul.f32 %v4272_v24, %v4272_v24  ;;  %v4289_v30 = vmul.f32 %v4273_v15, %v4273_v15  ;;  %v4290_v43 = vmul.f32 %v4274_v53, %v4274_v53 }
 0xdf8   : > { %v4291_v20 = vmul.f32 %v4275_v25, %v4275_v25  ;;  %v4292_v1 = vmul.f32 %v4276_v48, %v4276_v48  ;;  %v4293_v63 = vmul.f32 %v4277_v40, %v4277_v40  ;;  %v4294_v11 = vmul.f32 %v4278_v42, %v4278_v42 }
 0xdf9   : > { %v4303_v55 = vadd.f32 %v4288_v27, %v4287_v52  ;;  %v4295_v34 = vmul.f32 %v4279_v31, %v4279_v31  ;;  %v4296_v50 = vmul.f32 %v4280_v26, %v4280_v26  ;;  %v4297_v47 = vmul.f32 %v4281_v37, %v4281_v37 }
 0xdfa   : > { %v4298_v8 = vmul.f32 %v4282_v29, %v4282_v29  ;;  %v4299_v49 = vmul.f32 %v8217_v14, %v8217_v14  ;;  %v4300_v0 = vmul.f32 %v8219_v58, %v8219_v58  ;;  %v4301_v10 = vmul.f32 %v8221_v6, %v8221_v6 }
 0xdfb   : > { %v4304_v23 = vadd.f32 %v4303_v55, %v4289_v30  ;;  %v4302_v16 = vmul.f32 %v8223_v7, %v8223_v7 }
 0xdfd   : > { %v4305_v32 = vadd.f32 %v4304_v23, %v4290_v43 }
 0xdff   : > { %v4306_v28 = vadd.f32 %v4305_v32, %v4291_v20 }
 0xe01   : > { %v4307_v45 = vadd.f32 %v4306_v28, %v4292_v1 }
 0xe03   : > { %v4308_v56 = vadd.f32 %v4307_v45, %v4293_v63 }
 0xe05   : > { %v4309_v22 = vadd.f32 %v4308_v56, %v4294_v11 }
 0xe07   : > { %v4310_v38 = vadd.f32 %v4309_v22, %v4295_v34 }
 0xe09   : > { %v4311_v3 = vadd.f32 %v4310_v38, %v4296_v50 }
 0xe0b   : > { %v4312_v54 = vadd.f32 %v4311_v3, %v4297_v47 }
 0xe0d   : > { %v4313_v57 = vadd.f32 %v4312_v54, %v4298_v8 }
 0xe0f   : > { %v4314_v19 = vadd.f32 %v4313_v57, %v4299_v49 }
 0xe11   : > { %v4315_v17 = vadd.f32 %v4314_v19, %v4300_v0 }
 0xe13   : > { %v4316_v39 = vadd.f32 %v4315_v17, %v4301_v10 }
 0xe15   : > { %v4317_v60 = vadd.f32 %v4316_v39, %v4302_v16 }
 0xe17   : > { %v4318_v46 = vrot.slane %v4317_v60, 4 }
 0xe19   : > { %v4319_v35 = vadd.f32 %v4318_v46, %v4317_v60 }
 0xe1b   : > { %v4320_v51 = vrot.slane %v4319_v35, 2 }
 0xe1d   : > { %v4321_v62 = vadd.f32 %v4320_v51, %v4319_v35 }
 0xe1f   : > { %v4322_v4 = vrot.slane %v4321_v62, 1 }
 0xe21   : > { %v4323_v21 = vadd.f32 %v4322_v4, %v4321_v62 }
 0xe23   : > { %v4324_v59 = vmul.f32 0.0078125, %v4323_v21 }
 0xe25   : > { %v4325_v13 = vadd.f32 1e-05, %v4324_v59 }
 0xe27   : > { %5683 = vrsqrt.f32 %v4325_v13 }
 0xe31   : > { %v5684_v2 = vpop.eup %5683 }
 0xe32   : > { %v4327_v18 = vmul.f32 %v5684_v2, %v4271_v41  ;;  %v4328_v5 = vmul.f32 %v5684_v2, %v4272_v24  ;;  %v4329_v12 = vmul.f32 %v5684_v2, %v4273_v15  ;;  %v4330_v61 = vmul.f32 %v5684_v2, %v4274_v53 }
 0xe33   : > { %v4331_v36 = vmul.f32 %v5684_v2, %v4275_v25  ;;  %v4332_v44 = vmul.f32 %v5684_v2, %v4276_v48  ;;  %v4333_v9 = vmul.f32 %v5684_v2, %v4277_v40  ;;  %v4334_v33 = vmul.f32 %v5684_v2, %v4278_v42 }
 0xe34   : > { %v4335_v52 = vmul.f32 %v5684_v2, %v4279_v31  ;;  %v4336_v27 = vmul.f32 %v5684_v2, %v4280_v26  ;;  %v4337_v30 = vmul.f32 %v5684_v2, %v4281_v37  ;;  %v4338_v55 = vmul.f32 %v5684_v2, %v4282_v29  ;;  %4343 = vst [vmem:[%s8236_s24] sm:$0xff] %v4327_v18 }
 0xe35   : > { %4344 = vst [vmem:[%s8236_s24 + $0x8] sm:$0xff] %v4328_v5  ;;  %4345 = vst [vmem:[%s8236_s24 + $0x10] sm:$0xff] %v4329_v12  ;;  %v4339_v41 = vmul.f32 %v5684_v2, %v8217_v14  ;;  %v4340_v24 = vmul.f32 %v5684_v2, %v8219_v58  ;;  %v4341_v15 = vmul.f32 %v5684_v2, %v8221_v6 }
 0xe36   : > { %4346 = vst [vmem:[%s8236_s24 + $0x18] sm:$0xff] %v4330_v61  ;;  %v4342_v53 = vmul.f32 %v5684_v2, %v8223_v7  ;;  %4347 = vst [vmem:[%s8236_s24 + $0x20] sm:$0xff] %v4331_v36 }
 0xe37   : > { %4348 = vst [vmem:[%s8236_s24 + $0x28] sm:$0xff] %v4332_v44  ;;  %4349 = vst [vmem:[%s8236_s24 + $0x30] sm:$0xff] %v4333_v9 }
 0xe38   : > { %4350 = vst [vmem:[%s8236_s24 + $0x38] sm:$0xff] %v4334_v33  ;;  %4351 = vst [vmem:[%s8236_s24 + $0x40] sm:$0xff] %v4335_v52 }
 0xe39   : > { %4352 = vst [vmem:[%s8236_s24 + $0x48] sm:$0xff] %v4336_v27  ;;  %4353 = vst [vmem:[%s8236_s24 + $0x50] sm:$0xff] %v4337_v30 }
 0xe3a   : > { %4354 = vst [vmem:[%s8236_s24 + $0x58] sm:$0xff] %v4338_v55  ;;  %4355 = vst [vmem:[%s8236_s24 + $0x60] sm:$0xff] %v4339_v41 }
 0xe3b   : > { %4356 = vst [vmem:[%s8236_s24 + $0x68] sm:$0xff] %v4340_v24  ;;  %4357 = vst [vmem:[%s8236_s24 + $0x70] sm:$0xff] %v4341_v15 }
 0xe3c   : > { %4358 = vst [vmem:[%s8236_s24 + $0x78] sm:$0xff] %v4342_v53 }
 0xe3d   : > { %5970 = shalt.err (!%p5967_p12)
}
 0xe3e   : > { %s5971_s19 = scalar_lea.hbm %s8246_s16, 2048  ;;  %s5975_s23 = scalar_lea.hbm %s8634_s6, 4096 }
 0xe3f   : > { %p5972_p0 = scmp.ne.s32.totalorder %s8246_s16, %s5971_s19  ;;  %p5976_p8 = scmp.lt.u32.totalorder %s8246_s16, %s8634_s6 }
 0xe40   : > { %p5977_p5 = scmp.lt.u32.totalorder %s5975_s23, %s5971_s19  ;;  %p5979_p6 = scmp.lt.u32.totalorder %s5971_s19, %s8246_s16 }
 0xe41   : > { %p5973_p2 = pnand %p5972_p0, %p8636_p10 }
 0xe42   : > { %p5978_p11 = por %p5977_p5, %p5976_p8 }
 0xe43   : > { %p5974_p9 = pneg %p5973_p2 }
 0xe44   : > { %p5980_p7 = por %p5979_p6, %p5978_p11 }
 0xe46   : > { %p5981_p13 = pnand %p5980_p7, %p5974_p9 }
 0xe48   : > { %5984 = shalt.err (!%p5981_p13)
}
 0xe49   : > { %s6081_s26 = smov 128   ;;  %s6082_s4 = smov 8  }
 0xe4a   : > { %5263 = dma.vmem_to_hbm [thread:$0]  (%p8636_p10), %s8248_s0, 2048, %s8246_s16, %s4360_s29, %s6081_s26, %s6081_s26, %s6082_s4  }
 0xe4b PF: > { %s8637_s1 = sld [smem:[#allocation27_spill]]  ;;  %s8638_s30 = sld [smem:[#allocation32_spill]] }
 0xe4c   : > { %p8640_p4 = scmp.ge.s32.totalorder %s6047_s12, 2 }
 0xe51   : > { %s4388_s9 = sand.u32 1, %s8637_s1   ;;  %p8639_p1 = scmp.ne.s32.totalorder %s8638_s30, 0 }
 0xe52   : > { %s4389_s11 = scalar_lea.sflag [#allocation5], %s4388_s9 }
 0xe53   : > { %p5295_p3 = pnand %p8640_p4, %p8639_p1 }
 0xe55   : > { %6030 = dma.done.wait (!%p5295_p3), %s4389_s11, 2048  }
 0xe56   : > { %6032 = vsyncadd (!%p5295_p3), %s4389_s11, 4294965248  ;;  %s8641_s12 = sld [smem:[#allocation29_spill]]  ;;  %s8642_s24 = sld [smem:[#allocation28_spill]] }
 0xe57   : > { %s8643_s11 = sld [smem:[#allocation30_spill]]  ;;  %s8644_s30 = smov %s6039_s10 }
 0xe5c   : > { %p26_p12 = scmp.ge.s32.totalorder %s8641_s12, 4   ;;  %s8645_s10 = smov %s8642_s24 }
 0xe5e   :  { %28 = sbr.rel (!%p26_p12) target bundleno = 16 (0x10), region = 146 }
 0xe65   :  { %4394 = vsyncpa [#allocation4], 1 }
 0xe66   :  { %4396 = vsyncpa [#allocation4 + $0x1], 1 }
 0xe67   :  { %4397 = vsyncpa [#allocation7], 1 }
 0xe68   :  { %4398 = vsyncpa [#allocation11], 1 }
 0xe69   :  { %4399 = vsyncpa [#allocation14], 1 }
 0xe6a   :  { %4400 = vsyncpa [#allocation17], 1 }
 0xe6b   :  { %4401 = vsyncpa [#allocation5], 1 }
 0xe6c   :  { %4403 = vsyncpa [#allocation5 + $0x1], 1 }

</bundles_post_ra>
